<compile_context>
chip_gen: v7x
topology: tpu7x:2x2x1
jax: 0.10.0
libtpu: 0.0.40
codegen_flags: <defaults>
</compile_context>

<pallas_src>
import functools

import jax
import jax.numpy as jnp
import numpy as np
from jax.experimental import pallas as pl
from jax.experimental.pallas import tpu as pltpu

_LPAD = 8  # left W halo width -> interior stores start at a sublane-aligned offset


def _residual_block_kernel(x_ref, w1_ref, b1_ref, w2_ref, b2_ref, o_ref, pad_ref, *, H, W):
    """One batch element per grid step; both convs fused, intermediate stays in VMEM."""
    Cp = pad_ref.shape[2]        # lane-padded channel count (multiple of 128)
    cdt = pad_ref.dtype          # MXU compute dtype (f32 or bf16)
    WP = W + _LPAD + 1           # padded scratch width

    # Zero ONLY the halo frame actually read by the taps (rows 0 / H+1 and the two 1-wide
    # columns).  The interior is fully overwritten below every step, and the frame is never
    # written anywhere else.  This is done per step (cheap, ~a few vregs) so it stays correct
    # when the "parallel" grid axis is split across TensorCores (program_id(0)==0 never runs
    # on the second core).
    pad_ref[0:1, :, :] = jnp.zeros((1, WP, Cp), cdt)
    pad_ref[H + 1:H + 2, :, :] = jnp.zeros((1, WP, Cp), cdt)
    pad_ref[1:H + 1, _LPAD - 1:_LPAD, :] = jnp.zeros((H, 1, Cp), cdt)
    pad_ref[1:H + 1, _LPAD + W:_LPAD + W + 1, :] = jnp.zeros((H, 1, Cp), cdt)

    def conv3x3_bias(w_ref_, b_ref_):
        # 9 shifted MXU dots straight off the scratch ref: M = H*W, K = Cp (>=128), N = Cp.
        acc = None
        for t in range(9):
            kh, kw = divmod(t, 3)
            c0 = _LPAD - 1 + kw
            tap = pad_ref[kh:kh + H, c0:c0 + W, :].reshape(H * W, Cp)
            d = jnp.dot(tap, w_ref_[t], preferred_element_type=jnp.float32)
            acc = d if acc is None else acc + d
        return acc + b_ref_[...]                                 # folded BN shift + conv bias

    # layer_1: conv + BN + ReLU (input tile -> padded scratch, interior store is lane/sublane
    # aligned: starts at W offset _LPAD, full Cp lanes).
    pad_ref[1:H + 1, _LPAD:_LPAD + W, :] = x_ref[0].astype(cdt)
    y1 = jnp.maximum(conv3x3_bias(w1_ref, b1_ref), 0.0)          # (H*W, Cp) f32

    # layer_2: conv + BN; the intermediate never leaves VMEM.
    pad_ref[1:H + 1, _LPAD:_LPAD + W, :] = y1.reshape(H, W, Cp).astype(cdt)
    y2 = conv3x3_bias(w2_ref, b2_ref).reshape(H, W, Cp)

    # Residual (re-read from the still-resident input block, kept f32) + final ReLU.
    y2 = y2 + x_ref[0].astype(jnp.float32)
    o_ref[0] = jnp.maximum(y2, 0.0).astype(o_ref.dtype)


def _round_up(x, m):
    return (x + m - 1) // m * m


def _fold_conv_bn(w_oihw, conv_bias, gamma, beta, mean, var, eps, cp, compute_dtype):
    """Fold eval-mode BN into the conv: scale -> weights, shift + conv bias -> bias.

    Returns weights as (9, Cpad, Cpad) (per-tap, zero-padded to lane-dense channels) and the
    bias as (1, Cpad) f32.
    """
    cout, cin = w_oihw.shape[0], w_oihw.shape[1]
    s = gamma / jnp.sqrt(var + eps)                              # (Cout,)
    w = jnp.transpose(w_oihw, (2, 3, 1, 0)) * s                  # OIHW -> (3,3,Cin,Cout), scaled
    w = w.reshape(9, cin, cout)
    w = jnp.pad(w, ((0, 0), (0, cp - cin), (0, cp - cout))).astype(compute_dtype)
    b = (conv_bias - mean) * s + beta                            # (Cout,)
    b = jnp.pad(b, (0, cp - cout)).reshape(1, cp).astype(jnp.float32)
    return w, b


def residual_block(x_nchw, params, *, compute_dtype=jnp.bfloat16, eps=1e-5):
    """Forward pass of ResidualBlock (stride=1, padding=1, down_sample=None)."""
    N, C, H, W = x_nchw.shape
    assert params["w1"].shape[0] == C and params["w1"].shape[1] == C, \
        "identity shortcut requires in_channel == out_channel (no down_sample)"

    Cp = _round_up(C, 128)                                       # lane-dense channels
    x = jnp.transpose(x_nchw, (0, 2, 3, 1))                      # NCHW -> NHWC
    if Cp != C:
        x = jnp.pad(x, ((0, 0), (0, 0), (0, 0), (0, Cp - C)))    # zero-pad channels

    w1, b1 = _fold_conv_bn(params["w1"], params["b1"], params["g1"], params["beta1"],
                           params["m1"], params["v1"], eps, Cp, compute_dtype)
    w2, b2 = _fold_conv_bn(params["w2"], params["b2"], params["g2"], params["beta2"],
                           params["m2"], params["v2"], eps, Cp, compute_dtype)

    kern = functools.partial(_residual_block_kernel, H=H, W=W)
    out = pl.pallas_call(
        kern,
        out_shape=jax.ShapeDtypeStruct((N, H, W, Cp), x.dtype),
        grid=(N,),
        in_specs=[
            pl.BlockSpec((1, H, W, Cp), lambda n: (n, 0, 0, 0)),  # activation tile
            pl.BlockSpec((9, Cp, Cp), lambda n: (0, 0, 0)),       # folded conv1 weights (per tap)
            pl.BlockSpec((1, Cp), lambda n: (0, 0)),              # folded conv1 bias
            pl.BlockSpec((9, Cp, Cp), lambda n: (0, 0, 0)),       # folded conv2 weights (per tap)
            pl.BlockSpec((1, Cp), lambda n: (0, 0)),              # folded conv2 bias
        ],
        out_specs=pl.BlockSpec((1, H, W, Cp), lambda n: (n, 0, 0, 0)),
        scratch_shapes=[
            # zero-halo padded tile; left W halo of _LPAD keeps interior stores sublane-aligned
            pltpu.VMEM((H + 2, W + _LPAD + 1, Cp), compute_dtype),
        ],
        compiler_params=pltpu.CompilerParams(
            dimension_semantics=("parallel",),                    # v7x: images split across TCs
            vmem_limit_bytes=32 * 1024 * 1024,                    # explicit (v5e default is 16 MiB)
        ),
    )(x, w1, b1, w2, b2)

    out = out[..., :C]                                            # drop lane padding
    return jnp.transpose(out, (0, 3, 1, 2))                       # NHWC -> NCHW


def _reference(x_nchw, params, eps=1e-5):
    """Pure-JAX reference (mirrors the PyTorch forward in eval mode)."""
    def conv(x, w, b):
        y = jax.lax.conv_general_dilated(
            x, w, window_strides=(1, 1), padding=((1, 1), (1, 1)),
            dimension_numbers=("NCHW", "OIHW", "NCHW"))
        return y + b.reshape(1, -1, 1, 1)

    def bn(x, g, bt, m, v):
        return (x - m.reshape(1, -1, 1, 1)) / jnp.sqrt(v.reshape(1, -1, 1, 1) + eps) \
            * g.reshape(1, -1, 1, 1) + bt.reshape(1, -1, 1, 1)

    out = jax.nn.relu(bn(conv(x_nchw, params["w1"], params["b1"]),
                         params["g1"], params["beta1"], params["m1"], params["v1"]))
    out = bn(conv(out, params["w2"], params["b2"]),
             params["g2"], params["beta2"], params["m2"], params["v2"])
    return jax.nn.relu(out + x_nchw)


if __name__ == "__main__":
    N, C, H, W = 2, 4, 16, 16                                     # in_channel == out_channel
    key = jax.random.PRNGKey(0)
    ks = jax.random.split(key, 13)

    x = jax.random.normal(ks[0], (N, C, H, W), jnp.float32)

    params = {
        # layer_1: Conv2d(C, C, 3) + BatchNorm2d(C)
        "w1": jax.random.normal(ks[1], (C, C, 3, 3), jnp.float32) * 0.2,
        "b1": jax.random.normal(ks[2], (C,), jnp.float32) * 0.1,
        "g1": 1.0 + 0.1 * jax.random.normal(ks[3], (C,), jnp.float32),
        "beta1": 0.1 * jax.random.normal(ks[4], (C,), jnp.float32),
        "m1": 0.1 * jax.random.normal(ks[5], (C,), jnp.float32),
        "v1": jax.nn.softplus(jax.random.normal(ks[6], (C,), jnp.float32)) + 0.5,
        # layer_2: Conv2d(C, C, 3) + BatchNorm2d(C)
        "w2": jax.random.normal(ks[7], (C, C, 3, 3), jnp.float32) * 0.2,
        "b2": jax.random.normal(ks[8], (C,), jnp.float32) * 0.1,
        "g2": 1.0 + 0.1 * jax.random.normal(ks[9], (C,), jnp.float32),
        "beta2": 0.1 * jax.random.normal(ks[10], (C,), jnp.float32),
        "m2": 0.1 * jax.random.normal(ks[11], (C,), jnp.float32),
        "v2": jax.nn.softplus(jax.random.normal(ks[12], (C,), jnp.float32)) + 0.5,
    }

    ref = jax.block_until_ready(_reference(x, params))

    # f32 MXU path: exact match to the reference.
    out_f32 = jax.block_until_ready(residual_block(x, params, compute_dtype=jnp.float32))
    assert out_f32.shape == (N, C, H, W), out_f32.shape
    np.testing.assert_allclose(np.asarray(out_f32), np.asarray(ref), rtol=1e-4, atol=1e-4)

    # bf16 MXU path (default; f32 accumulation / epilogue): loose tolerance.
    out_bf16 = jax.block_until_ready(residual_block(x, params))
    np.testing.assert_allclose(np.asarray(out_bf16), np.asarray(ref), rtol=1e-1, atol=1e-1)

    print("KERNEL_OK")
</pallas_src>

<mosaic_0001>
module attributes {stable_mosaic.version = 11 : i64} {
  func.func @_residual_block_kernel(%arg0: i32, %arg1: memref<1x16x16x128xf32, #tpu.memory_space<vmem>>, %arg2: memref<9x128x128xf32, #tpu.memory_space<vmem>>, %arg3: memref<1x128xf32, #tpu.memory_space<vmem>>, %arg4: memref<9x128x128xf32, #tpu.memory_space<vmem>>, %arg5: memref<1x128xf32, #tpu.memory_space<vmem>>, %arg6: memref<1x16x16x128xf32, #tpu.memory_space<vmem>>, %arg7: memref<18x25x128xf32, #tpu.memory_space<vmem>>) attributes {dimension_semantics = [#tpu.dimension_semantics<parallel>], iteration_bounds = array<i64: 2>, scalar_prefetch = 0 : i64, scratch_operands = 1 : i64, tpu.core_type = #tpu.core_type<tc>, window_params = [{transform_indices = @transform_0, window_bounds = array<i64: 1, 16, 16, 128>}, {pipeline_mode = #tpu.pipeline_mode<synchronous>, transform_indices = @transform_1, window_bounds = array<i64: 9, 128, 128>}, {pipeline_mode = #tpu.pipeline_mode<synchronous>, transform_indices = @transform_2, window_bounds = array<i64: 1, 128>}, {pipeline_mode = #tpu.pipeline_mode<synchronous>, transform_indices = @transform_3, window_bounds = array<i64: 9, 128, 128>}, {pipeline_mode = #tpu.pipeline_mode<synchronous>, transform_indices = @transform_4, window_bounds = array<i64: 1, 128>}, {transform_indices = @transform_5, window_bounds = array<i64: 1, 16, 16, 128>}]} {
    %cst = arith.constant 0.000000e+00 : f32
    %0 = vector.broadcast %cst : f32 to vector<1x25x128xf32>
    %c0 = arith.constant 0 : index
    %c0_0 = arith.constant 0 : index
    %c0_1 = arith.constant 0 : index
    %1 = vector.load %arg7[%c0, %c0_0, %c0_1] : memref<18x25x128xf32, #tpu.memory_space<vmem>>, vector<1x25x128xf32>
    tpu.vector_store %arg7[%c0, %c0_0, %c0_1], %0 {strides = array<i32>} : memref<18x25x128xf32, #tpu.memory_space<vmem>>, vector<1x25x128xf32>,
    %cst_2 = arith.constant 0.000000e+00 : f32
    %2 = vector.broadcast %cst_2 : f32 to vector<1x25x128xf32>
    %c17 = arith.constant 17 : index
    %c0_3 = arith.constant 0 : index
    %c0_4 = arith.constant 0 : index
    %3 = vector.load %arg7[%c17, %c0_3, %c0_4] : memref<18x25x128xf32, #tpu.memory_space<vmem>>, vector<1x25x128xf32>
    tpu.vector_store %arg7[%c17, %c0_3, %c0_4], %2 {strides = array<i32>} : memref<18x25x128xf32, #tpu.memory_space<vmem>>, vector<1x25x128xf32>,
    %cst_5 = arith.constant 0.000000e+00 : f32
    %4 = vector.broadcast %cst_5 : f32 to vector<16x1x128xf32>
    %c1 = arith.constant 1 : index
    %c7 = arith.constant 7 : index
    %c0_6 = arith.constant 0 : index
    %5 = vector.load %arg7[%c1, %c7, %c0_6] : memref<18x25x128xf32, #tpu.memory_space<vmem>>, vector<16x1x128xf32>
    tpu.vector_store %arg7[%c1, %c7, %c0_6], %4 {strides = array<i32>} : memref<18x25x128xf32, #tpu.memory_space<vmem>>, vector<16x1x128xf32>,
    %cst_7 = arith.constant 0.000000e+00 : f32
    %6 = vector.broadcast %cst_7 : f32 to vector<16x1x128xf32>
    %c1_8 = arith.constant 1 : index
    %c24 = arith.constant 24 : index
    %c0_9 = arith.constant 0 : index
    %7 = vector.load %arg7[%c1_8, %c24, %c0_9] : memref<18x25x128xf32, #tpu.memory_space<vmem>>, vector<16x1x128xf32>
    tpu.vector_store %arg7[%c1_8, %c24, %c0_9], %6 {strides = array<i32>} : memref<18x25x128xf32, #tpu.memory_space<vmem>>, vector<16x1x128xf32>,
    %c0_10 = arith.constant 0 : index
    %c0_11 = arith.constant 0 : index
    %c0_12 = arith.constant 0 : index
    %c0_13 = arith.constant 0 : index
    %8 = vector.load %arg1[%c0_10, %c0_11, %c0_12, %c0_13] : memref<1x16x16x128xf32, #tpu.memory_space<vmem>>, vector<1x16x16x128xf32>
    %9 = vector.shape_cast %8 : vector<1x16x16x128xf32> to vector<16x16x128xf32>
    %c1_14 = arith.constant 1 : index
    %c8 = arith.constant 8 : index
    %c0_15 = arith.constant 0 : index
    %10 = vector.load %arg7[%c1_14, %c8, %c0_15] : memref<18x25x128xf32, #tpu.memory_space<vmem>>, vector<16x16x128xf32>
    tpu.vector_store %arg7[%c1_14, %c8, %c0_15], %9 {strides = array<i32>} : memref<18x25x128xf32, #tpu.memory_space<vmem>>, vector<16x16x128xf32>,
    %c0_16 = arith.constant 0 : index
    %c7_17 = arith.constant 7 : index
    %c0_18 = arith.constant 0 : index
    %11 = vector.load %arg7[%c0_16, %c7_17, %c0_18] : memref<18x25x128xf32, #tpu.memory_space<vmem>>, vector<16x16x128xf32>
    %12 = vector.shape_cast %11 : vector<16x16x128xf32> to vector<256x128xf32>
    %c0_19 = arith.constant 0 : index
    %c0_20 = arith.constant 0 : index
    %c0_21 = arith.constant 0 : index
    %13 = vector.load %arg2[%c0_19, %c0_20, %c0_21] : memref<9x128x128xf32, #tpu.memory_space<vmem>>, vector<1x128x128xf32>
    %14 = vector.shape_cast %13 : vector<1x128x128xf32> to vector<128x128xf32>
    %cst_22 = arith.constant dense<0.000000e+00> : vector<256x128xf32>
    %15 = tpu.matmul %12, %14, %cst_22 {dimension_numbers = #tpu.dot_dimension_numbers<[1], [0], [0], [1], [0, 0, 1, 1], [], []>} : vector<256x128xf32>, vector<128x128xf32>, vector<256x128xf32> -> vector<256x128xf32>
    %c0_23 = arith.constant 0 : index
    %c8_24 = arith.constant 8 : index
    %c0_25 = arith.constant 0 : index
    %16 = vector.load %arg7[%c0_23, %c8_24, %c0_25] : memref<18x25x128xf32, #tpu.memory_space<vmem>>, vector<16x16x128xf32>
    %17 = vector.shape_cast %16 : vector<16x16x128xf32> to vector<256x128xf32>
    %c1_26 = arith.constant 1 : index
    %c0_27 = arith.constant 0 : index
    %c0_28 = arith.constant 0 : index
    %18 = vector.load %arg2[%c1_26, %c0_27, %c0_28] : memref<9x128x128xf32, #tpu.memory_space<vmem>>, vector<1x128x128xf32>
    %19 = vector.shape_cast %18 : vector<1x128x128xf32> to vector<128x128xf32>
    %cst_29 = arith.constant dense<0.000000e+00> : vector<256x128xf32>
    %20 = tpu.matmul %17, %19, %cst_29 {dimension_numbers = #tpu.dot_dimension_numbers<[1], [0], [0], [1], [0, 0, 1, 1], [], []>} : vector<256x128xf32>, vector<128x128xf32>, vector<256x128xf32> -> vector<256x128xf32>
    %21 = arith.addf %15, %20 : vector<256x128xf32>
    %c0_30 = arith.constant 0 : index
    %c9 = arith.constant 9 : index
    %c0_31 = arith.constant 0 : index
    %22 = vector.load %arg7[%c0_30, %c9, %c0_31] : memref<18x25x128xf32, #tpu.memory_space<vmem>>, vector<16x16x128xf32>
    %23 = vector.shape_cast %22 : vector<16x16x128xf32> to vector<256x128xf32>
    %c2 = arith.constant 2 : index
    %c0_32 = arith.constant 0 : index
    %c0_33 = arith.constant 0 : index
    %24 = vector.load %arg2[%c2, %c0_32, %c0_33] : memref<9x128x128xf32, #tpu.memory_space<vmem>>, vector<1x128x128xf32>
    %25 = vector.shape_cast %24 : vector<1x128x128xf32> to vector<128x128xf32>
    %cst_34 = arith.constant dense<0.000000e+00> : vector<256x128xf32>
    %26 = tpu.matmul %23, %25, %cst_34 {dimension_numbers = #tpu.dot_dimension_numbers<[1], [0], [0], [1], [0, 0, 1, 1], [], []>} : vector<256x128xf32>, vector<128x128xf32>, vector<256x128xf32> -> vector<256x128xf32>
    %27 = arith.addf %21, %26 : vector<256x128xf32>
    %c1_35 = arith.constant 1 : index
    %c7_36 = arith.constant 7 : index
    %c0_37 = arith.constant 0 : index
    %28 = vector.load %arg7[%c1_35, %c7_36, %c0_37] : memref<18x25x128xf32, #tpu.memory_space<vmem>>, vector<16x16x128xf32>
    %29 = vector.shape_cast %28 : vector<16x16x128xf32> to vector<256x128xf32>
    %c3 = arith.constant 3 : index
    %c0_38 = arith.constant 0 : index
    %c0_39 = arith.constant 0 : index
    %30 = vector.load %arg2[%c3, %c0_38, %c0_39] : memref<9x128x128xf32, #tpu.memory_space<vmem>>, vector<1x128x128xf32>
    %31 = vector.shape_cast %30 : vector<1x128x128xf32> to vector<128x128xf32>
    %cst_40 = arith.constant dense<0.000000e+00> : vector<256x128xf32>
    %32 = tpu.matmul %29, %31, %cst_40 {dimension_numbers = #tpu.dot_dimension_numbers<[1], [0], [0], [1], [0, 0, 1, 1], [], []>} : vector<256x128xf32>, vector<128x128xf32>, vector<256x128xf32> -> vector<256x128xf32>
    %33 = arith.addf %27, %32 : vector<256x128xf32>
    %c1_41 = arith.constant 1 : index
    %c8_42 = arith.constant 8 : index
    %c0_43 = arith.constant 0 : index
    %34 = vector.load %arg7[%c1_41, %c8_42, %c0_43] : memref<18x25x128xf32, #tpu.memory_space<vmem>>, vector<16x16x128xf32>
    %35 = vector.shape_cast %34 : vector<16x16x128xf32> to vector<256x128xf32>
    %c4 = arith.constant 4 : index
    %c0_44 = arith.constant 0 : index
    %c0_45 = arith.constant 0 : index
    %36 = vector.load %arg2[%c4, %c0_44, %c0_45] : memref<9x128x128xf32, #tpu.memory_space<vmem>>, vector<1x128x128xf32>
    %37 = vector.shape_cast %36 : vector<1x128x128xf32> to vector<128x128xf32>
    %cst_46 = arith.constant dense<0.000000e+00> : vector<256x128xf32>
    %38 = tpu.matmul %35, %37, %cst_46 {dimension_numbers = #tpu.dot_dimension_numbers<[1], [0], [0], [1], [0, 0, 1, 1], [], []>} : vector<256x128xf32>, vector<128x128xf32>, vector<256x128xf32> -> vector<256x128xf32>
    %39 = arith.addf %33, %38 : vector<256x128xf32>
    %c1_47 = arith.constant 1 : index
    %c9_48 = arith.constant 9 : index
    %c0_49 = arith.constant 0 : index
    %40 = vector.load %arg7[%c1_47, %c9_48, %c0_49] : memref<18x25x128xf32, #tpu.memory_space<vmem>>, vector<16x16x128xf32>
    %41 = vector.shape_cast %40 : vector<16x16x128xf32> to vector<256x128xf32>
    %c5 = arith.constant 5 : index
    %c0_50 = arith.constant 0 : index
    %c0_51 = arith.constant 0 : index
    %42 = vector.load %arg2[%c5, %c0_50, %c0_51] : memref<9x128x128xf32, #tpu.memory_space<vmem>>, vector<1x128x128xf32>
    %43 = vector.shape_cast %42 : vector<1x128x128xf32> to vector<128x128xf32>
    %cst_52 = arith.constant dense<0.000000e+00> : vector<256x128xf32>
    %44 = tpu.matmul %41, %43, %cst_52 {dimension_numbers = #tpu.dot_dimension_numbers<[1], [0], [0], [1], [0, 0, 1, 1], [], []>} : vector<256x128xf32>, vector<128x128xf32>, vector<256x128xf32> -> vector<256x128xf32>
    %45 = arith.addf %39, %44 : vector<256x128xf32>
    %c2_53 = arith.constant 2 : index
    %c7_54 = arith.constant 7 : index
    %c0_55 = arith.constant 0 : index
    %46 = vector.load %arg7[%c2_53, %c7_54, %c0_55] : memref<18x25x128xf32, #tpu.memory_space<vmem>>, vector<16x16x128xf32>
    %47 = vector.shape_cast %46 : vector<16x16x128xf32> to vector<256x128xf32>
    %c6 = arith.constant 6 : index
    %c0_56 = arith.constant 0 : index
    %c0_57 = arith.constant 0 : index
    %48 = vector.load %arg2[%c6, %c0_56, %c0_57] : memref<9x128x128xf32, #tpu.memory_space<vmem>>, vector<1x128x128xf32>
    %49 = vector.shape_cast %48 : vector<1x128x128xf32> to vector<128x128xf32>
    %cst_58 = arith.constant dense<0.000000e+00> : vector<256x128xf32>
    %50 = tpu.matmul %47, %49, %cst_58 {dimension_numbers = #tpu.dot_dimension_numbers<[1], [0], [0], [1], [0, 0, 1, 1], [], []>} : vector<256x128xf32>, vector<128x128xf32>, vector<256x128xf32> -> vector<256x128xf32>
    %51 = arith.addf %45, %50 : vector<256x128xf32>
    %c2_59 = arith.constant 2 : index
    %c8_60 = arith.constant 8 : index
    %c0_61 = arith.constant 0 : index
    %52 = vector.load %arg7[%c2_59, %c8_60, %c0_61] : memref<18x25x128xf32, #tpu.memory_space<vmem>>, vector<16x16x128xf32>
    %53 = vector.shape_cast %52 : vector<16x16x128xf32> to vector<256x128xf32>
    %c7_62 = arith.constant 7 : index
    %c0_63 = arith.constant 0 : index
    %c0_64 = arith.constant 0 : index
    %54 = vector.load %arg2[%c7_62, %c0_63, %c0_64] : memref<9x128x128xf32, #tpu.memory_space<vmem>>, vector<1x128x128xf32>
    %55 = vector.shape_cast %54 : vector<1x128x128xf32> to vector<128x128xf32>
    %cst_65 = arith.constant dense<0.000000e+00> : vector<256x128xf32>
    %56 = tpu.matmul %53, %55, %cst_65 {dimension_numbers = #tpu.dot_dimension_numbers<[1], [0], [0], [1], [0, 0, 1, 1], [], []>} : vector<256x128xf32>, vector<128x128xf32>, vector<256x128xf32> -> vector<256x128xf32>
    %57 = arith.addf %51, %56 : vector<256x128xf32>
    %c2_66 = arith.constant 2 : index
    %c9_67 = arith.constant 9 : index
    %c0_68 = arith.constant 0 : index
    %58 = vector.load %arg7[%c2_66, %c9_67, %c0_68] : memref<18x25x128xf32, #tpu.memory_space<vmem>>, vector<16x16x128xf32>
    %59 = vector.shape_cast %58 : vector<16x16x128xf32> to vector<256x128xf32>
    %c8_69 = arith.constant 8 : index
    %c0_70 = arith.constant 0 : index
    %c0_71 = arith.constant 0 : index
    %60 = vector.load %arg2[%c8_69, %c0_70, %c0_71] : memref<9x128x128xf32, #tpu.memory_space<vmem>>, vector<1x128x128xf32>
    %61 = vector.shape_cast %60 : vector<1x128x128xf32> to vector<128x128xf32>
    %cst_72 = arith.constant dense<0.000000e+00> : vector<256x128xf32>
    %62 = tpu.matmul %59, %61, %cst_72 {dimension_numbers = #tpu.dot_dimension_numbers<[1], [0], [0], [1], [0, 0, 1, 1], [], []>} : vector<256x128xf32>, vector<128x128xf32>, vector<256x128xf32> -> vector<256x128xf32>
    %63 = arith.addf %57, %62 : vector<256x128xf32>
    %c0_73 = arith.constant 0 : index
    %c0_74 = arith.constant 0 : index
    %64 = vector.load %arg3[%c0_73, %c0_74] : memref<1x128xf32, #tpu.memory_space<vmem>>, vector<1x128xf32>
    %65 = vector.broadcast %64 : vector<1x128xf32> to vector<256x128xf32>
    %66 = arith.addf %63, %65 : vector<256x128xf32>
    %cst_75 = arith.constant 0.000000e+00 : f32
    %67 = vector.broadcast %cst_75 : f32 to vector<256x128xf32>
    %68 = arith.maximumf %66, %67 : vector<256x128xf32>
    %69 = vector.shape_cast %68 : vector<256x128xf32> to vector<16x16x128xf32>
    %c1_76 = arith.constant 1 : index
    %c8_77 = arith.constant 8 : index
    %c0_78 = arith.constant 0 : index
    %70 = vector.load %arg7[%c1_76, %c8_77, %c0_78] : memref<18x25x128xf32, #tpu.memory_space<vmem>>, vector<16x16x128xf32>
    tpu.vector_store %arg7[%c1_76, %c8_77, %c0_78], %69 {strides = array<i32>} : memref<18x25x128xf32, #tpu.memory_space<vmem>>, vector<16x16x128xf32>,
    %c0_79 = arith.constant 0 : index
    %c7_80 = arith.constant 7 : index
    %c0_81 = arith.constant 0 : index
    %71 = vector.load %arg7[%c0_79, %c7_80, %c0_81] : memref<18x25x128xf32, #tpu.memory_space<vmem>>, vector<16x16x128xf32>
    %72 = vector.shape_cast %71 : vector<16x16x128xf32> to vector<256x128xf32>
    %c0_82 = arith.constant 0 : index
    %c0_83 = arith.constant 0 : index
    %c0_84 = arith.constant 0 : index
    %73 = vector.load %arg4[%c0_82, %c0_83, %c0_84] : memref<9x128x128xf32, #tpu.memory_space<vmem>>, vector<1x128x128xf32>
    %74 = vector.shape_cast %73 : vector<1x128x128xf32> to vector<128x128xf32>
    %cst_85 = arith.constant dense<0.000000e+00> : vector<256x128xf32>
    %75 = tpu.matmul %72, %74, %cst_85 {dimension_numbers = #tpu.dot_dimension_numbers<[1], [0], [0], [1], [0, 0, 1, 1], [], []>} : vector<256x128xf32>, vector<128x128xf32>, vector<256x128xf32> -> vector<256x128xf32>
    %c0_86 = arith.constant 0 : index
    %c8_87 = arith.constant 8 : index
    %c0_88 = arith.constant 0 : index
    %76 = vector.load %arg7[%c0_86, %c8_87, %c0_88] : memref<18x25x128xf32, #tpu.memory_space<vmem>>, vector<16x16x128xf32>
    %77 = vector.shape_cast %76 : vector<16x16x128xf32> to vector<256x128xf32>
    %c1_89 = arith.constant 1 : index
    %c0_90 = arith.constant 0 : index
    %c0_91 = arith.constant 0 : index
    %78 = vector.load %arg4[%c1_89, %c0_90, %c0_91] : memref<9x128x128xf32, #tpu.memory_space<vmem>>, vector<1x128x128xf32>
    %79 = vector.shape_cast %78 : vector<1x128x128xf32> to vector<128x128xf32>
    %cst_92 = arith.constant dense<0.000000e+00> : vector<256x128xf32>
    %80 = tpu.matmul %77, %79, %cst_92 {dimension_numbers = #tpu.dot_dimension_numbers<[1], [0], [0], [1], [0, 0, 1, 1], [], []>} : vector<256x128xf32>, vector<128x128xf32>, vector<256x128xf32> -> vector<256x128xf32>
    %81 = arith.addf %75, %80 : vector<256x128xf32>
    %c0_93 = arith.constant 0 : index
    %c9_94 = arith.constant 9 : index
    %c0_95 = arith.constant 0 : index
    %82 = vector.load %arg7[%c0_93, %c9_94, %c0_95] : memref<18x25x128xf32, #tpu.memory_space<vmem>>, vector<16x16x128xf32>
    %83 = vector.shape_cast %82 : vector<16x16x128xf32> to vector<256x128xf32>
    %c2_96 = arith.constant 2 : index
    %c0_97 = arith.constant 0 : index
    %c0_98 = arith.constant 0 : index
    %84 = vector.load %arg4[%c2_96, %c0_97, %c0_98] : memref<9x128x128xf32, #tpu.memory_space<vmem>>, vector<1x128x128xf32>
    %85 = vector.shape_cast %84 : vector<1x128x128xf32> to vector<128x128xf32>
    %cst_99 = arith.constant dense<0.000000e+00> : vector<256x128xf32>
    %86 = tpu.matmul %83, %85, %cst_99 {dimension_numbers = #tpu.dot_dimension_numbers<[1], [0], [0], [1], [0, 0, 1, 1], [], []>} : vector<256x128xf32>, vector<128x128xf32>, vector<256x128xf32> -> vector<256x128xf32>
    %87 = arith.addf %81, %86 : vector<256x128xf32>
    %c1_100 = arith.constant 1 : index
    %c7_101 = arith.constant 7 : index
    %c0_102 = arith.constant 0 : index
    %88 = vector.load %arg7[%c1_100, %c7_101, %c0_102] : memref<18x25x128xf32, #tpu.memory_space<vmem>>, vector<16x16x128xf32>
    %89 = vector.shape_cast %88 : vector<16x16x128xf32> to vector<256x128xf32>
    %c3_103 = arith.constant 3 : index
    %c0_104 = arith.constant 0 : index
    %c0_105 = arith.constant 0 : index
    %90 = vector.load %arg4[%c3_103, %c0_104, %c0_105] : memref<9x128x128xf32, #tpu.memory_space<vmem>>, vector<1x128x128xf32>
    %91 = vector.shape_cast %90 : vector<1x128x128xf32> to vector<128x128xf32>
    %cst_106 = arith.constant dense<0.000000e+00> : vector<256x128xf32>
    %92 = tpu.matmul %89, %91, %cst_106 {dimension_numbers = #tpu.dot_dimension_numbers<[1], [0], [0], [1], [0, 0, 1, 1], [], []>} : vector<256x128xf32>, vector<128x128xf32>, vector<256x128xf32> -> vector<256x128xf32>
    %93 = arith.addf %87, %92 : vector<256x128xf32>
    %c1_107 = arith.constant 1 : index
    %c8_108 = arith.constant 8 : index
    %c0_109 = arith.constant 0 : index
    %94 = vector.load %arg7[%c1_107, %c8_108, %c0_109] : memref<18x25x128xf32, #tpu.memory_space<vmem>>, vector<16x16x128xf32>
    %95 = vector.shape_cast %94 : vector<16x16x128xf32> to vector<256x128xf32>
    %c4_110 = arith.constant 4 : index
    %c0_111 = arith.constant 0 : index
    %c0_112 = arith.constant 0 : index
    %96 = vector.load %arg4[%c4_110, %c0_111, %c0_112] : memref<9x128x128xf32, #tpu.memory_space<vmem>>, vector<1x128x128xf32>
    %97 = vector.shape_cast %96 : vector<1x128x128xf32> to vector<128x128xf32>
    %cst_113 = arith.constant dense<0.000000e+00> : vector<256x128xf32>
    %98 = tpu.matmul %95, %97, %cst_113 {dimension_numbers = #tpu.dot_dimension_numbers<[1], [0], [0], [1], [0, 0, 1, 1], [], []>} : vector<256x128xf32>, vector<128x128xf32>, vector<256x128xf32> -> vector<256x128xf32>
    %99 = arith.addf %93, %98 : vector<256x128xf32>
    %c1_114 = arith.constant 1 : index
    %c9_115 = arith.constant 9 : index
    %c0_116 = arith.constant 0 : index
    %100 = vector.load %arg7[%c1_114, %c9_115, %c0_116] : memref<18x25x128xf32, #tpu.memory_space<vmem>>, vector<16x16x128xf32>
    %101 = vector.shape_cast %100 : vector<16x16x128xf32> to vector<256x128xf32>
    %c5_117 = arith.constant 5 : index
    %c0_118 = arith.constant 0 : index
    %c0_119 = arith.constant 0 : index
    %102 = vector.load %arg4[%c5_117, %c0_118, %c0_119] : memref<9x128x128xf32, #tpu.memory_space<vmem>>, vector<1x128x128xf32>
    %103 = vector.shape_cast %102 : vector<1x128x128xf32> to vector<128x128xf32>
    %cst_120 = arith.constant dense<0.000000e+00> : vector<256x128xf32>
    %104 = tpu.matmul %101, %103, %cst_120 {dimension_numbers = #tpu.dot_dimension_numbers<[1], [0], [0], [1], [0, 0, 1, 1], [], []>} : vector<256x128xf32>, vector<128x128xf32>, vector<256x128xf32> -> vector<256x128xf32>
    %105 = arith.addf %99, %104 : vector<256x128xf32>
    %c2_121 = arith.constant 2 : index
    %c7_122 = arith.constant 7 : index
    %c0_123 = arith.constant 0 : index
    %106 = vector.load %arg7[%c2_121, %c7_122, %c0_123] : memref<18x25x128xf32, #tpu.memory_space<vmem>>, vector<16x16x128xf32>
    %107 = vector.shape_cast %106 : vector<16x16x128xf32> to vector<256x128xf32>
    %c6_124 = arith.constant 6 : index
    %c0_125 = arith.constant 0 : index
    %c0_126 = arith.constant 0 : index
    %108 = vector.load %arg4[%c6_124, %c0_125, %c0_126] : memref<9x128x128xf32, #tpu.memory_space<vmem>>, vector<1x128x128xf32>
    %109 = vector.shape_cast %108 : vector<1x128x128xf32> to vector<128x128xf32>
    %cst_127 = arith.constant dense<0.000000e+00> : vector<256x128xf32>
    %110 = tpu.matmul %107, %109, %cst_127 {dimension_numbers = #tpu.dot_dimension_numbers<[1], [0], [0], [1], [0, 0, 1, 1], [], []>} : vector<256x128xf32>, vector<128x128xf32>, vector<256x128xf32> -> vector<256x128xf32>
    %111 = arith.addf %105, %110 : vector<256x128xf32>
    %c2_128 = arith.constant 2 : index
    %c8_129 = arith.constant 8 : index
    %c0_130 = arith.constant 0 : index
    %112 = vector.load %arg7[%c2_128, %c8_129, %c0_130] : memref<18x25x128xf32, #tpu.memory_space<vmem>>, vector<16x16x128xf32>
    %113 = vector.shape_cast %112 : vector<16x16x128xf32> to vector<256x128xf32>
    %c7_131 = arith.constant 7 : index
    %c0_132 = arith.constant 0 : index
    %c0_133 = arith.constant 0 : index
    %114 = vector.load %arg4[%c7_131, %c0_132, %c0_133] : memref<9x128x128xf32, #tpu.memory_space<vmem>>, vector<1x128x128xf32>
    %115 = vector.shape_cast %114 : vector<1x128x128xf32> to vector<128x128xf32>
    %cst_134 = arith.constant dense<0.000000e+00> : vector<256x128xf32>
    %116 = tpu.matmul %113, %115, %cst_134 {dimension_numbers = #tpu.dot_dimension_numbers<[1], [0], [0], [1], [0, 0, 1, 1], [], []>} : vector<256x128xf32>, vector<128x128xf32>, vector<256x128xf32> -> vector<256x128xf32>
    %117 = arith.addf %111, %116 : vector<256x128xf32>
    %c2_135 = arith.constant 2 : index
    %c9_136 = arith.constant 9 : index
    %c0_137 = arith.constant 0 : index
    %118 = vector.load %arg7[%c2_135, %c9_136, %c0_137] : memref<18x25x128xf32, #tpu.memory_space<vmem>>, vector<16x16x128xf32>
    %119 = vector.shape_cast %118 : vector<16x16x128xf32> to vector<256x128xf32>
    %c8_138 = arith.constant 8 : index
    %c0_139 = arith.constant 0 : index
    %c0_140 = arith.constant 0 : index
    %120 = vector.load %arg4[%c8_138, %c0_139, %c0_140] : memref<9x128x128xf32, #tpu.memory_space<vmem>>, vector<1x128x128xf32>
    %121 = vector.shape_cast %120 : vector<1x128x128xf32> to vector<128x128xf32>
    %cst_141 = arith.constant dense<0.000000e+00> : vector<256x128xf32>
    %122 = tpu.matmul %119, %121, %cst_141 {dimension_numbers = #tpu.dot_dimension_numbers<[1], [0], [0], [1], [0, 0, 1, 1], [], []>} : vector<256x128xf32>, vector<128x128xf32>, vector<256x128xf32> -> vector<256x128xf32>
    %123 = arith.addf %117, %122 : vector<256x128xf32>
    %c0_142 = arith.constant 0 : index
    %c0_143 = arith.constant 0 : index
    %124 = vector.load %arg5[%c0_142, %c0_143] : memref<1x128xf32, #tpu.memory_space<vmem>>, vector<1x128xf32>
    %125 = vector.broadcast %124 : vector<1x128xf32> to vector<256x128xf32>
    %126 = arith.addf %123, %125 : vector<256x128xf32>
    %127 = vector.shape_cast %126 : vector<256x128xf32> to vector<16x16x128xf32>
    %c0_144 = arith.constant 0 : index
    %c0_145 = arith.constant 0 : index
    %c0_146 = arith.constant 0 : index
    %c0_147 = arith.constant 0 : index
    %128 = vector.load %arg1[%c0_144, %c0_145, %c0_146, %c0_147] : memref<1x16x16x128xf32, #tpu.memory_space<vmem>>, vector<1x16x16x128xf32>
    %129 = vector.shape_cast %128 : vector<1x16x16x128xf32> to vector<16x16x128xf32>
    %130 = arith.addf %127, %129 : vector<16x16x128xf32>
    %cst_148 = arith.constant 0.000000e+00 : f32
    %131 = vector.broadcast %cst_148 : f32 to vector<16x16x128xf32>
    %132 = arith.maximumf %130, %131 : vector<16x16x128xf32>
    %c0_149 = arith.constant 0 : index
    %c0_150 = arith.constant 0 : index
    %c0_151 = arith.constant 0 : index
    %c0_152 = arith.constant 0 : index
    %133 = vector.load %arg6[%c0_149, %c0_150, %c0_151, %c0_152] : memref<1x16x16x128xf32, #tpu.memory_space<vmem>>, vector<1x16x16x128xf32>
    %134 = vector.shape_cast %133 : vector<1x16x16x128xf32> to vector<16x16x128xf32>
    %135 = vector.shape_cast %132 : vector<16x16x128xf32> to vector<1x16x16x128xf32>
    tpu.vector_store %arg6[%c0_149, %c0_150, %c0_151, %c0_152], %135 {strides = array<i32>} : memref<1x16x16x128xf32, #tpu.memory_space<vmem>>, vector<1x16x16x128xf32>,
    return
  }
  func.func @transform_0(%arg0: i32) -> (i32, i32, i32, i32) {
    %c0_i32 = arith.constant 0 : i32
    %c0_i32_0 = arith.constant 0 : i32
    %c0_i32_1 = arith.constant 0 : i32
    %c0_i32_2 = arith.constant 0 : i32
    return %arg0, %c0_i32, %c0_i32_0, %c0_i32_1 : i32, i32, i32, i32
  }
  func.func @transform_1(%arg0: i32) -> (i32, i32, i32) {
    %c0_i32 = arith.constant 0 : i32
    %c0_i32_0 = arith.constant 0 : i32
    %c0_i32_1 = arith.constant 0 : i32
    %c0_i32_2 = arith.constant 0 : i32
    return %c0_i32, %c0_i32_0, %c0_i32_1 : i32, i32, i32
  }
  func.func @transform_2(%arg0: i32) -> (i32, i32) {
    %c0_i32 = arith.constant 0 : i32
    %c0_i32_0 = arith.constant 0 : i32
    %c0_i32_1 = arith.constant 0 : i32
    return %c0_i32, %c0_i32_0 : i32, i32
  }
  func.func @transform_3(%arg0: i32) -> (i32, i32, i32) {
    %c0_i32 = arith.constant 0 : i32
    %c0_i32_0 = arith.constant 0 : i32
    %c0_i32_1 = arith.constant 0 : i32
    %c0_i32_2 = arith.constant 0 : i32
    return %c0_i32, %c0_i32_0, %c0_i32_1 : i32, i32, i32
  }
  func.func @transform_4(%arg0: i32) -> (i32, i32) {
    %c0_i32 = arith.constant 0 : i32
    %c0_i32_0 = arith.constant 0 : i32
    %c0_i32_1 = arith.constant 0 : i32
    return %c0_i32, %c0_i32_0 : i32, i32
  }
  func.func @transform_5(%arg0: i32) -> (i32, i32, i32, i32) {
    %c0_i32 = arith.constant 0 : i32
    %c0_i32_0 = arith.constant 0 : i32
    %c0_i32_1 = arith.constant 0 : i32
    %c0_i32_2 = arith.constant 0 : i32
    return %arg0, %c0_i32, %c0_i32_0, %c0_i32_1 : i32, i32, i32, i32
  }
}

</mosaic_0001>

<bundles_post_ra>
// kernel: tpu_custom_call.1
= control target key start
LH: loop header
LB: loop body
LE: loop exit
PB: predicated region body
PF: predicated region fallthrough
CT: control target
= control target key end

     0   :  { %10 = vsyncpa [#allocation4], 0  ;;  %s11165_s0 = inlined_call_operand.hbm [shape: f32[2,16,16,128], index: 0, kind: input, shape index: {}]   ;;  %s11166_s1 = inlined_call_operand.hbm [shape: f32[9,128,128], index: 1, kind: input, shape index: {}]   ;;  %s11167_s2 = inlined_call_operand.vmem [shape: f32[1,128], index: 2, kind: input, shape index: {}]   ;;  %s11168_s3 = inlined_call_operand.hbm [shape: f32[9,128,128], index: 3, kind: input, shape index: {}]   ;;  %s11169_s4 = inlined_call_operand.vmem [shape: f32[1,128], index: 4, kind: input, shape index: {}]   ;;  %s11170_s5 = inlined_call_operand.hbm [shape: f32[2,16,16,128], index: 5, kind: output, shape index: {}]  }
   0x1   :  { %12 = vsyncpa [#allocation4 + $0x1], 0 }
   0x2   :  { %13 = vsyncpa [#allocation7], 0 }
   0x3   :  { %14 = vsyncpa [#allocation5], 0 }
   0x4   :  { %16 = vsyncpa [#allocation5 + $0x1], 0  ;;  %s9820_s18 = smov 0   ;;  %s9822_s19 = smov 0  }
   0x5   :  { %s9824_s20 = smov 0   ;;  %s9826_s21 = smov 0  }
   0x6 LB: > { %s9841_s22 = sadd.s32 4294967295, %s9779_s21   ;;  %s6133_s23 = sadd.s32 4294967294, %s9779_s21   ;;  %s9779_s21 = sphi %s9826_s21, %s11416_s21   ;;  %s9775_s20 = sphi %s9824_s20, %s11415_s20   ;;  %s9771_s19 = sphi %s9822_s19, %s11414_s19   ;;  %s9767_s18 = sphi %s9820_s18, %s11413_s18  }
   0x7   : > { %p42_p0 = scmp.ne.s32.totalorder %s9771_s19, %s9767_s18  ;;  %p11171_p1 = scmp.eq.s32.totalorder %s9841_s22, 0 }
   0x8   : > { %p156_p3 = scmp.eq.s32.totalorder %s6133_s23, 1  ;;  %p6134_p5 = scmp.ge.s32.totalorder %s9779_s21, 1 }
   0x9   : > { %p9850_p4 = por %p11171_p1, %p42_p0  ;;  %p163_p7 = scmp.lt.s32.totalorder %s9779_s21, 3 }
   0xa   : > { %p9855_p6 = por %p156_p3, %p42_p0  ;;  %s9781_s27 = smov [#allocation6]  }
   0xb   : > { %s11250_s24 = scalar_select %p9850_p4, 1, 0 }
   0xc   : > { %s11251_s25 = scalar_select %p9855_p6, 1, 0 }
   0xd   : > { %p9860_p8 = pnand %p6134_p5, %p163_p7  ;;  %s175_s28 = sshll.u32 %s9781_s27, 4  ;;  %s9864_s28 = int_to_ptr.vmem [resolvable:$true] %s175_s28 }
   0xe   : > { %s9782_s30 = smov [#allocation8]   ;;  %s9623_s9 = scalar_lea.hbm %s11166_s1, 18432 }
   0xf   : > { %p9559_p9 = pneg %p9860_p8  ;;  %s191_s6 = sshll.u32 %s9782_s30, 4  ;;  %s9875_s6 = int_to_ptr.vmem [resolvable:$true] %s191_s6 }
  0x10   : > { %p9624_p12 = scmp.ne.s32.totalorder %s11166_s1, %s9623_s9  ;;  %p9630_p5 = scmp.lt.u32.totalorder %s9623_s9, %s11166_s1 }
  0x11   : > { %p9871_p11 = pnand %p9559_p9, %p11171_p1 }
  0x13   : > { %p9625_p13 = pneg %p9871_p11 }
  0x15   : > { %p9626_p0 = pnand %p9625_p13, %p9624_p12 }
  0x17   : > { %p9627_p3 = pneg %p9626_p0 }
  0x19   : > { %p9632_p7 = pnand %p9630_p5, %p9627_p3 }
  0x1b   : > { %9635 = shalt.err (!%p9632_p7)
}
  0x1c   : > { %s9636_s14 = scalar_lea.vmem %s9864_s28, 18432  ;;  %p9644_p2 = scmp.lt.s32.totalorder %s9864_s28, %s9864_s28 }
  0x1d   : > { %p9637_p9 = scmp.ne.s32.totalorder %s9864_s28, %s9636_s14  ;;  %p9645_p12 = scmp.lt.s32.totalorder %s9636_s14, %s9636_s14 }
  0x1f   : > { %p9639_p10 = pnand %p9637_p9, %p9625_p13  ;;  %p9646_p0 = por %p9645_p12, %p9644_p2 }
  0x21   : > { %p9640_p1 = pneg %p9639_p10 }
  0x23   : > { %p9647_p6 = pnand %p9646_p0, %p9640_p1 }
  0x25   : > { %9650 = shalt.err (!%p9647_p6)
}
  0x26   : > { %s9783_s15 = smov 128   ;;  %s9784_s16 = smov 8  }
  0x27   : > { %9562 = dma.hbm_to_vmem [thread:$0]  (!%p9871_p11), %s11166_s1, 18432, %s9864_s28, [#allocation7], %s9783_s15, %s9783_s15, %s9784_s16  }
  0x28   : > { %s9651_s7 = scalar_lea.hbm %s11168_s3, 18432 }
  0x29   : > { %p9652_p1 = scmp.ne.s32.totalorder %s11168_s3, %s9651_s7  ;;  %p9658_p10 = scmp.lt.u32.totalorder %s9651_s7, %s11168_s3 }
  0x2b   : > { %p9654_p2 = pnand %p9652_p1, %p9625_p13 }
  0x2d   : > { %p9655_p6 = pneg %p9654_p2 }
  0x2f   : > { %p9660_p3 = pnand %p9658_p10, %p9655_p6 }
  0x31   : > { %9663 = shalt.err (!%p9660_p3)
}
  0x32   : > { %s9664_s28 = scalar_lea.vmem %s9875_s6, 18432  ;;  %p9672_p12 = scmp.lt.s32.totalorder %s9875_s6, %s9875_s6 }
  0x33   : > { %p9665_p5 = scmp.ne.s32.totalorder %s9875_s6, %s9664_s28  ;;  %p9673_p0 = scmp.lt.s32.totalorder %s9664_s28, %s9664_s28 }
  0x35   : > { %p9667_p7 = pnand %p9665_p5, %p9625_p13  ;;  %p9674_p1 = por %p9673_p0, %p9672_p12 }
  0x37   : > { %p9668_p9 = pneg %p9667_p7 }
  0x39   : > { %p9675_p2 = pnand %p9674_p1, %p9668_p9 }
  0x3b   : > { %9678 = shalt.err (!%p9675_p2)
}
  0x3c   : > { %9565 = dma.hbm_to_vmem [thread:$0]  (!%p9871_p11), %s11168_s3, 18432, %s9875_s6, [#allocation7], %s9783_s15, %s9783_s15, %s9784_s16  }
  0x3d   : > { %s9936_s29 = sadd.s32 1, %s9779_s21   ;;  %s29_s14 = sadd.s32 1, %s9775_s20 }
  0x3e   : > { %s26_s17 = ssub.s32 %s9779_s21, %s9936_s29  ;;  %p36_p13 = scmp.ne.s32.totalorder %s9775_s20, %s9771_s19 }
  0x3f   : > { %p27_p6 = scmp.eq.s32.totalorder %s26_s17, 0  ;;  %p37_p10 = scmp.eq.s32.totalorder %s9779_s21, 0 }
  0x40   : > { %p11254_p3 = scmp.eq.s32.totalorder %s9841_s22, 1  ;;  %p9576_p7 = scmp.lt.s32.totalorder %s9779_s21, 2 }
  0x41   : > { %s9952_s27 = scalar_select %p27_p6, %s9775_s20, %s29_s14  }
  0x42   : > { %p9946_p5 = por %p11254_p3, %p36_p13  ;;  %p38_p9 = por %p37_p10, %p36_p13 }
  0x43   : > { %s208_s30 = sand.u32 1, %s9775_s20   ;;  %s6153_s6 = sshll.u32 %s9779_s21, 12 }
  0x44   : > { %s11255_s23 = scalar_select %p9946_p5, 1, 0 }
  0x45   : > { %s6138_s7 = sshll.u32 %s208_s30, 8  ;;  %s9959_s10 = scalar_lea.hbm %s11165_s0, %s6153_s6 }
  0x46   : > { %s212_s11 = scalar_lea.vmem [#allocation3], %s6138_s7  ;;  %p9963_p11 = pnand %p9576_p7, %p38_p9 }
  0x47   : > { %s219_s28 = sshll.u32 %s212_s11, 4  ;;  %s9967_s13 = scalar_lea.sflag [#allocation4], %s208_s30  ;;  %s9961_s28 = int_to_ptr.vmem [resolvable:$true] %s219_s28 }
  0x48   : > { %s9679_s14 = scalar_lea.hbm %s9959_s10, 4096  ;;  %p9681_p0 = pneg %p9963_p11 }
  0x49   : > { %p9680_p12 = scmp.ne.s32.totalorder %s9959_s10, %s9679_s14  ;;  %s9684_s6 = scalar_lea.hbm %s11165_s0, 8192 }
  0x4a   : > { %p9685_p13 = scmp.lt.u32.totalorder %s9959_s10, %s11165_s0  ;;  %p9686_p6 = scmp.lt.u32.totalorder %s9684_s6, %s9679_s14 }
  0x4b   : > { %p9682_p1 = pnand %p9681_p0, %p9680_p12  ;;  %p9688_p3 = scmp.lt.u32.totalorder %s9679_s14, %s9959_s10 }
  0x4c   : > { %p9687_p10 = por %p9686_p6, %p9685_p13 }
  0x4d   : > { %p9683_p2 = pneg %p9682_p1 }
  0x4e   : > { %p9689_p7 = por %p9688_p3, %p9687_p10 }
  0x50   : > { %p9690_p9 = pnand %p9689_p7, %p9683_p2 }
  0x52   : > { %9693 = shalt.err (!%p9690_p9)
}
  0x53   : > { %s9694_s30 = scalar_lea.vmem %s9961_s28, 4096  ;;  %s9785_s11 = smov [#allocation3]  }
  0x54   : > { %p9695_p12 = scmp.ne.s32.totalorder %s9961_s28, %s9694_s30  ;;  %s9699_s17 = sshll.u32 %s9785_s11, 4  ;;  %s9700_s17 = int_to_ptr.vmem [resolvable:$false] %s9699_s17 }
  0x55   : > { %s9701_s7 = scalar_lea.vmem %s9700_s17, 8192  ;;  %p9702_p4 = scmp.lt.s32.totalorder %s9961_s28, %s9700_s17 }
  0x56   : > { %p9697_p1 = pnand %p9695_p12, %p9681_p0  ;;  %p9703_p13 = scmp.lt.s32.totalorder %s9701_s7, %s9694_s30 }
  0x58   : > { %p9698_p5 = pneg %p9697_p1  ;;  %p9704_p6 = por %p9703_p13, %p9702_p4 }
  0x5a   : > { %p9705_p10 = pnand %p9704_p6, %p9698_p5 }
  0x5c   : > { %9708 = shalt.err (!%p9705_p10)
}
  0x5d   : > { %9569 = dma.hbm_to_vmem [thread:$0]  (!%p9963_p11), %s9959_s10, 4096, %s9961_s28, %s9967_s13, %s9783_s15, %s9783_s15, %s9784_s16  }
  0x5e   : > { %231 = sbr.rel (%p9860_p8) target bundleno = 1675 (0x68b), region = 40 }
  0x65   : > { %s10001_s14 = sand.u32 1, %s9771_s19   ;;  %p11257_p4 = scmp.ne.s32.totalorder %s11250_s24, 0 }
  0x66   : > { %s6142_s6 = sshll.u32 %s10001_s14, 8  ;;  %s234_s8 = scalar_lea.sflag [#allocation4], %s10001_s14 }
  0x67   : > { %s10007_s12 = scalar_lea.vmem [#allocation3], %s6142_s6 }
  0x68   : > { %9754 = dma.done.wait (%p11257_p4), %s234_s8, 4096  }
  0x69   : > { %9756 = vsyncadd (%p11257_p4), %s234_s8, 4294963200  ;;  %p11258_p5 = scmp.eq.s32.totalorder %s9841_s22, 0 }
  0x6b   : > { %9758 = dma.done.wait (%p11258_p5), [#allocation7], 36864   ;;  %p11259_p8 = pmov %p11258_p5 }
  0x6c   : > { %v9786_v0 = vmov 0.0   ;;  %v459_v1 = vld [vmem:[#allocation6 + $0x80] sm:$0xff]  ;;  %v460_v2 = vld [vmem:[#allocation6 + $0x88] sm:$0xff]  ;;  %v461_v3 = vld [vmem:[#allocation6 + $0x90] sm:$0xff]  ;;  %s11024_s10 = scalar_lea.vmem [#allocation9], %s6142_s6  ;;  %s6154_s28 = sshll.u32 %s9841_s22, 12 }
  0x6d   : > { %9760 = vsyncadd (%p11259_p8), [#allocation7], 4294930432  ;;  %273 = vst [vmem:[#allocation2 + $0x8] sm:$0xff] %v9786_v0  ;;  %7051 = vmatprep.mubr.f32.mxu0 %v9786_v0  ;;  %7771 = vmatprep.mubr.f32.mxu1 %v9786_v0  ;;  %v8459_v4 = vpack.c.bf16 %v460_v2, %v459_v1  ;;  %v462_v5 = vld [vmem:[#allocation6 + $0x98] sm:$0xff]  ;;  %v463_v7 = vld [vmem:[#allocation6 + $0xa0] sm:$0xff]  ;;  %s6041_s13 = sshll.u32 %s11024_s10, 4  ;;  %s11117_s11 = scalar_lea.hbm %s11170_s5, %s6154_s28  ;;  %s11119_s13 = int_to_ptr.vmem [resolvable:$true] %s6041_s13 }
  0x6e   : > { %272 = vst [vmem:[#allocation2] sm:$0xff] %v9786_v0  ;;  %274 = vst [vmem:[#allocation2 + $0x10] sm:$0xff] %v9786_v0  ;;  %v8463_v6 = vpack.c.bf16 %v462_v5, %v461_v3  ;;  %v464_v8 = vld [vmem:[#allocation6 + $0xa8] sm:$0xff]  ;;  %v465_v10 = vld [vmem:[#allocation6 + $0xb0] sm:$0xff]  ;;  %s6028_s22 = scalar_lea.sflag [#allocation5], %s10001_s14  ;;  %s9709_s17 = scalar_lea.vmem %s11119_s13, 4096 }
  0x6f   : > { %275 = vst [vmem:[#allocation2 + $0x18] sm:$0x1] %v9786_v0  ;;  %277 = vst [vmem:[#allocation2 + $0x220] sm:$0xff] %v9786_v0  ;;  %8460 = vmatprep.subr.bf16.mxu0 %v8459_v4  ;;  %v8467_v9 = vpack.c.bf16 %v464_v8, %v463_v7  ;;  %v466_v11 = vld [vmem:[#allocation6 + $0xb8] sm:$0xff]  ;;  %v10060_v12 = vld [vmem:[%s10007_s12] sm:$0xff]  ;;  %p9710_p11 = scmp.ne.s32.totalorder %s11119_s13, %s9709_s17  ;;  %p11410_p0 = scmp.ne.s32.totalorder %s11255_s23, 0 }
  0x70   : > { %278 = vst [vmem:[#allocation2 + $0x228] sm:$0xff] %v9786_v0  ;;  %279 = vst [vmem:[#allocation2 + $0x230] sm:$0xff] %v9786_v0  ;;  %8462 = vmatpush3.bf16.msra.mxu0 %v8459_v4  ;;  %v10063_v13 = vld [vmem:[%s10007_s12 + $0x8] sm:$0xff]  ;;  %v10066_v14 = vld [vmem:[%s10007_s12 + $0x10] sm:$0xff]  ;;  %v8471_v19 = vpack.c.bf16 %v466_v11, %v465_v10  ;;  %s9787_s7 = smov [#allocation9]  }
  0x71   : > { %280 = vst [vmem:[#allocation2 + $0x238] sm:$0x1] %v9786_v0  ;;  %282 = vst [vmem:[#allocation2 + $0x27] sm:$0x1] %v9786_v0  ;;  %8464 = vmatprep.subr.bf16.mxu0 %v8463_v6  ;;  %v10072_v15 = vld [vmem:[%s10007_s12 + $0x18] sm:$0xff]  ;;  %v10076_v16 = vld [vmem:[%s10007_s12 + $0x20] sm:$0xff]  ;;  %p9711_p2 = pnand %p9710_p11, %p11410_p0 }
  0x72   : > { %283 = vst [vmem:[#allocation2 + $0x47] sm:$0x1] %v9786_v0  ;;  %284 = vst [vmem:[#allocation2 + $0x67] sm:$0x1] %v9786_v0  ;;  %v10079_v17 = vld [vmem:[%s10007_s12 + $0x28] sm:$0xff]  ;;  %v10082_v18 = vld [vmem:[%s10007_s12 + $0x30] sm:$0xff] }
  0x73   : > { %285 = vst [vmem:[#allocation2 + $0x87] sm:$0x1] %v9786_v0  ;;  %286 = vst [vmem:[#allocation2 + $0xa7] sm:$0x1] %v9786_v0  ;;  %v467_v20 = vld [vmem:[#allocation6 + $0xc0] sm:$0xff]  ;;  %v468_v21 = vld [vmem:[#allocation6 + $0xc8] sm:$0xff]  ;;  %p9712_p3 = pneg %p9711_p2 }
  0x74   : > { %287 = vst [vmem:[#allocation2 + $0xc7] sm:$0x1] %v9786_v0  ;;  %288 = vst [vmem:[#allocation2 + $0xe7] sm:$0x1] %v9786_v0  ;;  %8466 = vmatpush3.bf16.msra.mxu0 %v8463_v6  ;;  %v10088_v22 = vld [vmem:[%s10007_s12 + $0x38] sm:$0xff]  ;;  %v10092_v23 = vld [vmem:[%s10007_s12 + $0x40] sm:$0xff]  ;;  %v8475_v30 = vpack.c.bf16 %v468_v21, %v467_v20 }
  0x75   : > { %289 = vst [vmem:[#allocation2 + $0x107] sm:$0x1] %v9786_v0  ;;  %290 = vst [vmem:[#allocation2 + $0x127] sm:$0x1] %v9786_v0  ;;  %8468 = vmatprep.subr.bf16.mxu0 %v8467_v9  ;;  %v10095_v24 = vld [vmem:[%s10007_s12 + $0x48] sm:$0xff]  ;;  %v10098_v25 = vld [vmem:[%s10007_s12 + $0x50] sm:$0xff] }
  0x76   : > { %291 = vst [vmem:[#allocation2 + $0x147] sm:$0x1] %v9786_v0  ;;  %292 = vst [vmem:[#allocation2 + $0x167] sm:$0x1] %v9786_v0  ;;  %v10104_v26 = vld [vmem:[%s10007_s12 + $0x58] sm:$0xff]  ;;  %v10108_v27 = vld [vmem:[%s10007_s12 + $0x60] sm:$0xff] }
  0x77   : > { %293 = vst [vmem:[#allocation2 + $0x187] sm:$0x1] %v9786_v0  ;;  %294 = vst [vmem:[#allocation2 + $0x1a7] sm:$0x1] %v9786_v0  ;;  %v10111_v28 = vld [vmem:[%s10007_s12 + $0x68] sm:$0xff]  ;;  %v10114_v29 = vld [vmem:[%s10007_s12 + $0x70] sm:$0xff] }
  0x78   : > { %295 = vst [vmem:[#allocation2 + $0x1c7] sm:$0x1] %v9786_v0  ;;  %296 = vst [vmem:[#allocation2 + $0x1e7] sm:$0x1] %v9786_v0  ;;  %8470 = vmatpush3.bf16.msra.mxu0 %v8467_v9  ;;  %v469_v31 = vld [vmem:[#allocation6 + $0xd0] sm:$0xff]  ;;  %v470_v32 = vld [vmem:[#allocation6 + $0xd8] sm:$0xff] }
  0x79   : > { %297 = vst [vmem:[#allocation2 + $0x207] sm:$0x1] %v9786_v0  ;;  %298 = vst [vmem:[#allocation2 + $0x38] sm:$0x1] %v9786_v0  ;;  %8472 = vmatprep.subr.bf16.mxu0 %v8471_v19  ;;  %v10120_v33 = vld [vmem:[%s10007_s12 + $0x78] sm:$0xff]  ;;  %v10124_v34 = vld [vmem:[%s10007_s12 + $0x80] sm:$0xff]  ;;  %v8479_v41 = vpack.c.bf16 %v470_v32, %v469_v31 }
  0x7a   : > { %299 = vst [vmem:[#allocation2 + $0x58] sm:$0x1] %v9786_v0  ;;  %300 = vst [vmem:[#allocation2 + $0x78] sm:$0x1] %v9786_v0  ;;  %v10127_v35 = vld [vmem:[%s10007_s12 + $0x88] sm:$0xff]  ;;  %v10130_v36 = vld [vmem:[%s10007_s12 + $0x90] sm:$0xff] }
  0x7b   : > { %301 = vst [vmem:[#allocation2 + $0x98] sm:$0x1] %v9786_v0  ;;  %302 = vst [vmem:[#allocation2 + $0xb8] sm:$0x1] %v9786_v0  ;;  %v10136_v37 = vld [vmem:[%s10007_s12 + $0x98] sm:$0xff]  ;;  %v10140_v38 = vld [vmem:[%s10007_s12 + $0xa0] sm:$0xff] }
  0x7c   : > { %303 = vst [vmem:[#allocation2 + $0xd8] sm:$0x1] %v9786_v0  ;;  %304 = vst [vmem:[#allocation2 + $0xf8] sm:$0x1] %v9786_v0  ;;  %8474 = vmatpush3.bf16.msra.mxu0 %v8471_v19  ;;  %v10143_v39 = vld [vmem:[%s10007_s12 + $0xa8] sm:$0xff]  ;;  %v10146_v40 = vld [vmem:[%s10007_s12 + $0xb0] sm:$0xff] }
  0x7d   : > { %305 = vst [vmem:[#allocation2 + $0x118] sm:$0x1] %v9786_v0  ;;  %306 = vst [vmem:[#allocation2 + $0x138] sm:$0x1] %v9786_v0  ;;  %8476 = vmatprep.subr.bf16.mxu0 %v8475_v30  ;;  %v471_v42 = vld [vmem:[#allocation6 + $0xe0] sm:$0xff]  ;;  %v472_v43 = vld [vmem:[#allocation6 + $0xe8] sm:$0xff] }
  0x7e   : > { %307 = vst [vmem:[#allocation2 + $0x158] sm:$0x1] %v9786_v0  ;;  %308 = vst [vmem:[#allocation2 + $0x178] sm:$0x1] %v9786_v0  ;;  %v10152_v44 = vld [vmem:[%s10007_s12 + $0xb8] sm:$0xff]  ;;  %v10156_v45 = vld [vmem:[%s10007_s12 + $0xc0] sm:$0xff]  ;;  %v8483_v51 = vpack.c.bf16 %v472_v43, %v471_v42 }
  0x7f   : > { %309 = vst [vmem:[#allocation2 + $0x198] sm:$0x1] %v9786_v0  ;;  %310 = vst [vmem:[#allocation2 + $0x1b8] sm:$0x1] %v9786_v0  ;;  %v10159_v46 = vld [vmem:[%s10007_s12 + $0xc8] sm:$0xff]  ;;  %v10162_v47 = vld [vmem:[%s10007_s12 + $0xd0] sm:$0xff] }
  0x80   : > { %311 = vst [vmem:[#allocation2 + $0x1d8] sm:$0x1] %v9786_v0  ;;  %312 = vst [vmem:[#allocation2 + $0x1f8] sm:$0x1] %v9786_v0  ;;  %v10168_v48 = vld [vmem:[%s10007_s12 + $0xd8] sm:$0xff]  ;;  %8478 = vmatpush3.bf16.msra.mxu0 %v8475_v30  ;;  %v10172_v49 = vld [vmem:[%s10007_s12 + $0xe0] sm:$0xff] }
  0x81   : > { %313 = vst [vmem:[#allocation2 + $0x218] sm:$0x1] %v9786_v0  ;;  %346 = vst [vmem:[#allocation2 + $0x28] sm:$0xff] %v10060_v12  ;;  %v10175_v50 = vld [vmem:[%s10007_s12 + $0xe8] sm:$0xff]  ;;  %8480 = vmatprep.subr.bf16.mxu0 %v8479_v41  ;;  %v473_v52 = vld [vmem:[#allocation6 + $0xf0] sm:$0xff]  ;;  %s9713_s6 = sshll.u32 %s9787_s7, 4  ;;  %s9714_s6 = int_to_ptr.vmem [resolvable:$false] %s9713_s6 }
  0x82   : > { %347 = vst [vmem:[#allocation2 + $0x30] sm:$0xff] %v10063_v13  ;;  %348 = vst [vmem:[#allocation2 + $0x48] sm:$0xff] %v10066_v14  ;;  %v474_v53 = vld [vmem:[#allocation6 + $0xf8] sm:$0xff]  ;;  %v410_v55 = vld [vmem:[#allocation6] sm:$0xff]  ;;  %s9715_s8 = scalar_lea.vmem %s9714_s6, 8192  ;;  %p9716_p7 = scmp.lt.s32.totalorder %s11119_s13, %s9714_s6 }
  0x83   : > { %349 = vst [vmem:[#allocation2 + $0x50] sm:$0xff] %v10072_v15  ;;  %350 = vst [vmem:[#allocation2 + $0x68] sm:$0xff] %v10076_v16  ;;  %v8487_v54 = vpack.c.bf16 %v474_v53, %v473_v52  ;;  %v411_v56 = vld [vmem:[#allocation6 + $0x8] sm:$0xff]  ;;  %v412_v58 = vld [vmem:[#allocation6 + $0x10] sm:$0xff]  ;;  %p9717_p9 = scmp.lt.s32.totalorder %s9715_s8, %s9709_s17 }
  0x84   : > { %351 = vst [vmem:[#allocation2 + $0x70] sm:$0xff] %v10079_v17  ;;  %352 = vst [vmem:[#allocation2 + $0x88] sm:$0xff] %v10082_v18  ;;  %8482 = vmatpush3.bf16.msra.mxu0 %v8479_v41  ;;  %v8491_v57 = vpack.c.bf16 %v411_v56, %v410_v55  ;;  %v413_v59 = vld [vmem:[#allocation6 + $0x18] sm:$0xff]  ;;  %v414_v61 = vld [vmem:[#allocation6 + $0x20] sm:$0xff] }
  0x85   : > { %353 = vst [vmem:[#allocation2 + $0x90] sm:$0xff] %v10088_v22  ;;  %354 = vst [vmem:[#allocation2 + $0xa8] sm:$0xff] %v10092_v23  ;;  %8484 = vmatprep.subr.bf16.mxu0 %v8483_v51  ;;  %v8495_v60 = vpack.c.bf16 %v413_v59, %v412_v58  ;;  %v415_v62 = vld [vmem:[#allocation6 + $0x28] sm:$0xff]  ;;  %v416_v1 = vld [vmem:[#allocation6 + $0x30] sm:$0xff]  ;;  %p9718_p12 = por %p9717_p9, %p9716_p7 }
  0x86   : > { %355 = vst [vmem:[#allocation2 + $0xb0] sm:$0xff] %v10095_v24  ;;  %356 = vst [vmem:[#allocation2 + $0xc8] sm:$0xff] %v10098_v25  ;;  %v8499_v63 = vpack.c.bf16 %v415_v62, %v414_v61  ;;  %v417_v2 = vld [vmem:[#allocation6 + $0x38] sm:$0xff]  ;;  %v418_v4 = vld [vmem:[#allocation6 + $0x40] sm:$0xff] }
  0x87   : > { %357 = vst [vmem:[#allocation2 + $0xd0] sm:$0xff] %v10104_v26  ;;  %358 = vst [vmem:[#allocation2 + $0xe8] sm:$0xff] %v10108_v27  ;;  %v8503_v3 = vpack.c.bf16 %v417_v2, %v416_v1  ;;  %v419_v5 = vld [vmem:[#allocation6 + $0x48] sm:$0xff]  ;;  %v420_v6 = vld [vmem:[#allocation6 + $0x50] sm:$0xff]  ;;  %p9719_p1 = pnand %p9718_p12, %p9712_p3 }
  0x88   : > { %359 = vst [vmem:[#allocation2 + $0xf0] sm:$0xff] %v10111_v28  ;;  %360 = vst [vmem:[#allocation2 + $0x108] sm:$0xff] %v10114_v29  ;;  %8486 = vmatpush3.bf16.msra.mxu0 %v8483_v51  ;;  %v421_v7 = vld [vmem:[#allocation6 + $0x58] sm:$0xff]  ;;  %v422_v9 = vld [vmem:[#allocation6 + $0x60] sm:$0xff] }
  0x89   : > { %361 = vst [vmem:[#allocation2 + $0x110] sm:$0xff] %v10120_v33  ;;  %362 = vst [vmem:[#allocation2 + $0x128] sm:$0xff] %v10124_v34  ;;  %8488 = vmatprep.subr.bf16.mxu0 %v8487_v54  ;;  %v8511_v8 = vpack.c.bf16 %v421_v7, %v420_v6  ;;  %v423_v10 = vld [vmem:[#allocation6 + $0x68] sm:$0xff]  ;;  %v424_v19 = vld [vmem:[#allocation6 + $0x70] sm:$0xff] }
  0x8a   : > { %363 = vst [vmem:[#allocation2 + $0x130] sm:$0xff] %v10127_v35  ;;  %364 = vst [vmem:[#allocation2 + $0x148] sm:$0xff] %v10130_v36  ;;  %v8515_v11 = vpack.c.bf16 %v423_v10, %v422_v9  ;;  %v425_v20 = vld [vmem:[#allocation6 + $0x78] sm:$0xff]  ;;  %v958_v30 = vld [vmem:[#allocation6 + $0x100] sm:$0xff] }
  0x8b   : > { %365 = vst [vmem:[#allocation2 + $0x150] sm:$0xff] %v10136_v37  ;;  %11260 = vst [vmem:[#allocation13_spill] sm:$0xff] %v10140_v38  ;;  %v8519_v21 = vpack.c.bf16 %v425_v20, %v424_v19  ;;  %v959_v31 = vld [vmem:[#allocation6 + $0x108] sm:$0xff]  ;;  %v960_v42 = vld [vmem:[#allocation6 + $0x110] sm:$0xff] }
  0x8c   : > { %11261 = vst [vmem:[#allocation14_spill] sm:$0xff] %v10143_v39  ;;  %11262 = vst [vmem:[#allocation15_spill] sm:$0xff] %v10146_v40  ;;  %8490 = vmatpush3.bf16.msra.mxu0 %v8487_v54  ;;  %v8523_v32 = vpack.c.bf16 %v959_v31, %v958_v30  ;;  %v378_v41 = vld [vmem:[#allocation2 + $0x7] sm:$0xff]  ;;  %v961_v43 = vld [vmem:[#allocation6 + $0x118] sm:$0xff] }
  0x8d   : > { %366 = vst [vmem:[#allocation2 + $0x168] sm:$0xff] %v10140_v38  ;;  %367 = vst [vmem:[#allocation2 + $0x170] sm:$0xff] %v10143_v39  ;;  %8492 = vmatprep.subr.bf16.mxu0 %v8491_v57  ;;  %v379_v51 = vld [vmem:[#allocation2 + $0xf] sm:$0xff]  ;;  %v10210_v52 = vld [vmem:[#allocation2 + $0x27] sm:$0xff]  ;;  %v8527_v53 = vpack.c.bf16 %v961_v43, %v960_v42 }
  0x8e   : > { %368 = vst [vmem:[#allocation2 + $0x188] sm:$0xff] %v10146_v40  ;;  %11263 = vst [vmem:[#allocation16_spill] sm:$0xff] %v10152_v44  ;;  %v962_v54 = vld [vmem:[#allocation6 + $0x120] sm:$0xff]  ;;  %v963_v55 = vld [vmem:[#allocation6 + $0x128] sm:$0xff] }
  0x8f   : > { %369 = vst [vmem:[#allocation2 + $0x190] sm:$0xff] %v10152_v44  ;;  %11264 = vst [vmem:[#allocation17_spill] sm:$0xff] %v10156_v45  ;;  %7052 = vmatmul.mubr.f32.vlgmr.msra.gmra.mrb[0].mxu0 %v9786_v0  ;;  %v8507_v0 = vpack.c.bf16 %v419_v5, %v418_v4  ;;  %v10213_v56 = vld [vmem:[#allocation2 + $0x2f] sm:$0xff]  ;;  %v8531_v58 = vpack.c.bf16 %v963_v55, %v962_v54  ;;  %v10221_v62 = vld [vmem:[#allocation2 + $0x67] sm:$0xff] }
  0x90   : > { %11265 = vst [vmem:[#allocation18_spill] sm:$0xff] %v10159_v46  ;;  %11266 = vst [vmem:[#allocation19_spill] sm:$0xff] %v10162_v47  ;;  %8494 = vmatpush3.bf16.msra.mxu0 %v8491_v57  ;;  %7054 = vmatprep.mubr.f32.mxu0 %v10060_v12  ;;  %v10215_v57 = vld [vmem:[#allocation2 + $0x47] sm:$0xff]  ;;  %v964_v59 = vld [vmem:[#allocation6 + $0x130] sm:$0xff] }
  0x91   : > { %370 = vst [vmem:[#allocation2 + $0x1a8] sm:$0xff] %v10156_v45  ;;  %371 = vst [vmem:[#allocation2 + $0x1b0] sm:$0xff] %v10159_v46  ;;  %8496 = vmatprep.subr.bf16.mxu0 %v8495_v60  ;;  %v10219_v61 = vld [vmem:[#allocation2 + $0x4f] sm:$0xff]  ;;  %v966_v1 = vld [vmem:[#allocation6 + $0x140] sm:$0xff] }
  0x92   : > { %372 = vst [vmem:[#allocation2 + $0x1c8] sm:$0xff] %v10162_v47  ;;  %11267 = vst [vmem:[#allocation20_spill] sm:$0xff] %v10168_v48  ;;  %v967_v2 = vld [vmem:[#allocation6 + $0x148] sm:$0xff]  ;;  %v969_v6 = vld [vmem:[#allocation6 + $0x158] sm:$0xff] }
  0x93   : > { %373 = vst [vmem:[#allocation2 + $0x1d0] sm:$0xff] %v10168_v48  ;;  %11268 = vst [vmem:[#allocation21_spill] sm:$0xff] %v10172_v49  ;;  %7055 = vmatmul.mubr.f32.gmra.mrb[2].mxu0 %v10063_v13  ;;  %v10227_v4 = vld [vmem:[#allocation2 + $0x87] sm:$0xff]  ;;  %v8539_v5 = vpack.c.bf16 %v967_v2, %v966_v1  ;;  %v10231_v7 = vld [vmem:[#allocation2 + $0x8f] sm:$0xff] }
  0x94   : > { %11269 = vst [vmem:[#allocation22_spill] sm:$0xff] %v10175_v50  ;;  %374 = vst [vmem:[#allocation2 + $0x1e8] sm:$0xff] %v10172_v49  ;;  %7057 = vmatprep.mubr.f32.mxu0 %v10066_v14  ;;  %8498 = vmatpush3.bf16.msra.mxu0 %v8495_v60  ;;  %v965_v60 = vld [vmem:[#allocation6 + $0x138] sm:$0xff]  ;;  %v970_v10 = vld [vmem:[#allocation6 + $0x160] sm:$0xff] }
  0x95   : > { %375 = vst [vmem:[#allocation2 + $0x1f0] sm:$0xff] %v10175_v50  ;;  %8500 = vmatprep.subr.bf16.mxu0 %v8499_v63  ;;  %v10237_v19 = vld [vmem:[#allocation2 + $0xaf] sm:$0xff]  ;;  %v10239_v20 = vld [vmem:[#allocation2 + $0xc7] sm:$0xff]  ;;  %v973_v31 = vld [vmem:[#allocation6 + $0x178] sm:$0xff] }
  0x96   : > { %v972_v30 = vld [vmem:[#allocation6 + $0x170] sm:$0xff]  ;;  %v1264_v43 = vld [vmem:[#allocation6 + $0x180] sm:$0xff] }
  0x97   : > { %7058 = vmatmul.mubr.f32.gmra.mrb[4].mxu0 %v10072_v15  ;;  %v8551_v42 = vpack.c.bf16 %v973_v31, %v972_v30  ;;  %v10251_v54 = vld [vmem:[#allocation2 + $0x107] sm:$0xff]  ;;  %v10267_v1 = vld [vmem:[#allocation2 + $0x14f] sm:$0xff]  ;;  %v10294_v30 = vld [vmem:[%s10007_s12 + $0xf8] sm:$0xff] }
  0x98   : > { %7060 = vmatprep.mubr.f32.mxu0 %v10076_v16  ;;  %8502 = vmatpush3.bf16.msra.mxu0 %v8499_v63  ;;  %v8535_v63 = vpack.c.bf16 %v965_v60, %v964_v59  ;;  %v10257_v59 = vld [vmem:[#allocation2 + $0x127] sm:$0xff]  ;;  %v10261_v60 = vld [vmem:[#allocation2 + $0x12f] sm:$0xff]  ;;  %11271 = vst [vmem:[#allocation24_spill] sm:$0xff] %v10294_v30  ;;  %377 = vst [vmem:[#allocation2 + $0x210] sm:$0xff] %v10294_v30 }
  0x99   : > { %8504 = vmatprep.subr.bf16.mxu0 %v8503_v3  ;;  %v10269_v2 = vld [vmem:[#allocation2 + $0x167] sm:$0xff] }
  0x9a   : > { %v10299_v31 = vld [vmem:[#allocation2 + $0x1cf] sm:$0xff] }
  0x9b   : > { %7061 = vmatmul.mubr.f32.gmra.mrb[6].mxu0 %v10079_v17  ;;  %v10308_v30 = vld [vmem:[#allocation2 + $0x29] sm:$0xff] }
  0x9c   : > { %7063 = vmatprep.mubr.f32.mxu0 %v10082_v18  ;;  %8506 = vmatpush3.bf16.msra.mxu0 %v8503_v3  ;;  %v10225_v3 = vld [vmem:[#allocation2 + $0x6f] sm:$0xff]  ;;  %11272 = vst [vmem:[#allocation25_spill] sm:$0xff] %v10308_v30 }
  0x9d   : > { %8508 = vmatprep.subr.bf16.mxu0 %v8507_v0 }
  0x9f   : > { %7064 = vmatmul.mubr.f32.gmra.mrb[8].mxu0 %v10088_v22 }
  0xa0   : > { %7066 = vmatprep.mubr.f32.mxu0 %v10092_v23  ;;  %8510 = vmatpush3.bf16.msra.mxu0 %v8507_v0  ;;  %v968_v0 = vld [vmem:[#allocation6 + $0x150] sm:$0xff] }
  0xa1   : > { %8512 = vmatprep.subr.bf16.mxu0 %v8511_v8  ;;  %v8543_v9 = vpack.c.bf16 %v969_v6, %v968_v0  ;;  %v10275_v0 = vld [vmem:[#allocation2 + $0x187] sm:$0xff]  ;;  %v10279_v6 = vld [vmem:[#allocation2 + $0x18f] sm:$0xff] }
  0xa3   : > { %7067 = vmatmul.mubr.f32.gmra.mrb[10].mxu0 %v10095_v24 }
  0xa4   : > { %7069 = vmatprep.mubr.f32.mxu0 %v10098_v25  ;;  %8514 = vmatpush3.bf16.msra.mxu0 %v8511_v8  ;;  %v10233_v8 = vld [vmem:[#allocation2 + $0xa7] sm:$0xff] }
  0xa5   : > { %8516 = vmatprep.subr.bf16.mxu0 %v8515_v11 }
  0xa7   : > { %7070 = vmatmul.mubr.f32.gmra.mrb[12].mxu0 %v10104_v26 }
  0xa8   : > { %7072 = vmatprep.mubr.f32.mxu0 %v10108_v27  ;;  %8518 = vmatpush3.bf16.msra.mxu0 %v8515_v11  ;;  %v971_v11 = vld [vmem:[#allocation6 + $0x168] sm:$0xff] }
  0xa9   : > { %8520 = vmatprep.subr.bf16.mxu0 %v8519_v21 }
  0xab   : > { %7073 = vmatmul.mubr.f32.gmra.mrb[14].mxu0 %v10111_v28 }
  0xac   : > { %7075 = vmatprep.mubr.f32.mxu0 %v10114_v29  ;;  %8522 = vmatpush3.bf16.msra.mxu0 %v8519_v21  ;;  %v8547_v21 = vpack.c.bf16 %v971_v11, %v970_v10  ;;  %v10285_v10 = vld [vmem:[#allocation2 + $0x1af] sm:$0xff]  ;;  %v10287_v11 = vld [vmem:[#allocation2 + $0x1c7] sm:$0xff] }
  0xad   : > { %8524 = vmatprep.subr.bf16.mxu0 %v8523_v32 }
  0xaf   : > { %7076 = vmatmul.mubr.f32.gmra.mrb[16].mxu0 %v10120_v33 }
  0xb0   : > { %7078 = vmatprep.mubr.f32.mxu0 %v10124_v34 }
  0xb3   : > { %7079 = vmatmul.mubr.f32.gmra.mrb[18].mxu0 %v10127_v35 }
  0xb4   : > { %7081 = vmatprep.mubr.f32.mxu0 %v10130_v36 }
  0xb7   : > { %7082 = vmatmul.mubr.f32.gmra.mrb[20].mxu0 %v10136_v37 }
  0xb8   : > { %7084 = vmatprep.mubr.f32.mxu0 %v10140_v38  ;;  %v1271_v38 = vld [vmem:[#allocation6 + $0x1b8] sm:$0xff] }
  0xbb   : > { %7085 = vmatmul.mubr.f32.gmra.mrb[22].mxu0 %v10143_v39  ;;  %v1270_v39 = vld [vmem:[#allocation6 + $0x1b0] sm:$0xff] }
  0xbc   : > { %7087 = vmatprep.mubr.f32.mxu0 %v10146_v40 }
  0xbf   : > { %7088 = vmatmul.mubr.f32.gmra.mrb[24].mxu0 %v10152_v44  ;;  %v10313_v44 = vld [vmem:[#allocation2 + $0x49] sm:$0xff] }
  0xc0   : > { %7090 = vmatprep.mubr.f32.mxu0 %v10156_v45  ;;  %v10311_v45 = vld [vmem:[#allocation2 + $0x31] sm:$0xff]  ;;  %11274 = vst [vmem:[#allocation27_spill] sm:$0xff] %v10313_v44 }
  0xc1   : > { %11273 = vst [vmem:[#allocation26_spill] sm:$0xff] %v10311_v45 }
  0xc3   : > { %7091 = vmatmul.mubr.f32.gmra.mrb[26].mxu0 %v10159_v46  ;;  %v1269_v46 = vld [vmem:[#allocation6 + $0x1a8] sm:$0xff] }
  0xc4   : > { %7093 = vmatprep.mubr.f32.mxu0 %v10162_v47  ;;  %v1268_v47 = vld [vmem:[#allocation6 + $0x1a0] sm:$0xff] }
  0xc5   : > { %v8563_v40 = vpack.c.bf16 %v1269_v46, %v1268_v47  ;;  %v10323_v46 = vld [vmem:[#allocation2 + $0x71] sm:$0xff]  ;;  %v10325_v47 = vld [vmem:[#allocation2 + $0x89] sm:$0xff] }
  0xc6   : > { %11277 = vst [vmem:[#allocation30_spill] sm:$0xff] %v10323_v46  ;;  %11278 = vst [vmem:[#allocation31_spill] sm:$0xff] %v10325_v47 }
  0xc7   : > { %7094 = vmatmul.mubr.f32.gmra.mrb[28].mxu0 %v10168_v48 }
  0xc8   : > { %7096 = vmatprep.mubr.f32.mxu0 %v10172_v49  ;;  %v926_v49 = vld [vmem:[#allocation2 + $0x11] sm:$0xff] }
  0xcb   : > { %7097 = vmatmul.mubr.f32.gmra.mrb[30].mxu0 %v10175_v50  ;;  %v1267_v50 = vld [vmem:[#allocation6 + $0x198] sm:$0xff] }
  0xcc   : > { %7131 = vmatprep.mubr.f32.mxu0 %v378_v41  ;;  %v10245_v41 = vld [vmem:[#allocation2 + $0xe7] sm:$0xff] }
  0xcf   : > { %7132 = vmatmul.mubr.f32.vlgmr.msra.gmra.mrb[0].mxu0 %v379_v51  ;;  %v1265_v51 = vld [vmem:[#allocation6 + $0x188] sm:$0xff] }
  0xd0   : > { %8526 = vmatpush3.bf16.msra.mxu0 %v8523_v32  ;;  %7134 = vmatprep.mubr.f32.mxu0 %v10210_v52  ;;  %v10243_v32 = vld [vmem:[#allocation2 + $0xcf] sm:$0xff]  ;;  %v8555_v55 = vpack.c.bf16 %v1265_v51, %v1264_v43 }
  0xd1   : > { %8528 = vmatprep.subr.bf16.mxu0 %v8527_v53  ;;  %v10305_v43 = vld [vmem:[#allocation2 + $0x1ef] sm:$0xff] }
  0xd2   : > { %v925_v51 = vld [vmem:[#allocation2 + $0x9] sm:$0xff] }
  0xd3   : > { %7135 = vmatmul.mubr.f32.gmra.mrb[2].mxu0 %v10213_v56 }
  0xd4   : > { %7137 = vmatprep.mubr.f32.mxu0 %v10215_v57  ;;  %8530 = vmatpush3.bf16.msra.mxu0 %v8527_v53  ;;  %v10249_v53 = vld [vmem:[#allocation2 + $0xef] sm:$0xff] }
  0xd5   : > { %8532 = vmatprep.subr.bf16.mxu0 %v8531_v58 }
  0xd7   : > { %7138 = vmatmul.mubr.f32.gmra.mrb[4].mxu0 %v10219_v61 }
  0xd8   : > { %7140 = vmatprep.mubr.f32.mxu0 %v10221_v62  ;;  %8534 = vmatpush3.bf16.msra.mxu0 %v8531_v58  ;;  %v10255_v58 = vld [vmem:[#allocation2 + $0x10f] sm:$0xff] }
  0xd9   : > { %8536 = vmatprep.subr.bf16.mxu0 %v8535_v63 }
  0xdb   : > { %7141 = vmatmul.mubr.f32.gmra.mrb[6].mxu0 %v10225_v3 }
  0xdc   : > { %7143 = vmatprep.mubr.f32.mxu0 %v10227_v4  ;;  %8538 = vmatpush3.bf16.msra.mxu0 %v8535_v63  ;;  %v10263_v63 = vld [vmem:[#allocation2 + $0x147] sm:$0xff] }
  0xdd   : > { %8540 = vmatprep.subr.bf16.mxu0 %v8539_v5 }
  0xdf   : > { %7144 = vmatmul.mubr.f32.gmra.mrb[8].mxu0 %v10231_v7 }
  0xe0   : > { %7146 = vmatprep.mubr.f32.mxu0 %v10233_v8  ;;  %8542 = vmatpush3.bf16.msra.mxu0 %v8539_v5  ;;  %v10273_v5 = vld [vmem:[#allocation2 + $0x16f] sm:$0xff] }
  0xe1   : > { %8544 = vmatprep.subr.bf16.mxu0 %v8543_v9 }
  0xe3   : > { %7147 = vmatmul.mubr.f32.gmra.mrb[10].mxu0 %v10237_v19 }
  0xe4   : > { %7149 = vmatprep.mubr.f32.mxu0 %v10239_v20  ;;  %8546 = vmatpush3.bf16.msra.mxu0 %v8543_v9  ;;  %v10281_v9 = vld [vmem:[#allocation2 + $0x1a7] sm:$0xff] }
  0xe5   : > { %8548 = vmatprep.subr.bf16.mxu0 %v8547_v21 }
  0xe7   : > { %7150 = vmatmul.mubr.f32.gmra.mrb[12].mxu0 %v10243_v32 }
  0xe8   : > { %7152 = vmatprep.mubr.f32.mxu0 %v10245_v41  ;;  %8550 = vmatpush3.bf16.msra.mxu0 %v8547_v21  ;;  %v10290_v21 = vld [vmem:[%s10007_s12 + $0xf0] sm:$0xff] }
  0xe9   : > { %8552 = vmatprep.subr.bf16.mxu0 %v8551_v42  ;;  %11270 = vst [vmem:[#allocation23_spill] sm:$0xff] %v10290_v21  ;;  %376 = vst [vmem:[#allocation2 + $0x208] sm:$0xff] %v10290_v21  ;;  %v1266_v21 = vld [vmem:[#allocation6 + $0x190] sm:$0xff] }
  0xea   : > { %v8559_v48 = vpack.c.bf16 %v1267_v50, %v1266_v21  ;;  %v10319_v50 = vld [vmem:[#allocation2 + $0x69] sm:$0xff] }
  0xeb   : > { %7153 = vmatmul.mubr.f32.gmra.mrb[14].mxu0 %v10249_v53  ;;  %11276 = vst [vmem:[#allocation29_spill] sm:$0xff] %v10319_v50  ;;  %v1273_v21 = vld [vmem:[#allocation6 + $0x1c8] sm:$0xff] }
  0xec   : > { %7155 = vmatprep.mubr.f32.mxu0 %v10251_v54  ;;  %8554 = vmatpush3.bf16.msra.mxu0 %v8551_v42  ;;  %v10301_v42 = vld [vmem:[#allocation2 + $0x1e7] sm:$0xff] }
  0xed   : > { %8556 = vmatprep.subr.bf16.mxu0 %v8555_v55 }
  0xef   : > { %7156 = vmatmul.mubr.f32.gmra.mrb[16].mxu0 %v10255_v58 }
  0xf0   : > { %7158 = vmatprep.mubr.f32.mxu0 %v10257_v59 }
  0xf3   : > { %7159 = vmatmul.mubr.f32.gmra.mrb[18].mxu0 %v10261_v60 }
  0xf4   : > { %7161 = vmatprep.mubr.f32.mxu0 %v10263_v63 }
  0xf7   : > { %7162 = vmatmul.mubr.f32.gmra.mrb[20].mxu0 %v10267_v1 }
  0xf8   : > { %7164 = vmatprep.mubr.f32.mxu0 %v10269_v2 }
  0xfb   : > { %7165 = vmatmul.mubr.f32.gmra.mrb[22].mxu0 %v10273_v5 }
  0xfc   : > { %7167 = vmatprep.mubr.f32.mxu0 %v10275_v0 }
  0xff   : > { %7168 = vmatmul.mubr.f32.gmra.mrb[24].mxu0 %v10279_v6 }
 0x100   : > { %7170 = vmatprep.mubr.f32.mxu0 %v10281_v9 }
 0x103   : > { %7171 = vmatmul.mubr.f32.gmra.mrb[26].mxu0 %v10285_v10 }
 0x104   : > { %7173 = vmatprep.mubr.f32.mxu0 %v10287_v11 }
 0x107   : > { %7174 = vmatmul.mubr.f32.gmra.mrb[28].mxu0 %v10299_v31 }
 0x108   : > { %7176 = vmatprep.mubr.f32.mxu0 %v10301_v42 }
 0x10b   : > { %7177 = vmatmul.mubr.f32.gmra.mrb[30].mxu0 %v10305_v43 }
 0x10c   : > { %7211 = vmatprep.mubr.f32.mxu0 %v925_v51  ;;  %v10317_v51 = vld [vmem:[#allocation2 + $0x51] sm:$0xff] }
 0x10d   : > { %11275 = vst [vmem:[#allocation28_spill] sm:$0xff] %v10317_v51 }
 0x10f   : > { %7212 = vmatmul.mubr.f32.vlgmr.msra.gmra.mrb[0].mxu0 %v926_v49  ;;  %v8567_v49 = vpack.c.bf16 %v1271_v38, %v1270_v39  ;;  %v10329_v38 = vld [vmem:[#allocation2 + $0x91] sm:$0xff]  ;;  %v10331_v39 = vld [vmem:[#allocation2 + $0xa9] sm:$0xff] }
 0x110   : > { %8558 = vmatpush3.bf16.msra.mxu0 %v8555_v55  ;;  %7214 = vmatprep.mubr.f32.mxu0 %v10308_v30  ;;  %v1272_v55 = vld [vmem:[#allocation6 + $0x1c0] sm:$0xff]  ;;  %v1275_v30 = vld [vmem:[#allocation6 + $0x1d8] sm:$0xff]  ;;  %11279 = vst [vmem:[#allocation32_spill] sm:$0xff] %v10329_v38  ;;  %11280 = vst [vmem:[#allocation33_spill] sm:$0xff] %v10331_v39 }
 0x111   : > { %8560 = vmatprep.subr.bf16.mxu0 %v8559_v48 }
 0x113   : > { %7215 = vmatmul.mubr.f32.gmra.mrb[2].mxu0 %v10311_v45  ;;  %v1274_v45 = vld [vmem:[#allocation6 + $0x1d0] sm:$0xff] }
 0x114   : > { %7217 = vmatprep.mubr.f32.mxu0 %v10313_v44  ;;  %8562 = vmatpush3.bf16.msra.mxu0 %v8559_v48  ;;  %v8571_v44 = vpack.c.bf16 %v1273_v21, %v1272_v55  ;;  %v8575_v48 = vpack.c.bf16 %v1275_v30, %v1274_v45  ;;  %v10337_v55 = vld [vmem:[#allocation2 + $0xc9] sm:$0xff]  ;;  %v10341_v45 = vld [vmem:[#allocation2 + $0xd1] sm:$0xff] }
 0x115   : > { %8564 = vmatprep.subr.bf16.mxu0 %v8563_v40  ;;  %v10343_v30 = vld [vmem:[#allocation2 + $0xe9] sm:$0xff] }
 0x117   : > { %7218 = vmatmul.mubr.f32.gmra.mrb[4].mxu0 %v10317_v51  ;;  %v1277_v51 = vld [vmem:[#allocation6 + $0x1e8] sm:$0xff] }
 0x118   : > { %7220 = vmatprep.mubr.f32.mxu0 %v10319_v50  ;;  %8566 = vmatpush3.bf16.msra.mxu0 %v8563_v40  ;;  %v1276_v50 = vld [vmem:[#allocation6 + $0x1e0] sm:$0xff]  ;;  %v10335_v40 = vld [vmem:[#allocation2 + $0xb1] sm:$0xff] }
 0x119   : > { %8568 = vmatprep.subr.bf16.mxu0 %v8567_v49  ;;  %v8579_v21 = vpack.c.bf16 %v1277_v51, %v1276_v50  ;;  %v10349_v51 = vld [vmem:[#allocation2 + $0x109] sm:$0xff] }
 0x11a   : > { %11282 = vst [vmem:[#allocation35_spill] sm:$0xff] %v10349_v51 }
 0x11b   : > { %7221 = vmatmul.mubr.f32.gmra.mrb[6].mxu0 %v10323_v46  ;;  %v1279_v46 = vld [vmem:[#allocation6 + $0x1f8] sm:$0xff] }
 0x11c   : > { %7223 = vmatprep.mubr.f32.mxu0 %v10325_v47  ;;  %8570 = vmatpush3.bf16.msra.mxu0 %v8567_v49  ;;  %v1278_v47 = vld [vmem:[#allocation6 + $0x1f0] sm:$0xff] }
 0x11d   : > { %8572 = vmatprep.subr.bf16.mxu0 %v8571_v44  ;;  %v8583_v49 = vpack.c.bf16 %v1279_v46, %v1278_v47  ;;  %v10355_v46 = vld [vmem:[#allocation2 + $0x129] sm:$0xff]  ;;  %v10359_v47 = vld [vmem:[#allocation2 + $0x131] sm:$0xff] }
 0x11e   : > { %11284 = vst [vmem:[#allocation37_spill] sm:$0xff] %v10355_v46  ;;  %11285 = vst [vmem:[#allocation38_spill] sm:$0xff] %v10359_v47 }
 0x11f   : > { %7224 = vmatmul.mubr.f32.gmra.mrb[8].mxu0 %v10329_v38  ;;  %v1571_v38 = vld [vmem:[#allocation6 + $0x208] sm:$0xff] }
 0x120   : > { %7226 = vmatprep.mubr.f32.mxu0 %v10331_v39  ;;  %8574 = vmatpush3.bf16.msra.mxu0 %v8571_v44  ;;  %v1570_v39 = vld [vmem:[#allocation6 + $0x200] sm:$0xff]  ;;  %v10347_v44 = vld [vmem:[#allocation2 + $0xf1] sm:$0xff] }
 0x121   : > { %8576 = vmatprep.subr.bf16.mxu0 %v8575_v48  ;;  %11281 = vst [vmem:[#allocation34_spill] sm:$0xff] %v10347_v44  ;;  %v8587_v50 = vpack.c.bf16 %v1571_v38, %v1570_v39  ;;  %v10365_v38 = vld [vmem:[#allocation2 + $0x151] sm:$0xff]  ;;  %v10367_v39 = vld [vmem:[#allocation2 + $0x169] sm:$0xff] }
 0x122   : > { %11287 = vst [vmem:[#allocation40_spill] sm:$0xff] %v10365_v38  ;;  %11288 = vst [vmem:[#allocation41_spill] sm:$0xff] %v10367_v39 }
 0x123   : > { %7227 = vmatmul.mubr.f32.gmra.mrb[10].mxu0 %v10335_v40 }
 0x124   : > { %7229 = vmatprep.mubr.f32.mxu0 %v10337_v55  ;;  %8578 = vmatpush3.bf16.msra.mxu0 %v8575_v48  ;;  %v10353_v48 = vld [vmem:[#allocation2 + $0x111] sm:$0xff] }
 0x125   : > { %8580 = vmatprep.subr.bf16.mxu0 %v8579_v21  ;;  %11283 = vst [vmem:[#allocation36_spill] sm:$0xff] %v10353_v48 }
 0x127   : > { %7230 = vmatmul.mubr.f32.gmra.mrb[12].mxu0 %v10341_v45 }
 0x128   : > { %7232 = vmatprep.mubr.f32.mxu0 %v10343_v30  ;;  %8582 = vmatpush3.bf16.msra.mxu0 %v8579_v21  ;;  %v10361_v21 = vld [vmem:[#allocation2 + $0x149] sm:$0xff] }
 0x129   : > { %8584 = vmatprep.subr.bf16.mxu0 %v8583_v49  ;;  %11286 = vst [vmem:[#allocation39_spill] sm:$0xff] %v10361_v21 }
 0x12b   : > { %7233 = vmatmul.mubr.f32.gmra.mrb[14].mxu0 %v10347_v44  ;;  %v1575_v44 = vld [vmem:[#allocation6 + $0x228] sm:$0xff] }
 0x12c   : > { %7235 = vmatprep.mubr.f32.mxu0 %v10349_v51  ;;  %8586 = vmatpush3.bf16.msra.mxu0 %v8583_v49  ;;  %v10371_v49 = vld [vmem:[#allocation2 + $0x171] sm:$0xff] }
 0x12d   : > { %8588 = vmatprep.subr.bf16.mxu0 %v8587_v50  ;;  %11289 = vst [vmem:[#allocation42_spill] sm:$0xff] %v10371_v49 }
 0x12f   : > { %7236 = vmatmul.mubr.f32.gmra.mrb[16].mxu0 %v10353_v48  ;;  %v10373_v48 = vld [vmem:[#allocation2 + $0x189] sm:$0xff] }
 0x130   : > { %7238 = vmatprep.mubr.f32.mxu0 %v10355_v46  ;;  %11290 = vst [vmem:[#allocation43_spill] sm:$0xff] %v10373_v48  ;;  %v10377_v46 = vld [vmem:[#allocation2 + $0x191] sm:$0xff] }
 0x131   : > { %11291 = vst [vmem:[#allocation44_spill] sm:$0xff] %v10377_v46 }
 0x133   : > { %7239 = vmatmul.mubr.f32.gmra.mrb[18].mxu0 %v10359_v47  ;;  %v10379_v47 = vld [vmem:[#allocation2 + $0x1a9] sm:$0xff] }
 0x134   : > { %7241 = vmatprep.mubr.f32.mxu0 %v10361_v21  ;;  %11292 = vst [vmem:[#allocation45_spill] sm:$0xff] %v10379_v47  ;;  %v10383_v21 = vld [vmem:[#allocation2 + $0x1b1] sm:$0xff] }
 0x135   : > { %11293 = vst [vmem:[#allocation46_spill] sm:$0xff] %v10383_v21 }
 0x137   : > { %7242 = vmatmul.mubr.f32.gmra.mrb[20].mxu0 %v10365_v38  ;;  %v10385_v38 = vld [vmem:[#allocation2 + $0x1c9] sm:$0xff] }
 0x138   : > { %7244 = vmatprep.mubr.f32.mxu0 %v10367_v39  ;;  %11294 = vst [vmem:[#allocation47_spill] sm:$0xff] %v10385_v38  ;;  %v10389_v39 = vld [vmem:[#allocation2 + $0x1d1] sm:$0xff] }
 0x139   : > { %11295 = vst [vmem:[#allocation48_spill] sm:$0xff] %v10389_v39 }
 0x13b   : > { %7245 = vmatmul.mubr.f32.gmra.mrb[22].mxu0 %v10371_v49  ;;  %v10391_v49 = vld [vmem:[#allocation2 + $0x1e9] sm:$0xff] }
 0x13c   : > { %7247 = vmatprep.mubr.f32.mxu0 %v10373_v48  ;;  %11296 = vst [vmem:[#allocation49_spill] sm:$0xff] %v10391_v49  ;;  %v10395_v48 = vld [vmem:[#allocation2 + $0x1f1] sm:$0xff] }
 0x13d   : > { %11297 = vst [vmem:[#allocation50_spill] sm:$0xff] %v10395_v48 }
 0x13f   : > { %7248 = vmatmul.mubr.f32.gmra.mrb[24].mxu0 %v10377_v46  ;;  %v1572_v46 = vld [vmem:[#allocation6 + $0x210] sm:$0xff] }
 0x140   : > { %7250 = vmatprep.mubr.f32.mxu0 %v10379_v47  ;;  %v1573_v47 = vld [vmem:[#allocation6 + $0x218] sm:$0xff] }
 0x141   : > { %v8591_v51 = vpack.c.bf16 %v1573_v47, %v1572_v46  ;;  %v1579_v46 = vld [vmem:[#allocation6 + $0x248] sm:$0xff]  ;;  %v1582_v47 = vld [vmem:[#allocation6 + $0x260] sm:$0xff] }
 0x143   : > { %7251 = vmatmul.mubr.f32.gmra.mrb[26].mxu0 %v10383_v21  ;;  %v1574_v21 = vld [vmem:[#allocation6 + $0x220] sm:$0xff] }
 0x144   : > { %7253 = vmatprep.mubr.f32.mxu0 %v10385_v38  ;;  %v1576_v38 = vld [vmem:[#allocation6 + $0x230] sm:$0xff] }
 0x147   : > { %7254 = vmatmul.mubr.f32.gmra.mrb[28].mxu0 %v10389_v39  ;;  %v8595_v39 = vpack.c.bf16 %v1575_v44, %v1574_v21  ;;  %v1581_v44 = vld [vmem:[#allocation6 + $0x258] sm:$0xff]  ;;  %v1583_v21 = vld [vmem:[#allocation6 + $0x268] sm:$0xff] }
 0x148   : > { %7256 = vmatprep.mubr.f32.mxu0 %v10391_v49  ;;  %v1577_v49 = vld [vmem:[#allocation6 + $0x238] sm:$0xff] }
 0x14b   : > { %7257 = vmatmul.mubr.f32.gmra.mrb[30].mxu0 %v10395_v48  ;;  %v8599_v48 = vpack.c.bf16 %v1577_v49, %v1576_v38  ;;  %v8611_v38 = vpack.c.bf16 %v1583_v21, %v1582_v47  ;;  %v1585_v49 = vld [vmem:[#allocation6 + $0x278] sm:$0xff] }
 0x14c   : > { %7291 = vmatprep.mubr.f32.mxu0 %v10210_v52  ;;  %v1578_v52 = vld [vmem:[#allocation6 + $0x240] sm:$0xff]  ;;  %v1879_v47 = vld [vmem:[#allocation6 + $0x298] sm:$0xff] }
 0x14f   : > { %7292 = vmatmul.mubr.f32.vlgmr.msra.gmra.mrb[0].mxu0 %v10213_v56  ;;  %v8603_v56 = vpack.c.bf16 %v1579_v46, %v1578_v52  ;;  %v1876_v52 = vld [vmem:[#allocation6 + $0x280] sm:$0xff]  ;;  %v1877_v46 = vld [vmem:[#allocation6 + $0x288] sm:$0xff] }
 0x150   : > { %8590 = vmatpush3.bf16.msra.mxu0 %v8587_v50  ;;  %7294 = vmatprep.mubr.f32.mxu0 %v10215_v57  ;;  %v1580_v50 = vld [vmem:[#allocation6 + $0x250] sm:$0xff] }
 0x151   : > { %8592 = vmatprep.subr.bf16.mxu0 %v8591_v51 }
 0x153   : > { %7295 = vmatmul.mubr.f32.gmra.mrb[2].mxu0 %v10219_v61 }
 0x154   : > { %7297 = vmatprep.mubr.f32.mxu0 %v10221_v62  ;;  %8594 = vmatpush3.bf16.msra.mxu0 %v8591_v51  ;;  %v8607_v51 = vpack.c.bf16 %v1581_v44, %v1580_v50  ;;  %v10427_v50 = vld [vmem:[#allocation2 + $0x207] sm:$0xff]  ;;  %v10431_v44 = vld [vmem:[#allocation2 + $0x20f] sm:$0xff] }
 0x155   : > { %8596 = vmatprep.subr.bf16.mxu0 %v8595_v39 }
 0x157   : > { %7298 = vmatmul.mubr.f32.gmra.mrb[4].mxu0 %v10225_v3 }
 0x158   : > { %7300 = vmatprep.mubr.f32.mxu0 %v10227_v4  ;;  %8598 = vmatpush3.bf16.msra.mxu0 %v8595_v39  ;;  %v1584_v39 = vld [vmem:[#allocation6 + $0x270] sm:$0xff] }
 0x159   : > { %8600 = vmatprep.subr.bf16.mxu0 %v8599_v48 }
 0x15b   : > { %7301 = vmatmul.mubr.f32.gmra.mrb[6].mxu0 %v10231_v7 }
 0x15c   : > { %7303 = vmatprep.mubr.f32.mxu0 %v10233_v8  ;;  %8602 = vmatpush3.bf16.msra.mxu0 %v8599_v48  ;;  %v8615_v48 = vpack.c.bf16 %v1585_v49, %v1584_v39  ;;  %v1881_v39 = vld [vmem:[#allocation6 + $0x2a8] sm:$0xff] }
 0x15d   : > { %8604 = vmatprep.subr.bf16.mxu0 %v8603_v56 }
 0x15f   : > { %7304 = vmatmul.mubr.f32.gmra.mrb[8].mxu0 %v10237_v19 }
 0x160   : > { %7306 = vmatprep.mubr.f32.mxu0 %v10239_v20  ;;  %8606 = vmatpush3.bf16.msra.mxu0 %v8603_v56  ;;  %v8619_v56 = vpack.c.bf16 %v1877_v46, %v1876_v52  ;;  %v1883_v52 = vld [vmem:[#allocation6 + $0x2b8] sm:$0xff] }
 0x161   : > { %8608 = vmatprep.subr.bf16.mxu0 %v8607_v51 }
 0x163   : > { %7307 = vmatmul.mubr.f32.gmra.mrb[10].mxu0 %v10243_v32 }
 0x164   : > { %7309 = vmatprep.mubr.f32.mxu0 %v10245_v41  ;;  %8610 = vmatpush3.bf16.msra.mxu0 %v8607_v51  ;;  %v1878_v51 = vld [vmem:[#allocation6 + $0x290] sm:$0xff] }
 0x165   : > { %8612 = vmatprep.subr.bf16.mxu0 %v8611_v38  ;;  %v8623_v21 = vpack.c.bf16 %v1879_v47, %v1878_v51  ;;  %v1885_v51 = vld [vmem:[#allocation6 + $0x2c8] sm:$0xff] }
 0x166   : > { %v1889_v47 = vld [vmem:[#allocation6 + $0x2e8] sm:$0xff] }
 0x167   : > { %7310 = vmatmul.mubr.f32.gmra.mrb[12].mxu0 %v10249_v53 }
 0x168   : > { %7312 = vmatprep.mubr.f32.mxu0 %v10251_v54  ;;  %8614 = vmatpush3.bf16.msra.mxu0 %v8611_v38  ;;  %v1880_v38 = vld [vmem:[#allocation6 + $0x2a0] sm:$0xff] }
 0x169   : > { %8616 = vmatprep.subr.bf16.mxu0 %v8615_v48  ;;  %v8627_v49 = vpack.c.bf16 %v1881_v39, %v1880_v38  ;;  %v2184_v38 = vld [vmem:[#allocation6 + $0x308] sm:$0xff]  ;;  %v11305_v39 = vld [vmem:[#allocation20_spill] sm:$0xff] }
 0x16b   : > { %7313 = vmatmul.mubr.f32.gmra.mrb[14].mxu0 %v10255_v58 }
 0x16c   : > { %7315 = vmatprep.mubr.f32.mxu0 %v10257_v59  ;;  %8618 = vmatpush3.bf16.msra.mxu0 %v8615_v48  ;;  %v1882_v48 = vld [vmem:[#allocation6 + $0x2b0] sm:$0xff] }
 0x16d   : > { %8620 = vmatprep.subr.bf16.mxu0 %v8619_v56  ;;  %v8631_v46 = vpack.c.bf16 %v1883_v52, %v1882_v48  ;;  %v2186_v48 = vld [vmem:[#allocation6 + $0x318] sm:$0xff] }
 0x16e   : > { %v11309_v52 = vld [vmem:[#allocation24_spill] sm:$0xff] }
 0x16f   : > { %7316 = vmatmul.mubr.f32.gmra.mrb[16].mxu0 %v10261_v60 }
 0x170   : > { %7318 = vmatprep.mubr.f32.mxu0 %v10263_v63 }
 0x173   : > { %7319 = vmatmul.mubr.f32.gmra.mrb[18].mxu0 %v10267_v1 }
 0x174   : > { %7321 = vmatprep.mubr.f32.mxu0 %v10269_v2 }
 0x177   : > { %7322 = vmatmul.mubr.f32.gmra.mrb[20].mxu0 %v10273_v5 }
 0x178   : > { %7324 = vmatprep.mubr.f32.mxu0 %v10275_v0 }
 0x17b   : > { %7325 = vmatmul.mubr.f32.gmra.mrb[22].mxu0 %v10279_v6 }
 0x17c   : > { %7327 = vmatprep.mubr.f32.mxu0 %v10281_v9 }
 0x17f   : > { %7328 = vmatmul.mubr.f32.gmra.mrb[24].mxu0 %v10285_v10 }
 0x180   : > { %7330 = vmatprep.mubr.f32.mxu0 %v10287_v11 }
 0x183   : > { %7331 = vmatmul.mubr.f32.gmra.mrb[26].mxu0 %v10299_v31 }
 0x184   : > { %7333 = vmatprep.mubr.f32.mxu0 %v10301_v42 }
 0x187   : > { %7334 = vmatmul.mubr.f32.gmra.mrb[28].mxu0 %v10305_v43 }
 0x188   : > { %7336 = vmatprep.mubr.f32.mxu0 %v10427_v50 }
 0x18b   : > { %7337 = vmatmul.mubr.f32.gmra.mrb[30].mxu0 %v10431_v44 }
 0x18c   : > { %7371 = vmatprep.mubr.f32.mxu0 %v10060_v12  ;;  %v1884_v12 = vld [vmem:[#allocation6 + $0x2c0] sm:$0xff] }
 0x18f   : > { %7372 = vmatmul.mubr.f32.vlgmr.msra.gmra.mrb[0].mxu0 %v10063_v13  ;;  %v8635_v13 = vpack.c.bf16 %v1885_v51, %v1884_v12  ;;  %v2187_v51 = vld [vmem:[#allocation6 + $0x320] sm:$0xff] }
 0x190   : > { %8622 = vmatpush3.bf16.msra.mxu0 %v8619_v56  ;;  %7374 = vmatprep.mubr.f32.mxu0 %v10066_v14  ;;  %v1886_v14 = vld [vmem:[#allocation6 + $0x2d0] sm:$0xff]  ;;  %v1887_v56 = vld [vmem:[#allocation6 + $0x2d8] sm:$0xff] }
 0x191   : > { %8624 = vmatprep.subr.bf16.mxu0 %v8623_v21 }
 0x193   : > { %7375 = vmatmul.mubr.f32.gmra.mrb[2].mxu0 %v10072_v15  ;;  %v8639_v15 = vpack.c.bf16 %v1887_v56, %v1886_v14  ;;  %v11311_v14 = vld [vmem:[#allocation26_spill] sm:$0xff]  ;;  %v11312_v56 = vld [vmem:[#allocation27_spill] sm:$0xff] }
 0x194   : > { %7377 = vmatprep.mubr.f32.mxu0 %v10076_v16  ;;  %8626 = vmatpush3.bf16.msra.mxu0 %v8623_v21  ;;  %v1888_v16 = vld [vmem:[#allocation6 + $0x2e0] sm:$0xff]  ;;  %v1891_v21 = vld [vmem:[#allocation6 + $0x2f8] sm:$0xff] }
 0x195   : > { %8628 = vmatprep.subr.bf16.mxu0 %v8627_v49 }
 0x197   : > { %7378 = vmatmul.mubr.f32.gmra.mrb[4].mxu0 %v10079_v17  ;;  %v8643_v17 = vpack.c.bf16 %v1889_v47, %v1888_v16  ;;  %v2189_v16 = vld [vmem:[#allocation6 + $0x330] sm:$0xff]  ;;  %v2190_v47 = vld [vmem:[#allocation6 + $0x338] sm:$0xff] }
 0x198   : > { %7380 = vmatprep.mubr.f32.mxu0 %v10082_v18  ;;  %8630 = vmatpush3.bf16.msra.mxu0 %v8627_v49  ;;  %v1890_v18 = vld [vmem:[#allocation6 + $0x2f0] sm:$0xff] }
 0x199   : > { %8632 = vmatprep.subr.bf16.mxu0 %v8631_v46  ;;  %v2185_v49 = vld [vmem:[#allocation6 + $0x310] sm:$0xff] }
 0x19a   : > { %v8655_v12 = vpack.c.bf16 %v2186_v48, %v2185_v49  ;;  %v2489_v48 = vld [vmem:[#allocation6 + $0x380] sm:$0xff] }
 0x19b   : > { %7381 = vmatmul.mubr.f32.gmra.mrb[6].mxu0 %v10088_v22  ;;  %v8647_v22 = vpack.c.bf16 %v1891_v21, %v1890_v18  ;;  %v11314_v18 = vld [vmem:[#allocation29_spill] sm:$0xff]  ;;  %v8663_v21 = vpack.c.bf16 %v2190_v47, %v2189_v16  ;;  %v11329_v16 = vld [vmem:[#allocation44_spill] sm:$0xff] }
 0x19c   : > { %7383 = vmatprep.mubr.f32.mxu0 %v10092_v23  ;;  %8634 = vmatpush3.bf16.msra.mxu0 %v8631_v46  ;;  %v2183_v23 = vld [vmem:[#allocation6 + $0x300] sm:$0xff] }
 0x19d   : > { %8636 = vmatprep.subr.bf16.mxu0 %v8635_v13  ;;  %v11310_v46 = vld [vmem:[#allocation25_spill] sm:$0xff] }
 0x19e   : > { %v11330_v47 = vld [vmem:[#allocation45_spill] sm:$0xff] }
 0x19f   : > { %7384 = vmatmul.mubr.f32.gmra.mrb[8].mxu0 %v10095_v24  ;;  %v8651_v24 = vpack.c.bf16 %v2184_v38, %v2183_v23  ;;  %v2192_v23 = vld [vmem:[#allocation6 + $0x348] sm:$0xff] }
 0x1a0   : > { %7386 = vmatprep.mubr.f32.mxu0 %v10098_v25  ;;  %8638 = vmatpush3.bf16.msra.mxu0 %v8635_v13  ;;  %v11298_v25 = vld [vmem:[#allocation13_spill] sm:$0xff]  ;;  %v2188_v13 = vld [vmem:[#allocation6 + $0x328] sm:$0xff] }
 0x1a1   : > { %8640 = vmatprep.subr.bf16.mxu0 %v8639_v15  ;;  %v11315_v38 = vld [vmem:[#allocation30_spill] sm:$0xff] }
 0x1a3   : > { %7387 = vmatmul.mubr.f32.gmra.mrb[10].mxu0 %v10104_v26  ;;  %v11299_v26 = vld [vmem:[#allocation14_spill] sm:$0xff] }
 0x1a4   : > { %7389 = vmatprep.mubr.f32.mxu0 %v10108_v27  ;;  %8642 = vmatpush3.bf16.msra.mxu0 %v8639_v15  ;;  %v11300_v27 = vld [vmem:[#allocation15_spill] sm:$0xff]  ;;  %v8659_v15 = vpack.c.bf16 %v2188_v13, %v2187_v51  ;;  %v11322_v51 = vld [vmem:[#allocation37_spill] sm:$0xff]  ;;  %v11325_v13 = vld [vmem:[#allocation40_spill] sm:$0xff] }
 0x1a5   : > { %8644 = vmatprep.subr.bf16.mxu0 %v8643_v17 }
 0x1a7   : > { %7390 = vmatmul.mubr.f32.gmra.mrb[12].mxu0 %v10111_v28  ;;  %v11301_v28 = vld [vmem:[#allocation16_spill] sm:$0xff] }
 0x1a8   : > { %7392 = vmatprep.mubr.f32.mxu0 %v10114_v29  ;;  %8646 = vmatpush3.bf16.msra.mxu0 %v8643_v17  ;;  %v11302_v29 = vld [vmem:[#allocation17_spill] sm:$0xff]  ;;  %v11313_v17 = vld [vmem:[#allocation28_spill] sm:$0xff] }
 0x1a9   : > { %8648 = vmatprep.subr.bf16.mxu0 %v8647_v22 }
 0x1ab   : > { %7393 = vmatmul.mubr.f32.gmra.mrb[14].mxu0 %v10120_v33  ;;  %v11303_v33 = vld [vmem:[#allocation18_spill] sm:$0xff] }
 0x1ac   : > { %7395 = vmatprep.mubr.f32.mxu0 %v10124_v34  ;;  %8650 = vmatpush3.bf16.msra.mxu0 %v8647_v22  ;;  %v11304_v34 = vld [vmem:[#allocation19_spill] sm:$0xff]  ;;  %v2191_v22 = vld [vmem:[#allocation6 + $0x340] sm:$0xff] }
 0x1ad   : > { %8652 = vmatprep.subr.bf16.mxu0 %v8651_v24 }
 0x1af   : > { %7396 = vmatmul.mubr.f32.gmra.mrb[16].mxu0 %v10127_v35  ;;  %v11306_v35 = vld [vmem:[#allocation21_spill] sm:$0xff] }
 0x1b0   : > { %7398 = vmatprep.mubr.f32.mxu0 %v10130_v36  ;;  %v11307_v36 = vld [vmem:[#allocation22_spill] sm:$0xff] }
 0x1b3   : > { %7399 = vmatmul.mubr.f32.gmra.mrb[18].mxu0 %v10136_v37  ;;  %v11308_v37 = vld [vmem:[#allocation23_spill] sm:$0xff] }
 0x1b4   : > { %7401 = vmatprep.mubr.f32.mxu0 %v11298_v25  ;;  %v11316_v25 = vld [vmem:[#allocation31_spill] sm:$0xff] }
 0x1b7   : > { %7402 = vmatmul.mubr.f32.gmra.mrb[20].mxu0 %v11299_v26  ;;  %v2193_v26 = vld [vmem:[#allocation6 + $0x350] sm:$0xff] }
 0x1b8   : > { %7404 = vmatprep.mubr.f32.mxu0 %v11300_v27  ;;  %v2194_v27 = vld [vmem:[#allocation6 + $0x358] sm:$0xff] }
 0x1bb   : > { %7405 = vmatmul.mubr.f32.gmra.mrb[22].mxu0 %v11301_v28  ;;  %v11317_v28 = vld [vmem:[#allocation32_spill] sm:$0xff] }
 0x1bc   : > { %7407 = vmatprep.mubr.f32.mxu0 %v11302_v29  ;;  %v11318_v29 = vld [vmem:[#allocation33_spill] sm:$0xff] }
 0x1bf   : > { %7408 = vmatmul.mubr.f32.gmra.mrb[24].mxu0 %v11303_v33  ;;  %v8671_v33 = vpack.c.bf16 %v2194_v27, %v2193_v26  ;;  %v2492_v26 = vld [vmem:[#allocation6 + $0x398] sm:$0xff] }
 0x1c0   : > { %7410 = vmatprep.mubr.f32.mxu0 %v11304_v34  ;;  %v2195_v34 = vld [vmem:[#allocation6 + $0x360] sm:$0xff] }
 0x1c3   : > { %7411 = vmatmul.mubr.f32.gmra.mrb[26].mxu0 %v11305_v39  ;;  %v2196_v39 = vld [vmem:[#allocation6 + $0x368] sm:$0xff] }
 0x1c4   : > { %7413 = vmatprep.mubr.f32.mxu0 %v11306_v35  ;;  %v8675_v35 = vpack.c.bf16 %v2196_v39, %v2195_v34  ;;  %v2495_v34 = vld [vmem:[#allocation6 + $0x3b0] sm:$0xff]  ;;  %v2496_v39 = vld [vmem:[#allocation6 + $0x3b8] sm:$0xff] }
 0x1c7   : > { %7414 = vmatmul.mubr.f32.gmra.mrb[28].mxu0 %v11307_v36  ;;  %v2197_v36 = vld [vmem:[#allocation6 + $0x370] sm:$0xff] }
 0x1c8   : > { %7416 = vmatprep.mubr.f32.mxu0 %v11308_v37  ;;  %v2198_v37 = vld [vmem:[#allocation6 + $0x378] sm:$0xff] }
 0x1c9   : > { %v8679_v49 = vpack.c.bf16 %v2198_v37, %v2197_v36  ;;  %v2498_v36 = vld [vmem:[#allocation6 + $0x3c8] sm:$0xff]  ;;  %v2500_v37 = vld [vmem:[#allocation6 + $0x3d8] sm:$0xff] }
 0x1cb   : > { %7417 = vmatmul.mubr.f32.gmra.mrb[30].mxu0 %v11309_v52  ;;  %v2490_v52 = vld [vmem:[#allocation6 + $0x388] sm:$0xff] }
 0x1cc   : > { %7451 = vmatprep.mubr.f32.mxu0 %v11310_v46  ;;  %v11319_v46 = vld [vmem:[#allocation34_spill] sm:$0xff] }
 0x1cf   : > { %7452 = vmatmul.mubr.f32.vlgmr.msra.gmra.mrb[0].mxu0 %v11311_v14  ;;  %v11326_v14 = vld [vmem:[#allocation41_spill] sm:$0xff] }
 0x1d0   : > { %8654 = vmatpush3.bf16.msra.mxu0 %v8651_v24  ;;  %7454 = vmatprep.mubr.f32.mxu0 %v11312_v56  ;;  %v8667_v24 = vpack.c.bf16 %v2192_v23, %v2191_v22  ;;  %v11327_v56 = vld [vmem:[#allocation42_spill] sm:$0xff]  ;;  %v11334_v22 = vld [vmem:[#allocation49_spill] sm:$0xff] }
 0x1d1   : > { %8656 = vmatprep.subr.bf16.mxu0 %v8655_v12  ;;  %v10495_v23 = vld [vmem:[#allocation2 + $0x209] sm:$0xff] }
 0x1d3   : > { %7455 = vmatmul.mubr.f32.gmra.mrb[2].mxu0 %v11313_v17  ;;  %v11331_v17 = vld [vmem:[#allocation46_spill] sm:$0xff] }
 0x1d4   : > { %7457 = vmatprep.mubr.f32.mxu0 %v11314_v18  ;;  %8658 = vmatpush3.bf16.msra.mxu0 %v8655_v12  ;;  %v11320_v12 = vld [vmem:[#allocation35_spill] sm:$0xff] }
 0x1d5   : > { %8660 = vmatprep.subr.bf16.mxu0 %v8659_v15  ;;  %v11332_v18 = vld [vmem:[#allocation47_spill] sm:$0xff] }
 0x1d7   : > { %7458 = vmatmul.mubr.f32.gmra.mrb[4].mxu0 %v11315_v38  ;;  %v11335_v38 = vld [vmem:[#allocation50_spill] sm:$0xff] }
 0x1d8   : > { %7460 = vmatprep.mubr.f32.mxu0 %v11316_v25  ;;  %8662 = vmatpush3.bf16.msra.mxu0 %v8659_v15  ;;  %v11328_v15 = vld [vmem:[#allocation43_spill] sm:$0xff] }
 0x1d9   : > { %8664 = vmatprep.subr.bf16.mxu0 %v8663_v21  ;;  %v10499_v25 = vld [vmem:[#allocation2 + $0x211] sm:$0xff] }
 0x1db   : > { %7461 = vmatmul.mubr.f32.gmra.mrb[6].mxu0 %v11317_v28  ;;  %v2493_v28 = vld [vmem:[#allocation6 + $0x3a0] sm:$0xff] }
 0x1dc   : > { %7463 = vmatprep.mubr.f32.mxu0 %v11318_v29  ;;  %8666 = vmatpush3.bf16.msra.mxu0 %v8663_v21  ;;  %v11333_v21 = vld [vmem:[#allocation48_spill] sm:$0xff]  ;;  %v2494_v29 = vld [vmem:[#allocation6 + $0x3a8] sm:$0xff] }
 0x1dd   : > { %8668 = vmatprep.subr.bf16.mxu0 %v8667_v24 }
 0x1df   : > { %7464 = vmatmul.mubr.f32.gmra.mrb[8].mxu0 %v10335_v40  ;;  %v8683_v40 = vpack.c.bf16 %v2490_v52, %v2489_v48  ;;  %v2504_v48 = vld [vmem:[#allocation6 + $0x3f8] sm:$0xff]  ;;  %v2796_v52 = vld [vmem:[#allocation6 + $0x408] sm:$0xff] }
 0x1e0   : > { %7466 = vmatprep.mubr.f32.mxu0 %v10337_v55  ;;  %8670 = vmatpush3.bf16.msra.mxu0 %v8667_v24  ;;  %v11321_v55 = vld [vmem:[#allocation36_spill] sm:$0xff]  ;;  %v2491_v24 = vld [vmem:[#allocation6 + $0x390] sm:$0xff] }
 0x1e1   : > { %8672 = vmatprep.subr.bf16.mxu0 %v8671_v33  ;;  %v8687_v27 = vpack.c.bf16 %v2492_v26, %v2491_v24  ;;  %v2806_v26 = vld [vmem:[#allocation6 + $0x458] sm:$0xff] }
 0x1e3   : > { %7467 = vmatmul.mubr.f32.gmra.mrb[10].mxu0 %v10341_v45  ;;  %v11323_v45 = vld [vmem:[#allocation38_spill] sm:$0xff] }
 0x1e4   : > { %7469 = vmatprep.mubr.f32.mxu0 %v10343_v30  ;;  %8674 = vmatpush3.bf16.msra.mxu0 %v8671_v33  ;;  %v11324_v30 = vld [vmem:[#allocation39_spill] sm:$0xff]  ;;  %v8691_v33 = vpack.c.bf16 %v2494_v29, %v2493_v28  ;;  %v3263_v28 = vld [vmem:[#allocation8 + $0xd8] sm:$0xff] }
 0x1e5   : > { %8676 = vmatprep.subr.bf16.mxu0 %v8675_v35  ;;  %v2465_v29 = vld [vmem:[#allocation2 + $0xd0] sm:$0xff] }
 0x1e7   : > { %7470 = vmatmul.mubr.f32.gmra.mrb[12].mxu0 %v11319_v46 }
 0x1e8   : > { %7472 = vmatprep.mubr.f32.mxu0 %v11320_v12  ;;  %8678 = vmatpush3.bf16.msra.mxu0 %v8675_v35  ;;  %v8695_v35 = vpack.c.bf16 %v2496_v39, %v2495_v34  ;;  %v2801_v12 = vld [vmem:[#allocation6 + $0x430] sm:$0xff] }
 0x1e9   : > { %8680 = vmatprep.subr.bf16.mxu0 %v8679_v49 }
 0x1eb   : > { %7473 = vmatmul.mubr.f32.gmra.mrb[14].mxu0 %v11321_v55  ;;  %v2802_v55 = vld [vmem:[#allocation6 + $0x438] sm:$0xff] }
 0x1ec   : > { %7475 = vmatprep.mubr.f32.mxu0 %v11322_v51  ;;  %8682 = vmatpush3.bf16.msra.mxu0 %v8679_v49  ;;  %v2502_v49 = vld [vmem:[#allocation6 + $0x3e8] sm:$0xff]  ;;  %v3258_v51 = vld [vmem:[#allocation8 + $0xb0] sm:$0xff] }
 0x1ed   : > { %8684 = vmatprep.subr.bf16.mxu0 %v8683_v40 }
 0x1ef   : > { %7476 = vmatmul.mubr.f32.gmra.mrb[16].mxu0 %v11323_v45  ;;  %v3259_v45 = vld [vmem:[#allocation8 + $0xb8] sm:$0xff] }
 0x1f0   : > { %7478 = vmatprep.mubr.f32.mxu0 %v11324_v30  ;;  %v2461_v30 = vld [vmem:[#allocation2 + $0x90] sm:$0xff] }
 0x1f3   : > { %7479 = vmatmul.mubr.f32.gmra.mrb[18].mxu0 %v11325_v13  ;;  %v2462_v13 = vld [vmem:[#allocation2 + $0xa8] sm:$0xff] }
 0x1f4   : > { %7481 = vmatprep.mubr.f32.mxu0 %v11326_v14  ;;  %v8727_v14 = vpack.c.bf16 %v2802_v55, %v2801_v12  ;;  %v2773_v12 = vld [vmem:[#allocation2 + $0xf1] sm:$0xff] }
 0x1f5   : > { %v2775_v55 = vld [vmem:[#allocation2 + $0x111] sm:$0xff] }
 0x1f7   : > { %7482 = vmatmul.mubr.f32.gmra.mrb[20].mxu0 %v11327_v56  ;;  %v2803_v56 = vld [vmem:[#allocation6 + $0x440] sm:$0xff] }
 0x1f8   : > { %7484 = vmatprep.mubr.f32.mxu0 %v11328_v15  ;;  %v8759_v15 = vpack.c.bf16 %v3259_v45, %v3258_v51  ;;  %v2776_v51 = vld [vmem:[#allocation2 + $0x129] sm:$0xff]  ;;  %v2777_v45 = vld [vmem:[#allocation2 + $0x131] sm:$0xff] }
 0x1fb   : > { %7485 = vmatmul.mubr.f32.gmra.mrb[22].mxu0 %v11329_v16  ;;  %v2804_v16 = vld [vmem:[#allocation6 + $0x448] sm:$0xff] }
 0x1fc   : > { %7487 = vmatprep.mubr.f32.mxu0 %v11330_v47  ;;  %v3260_v47 = vld [vmem:[#allocation8 + $0xc0] sm:$0xff] }
 0x1ff   : > { %7488 = vmatmul.mubr.f32.gmra.mrb[24].mxu0 %v11331_v17  ;;  %v3261_v17 = vld [vmem:[#allocation8 + $0xc8] sm:$0xff] }
 0x200   : > { %7490 = vmatprep.mubr.f32.mxu0 %v11332_v18  ;;  %v2463_v18 = vld [vmem:[#allocation2 + $0xb0] sm:$0xff]  ;;  %v8763_v24 = vpack.c.bf16 %v3261_v17, %v3260_v47 }
 0x201   : > { %v2784_v47 = vld [vmem:[#allocation2 + $0x1a9] sm:$0xff]  ;;  %v2785_v17 = vld [vmem:[#allocation2 + $0x1b1] sm:$0xff] }
 0x203   : > { %7491 = vmatmul.mubr.f32.gmra.mrb[26].mxu0 %v11333_v21  ;;  %v2464_v21 = vld [vmem:[#allocation2 + $0xc8] sm:$0xff] }
 0x204   : > { %7493 = vmatprep.mubr.f32.mxu0 %v11334_v22  ;;  %v8731_v22 = vpack.c.bf16 %v2804_v16, %v2803_v56  ;;  %v2781_v56 = vld [vmem:[#allocation2 + $0x171] sm:$0xff] }
 0x205   : > { %v2783_v16 = vld [vmem:[#allocation2 + $0x191] sm:$0xff] }
 0x207   : > { %7494 = vmatmul.mubr.f32.gmra.mrb[28].mxu0 %v11335_v38  ;;  %v2805_v38 = vld [vmem:[#allocation6 + $0x450] sm:$0xff] }
 0x208   : > { %7496 = vmatprep.mubr.f32.mxu0 %v10495_v23  ;;  %v8735_v34 = vpack.c.bf16 %v2806_v26, %v2805_v38  ;;  %v2789_v38 = vld [vmem:[#allocation2 + $0x1f1] sm:$0xff] }
 0x209   : > { %v2793_v26 = vld [vmem:[#allocation2 + $0x231] sm:$0xff] }
 0x20b   : > { %7497 = vmatmul.mubr.f32.gmra.mrb[30].mxu0 %v10499_v25 }
 0x20c   : > { %7531 = vmatprep.mubr.f32.mxu0 %v10215_v57  ;;  %v2497_v57 = vld [vmem:[#allocation6 + $0x3c0] sm:$0xff] }
 0x20f   : > { %7532 = vmatmul.mubr.f32.vlgmr.msra.gmra.mrb[0].mxu0 %v10219_v61  ;;  %v8699_v61 = vpack.c.bf16 %v2498_v36, %v2497_v57  ;;  %v2808_v57 = vld [vmem:[#allocation6 + $0x468] sm:$0xff]  ;;  %v2467_v36 = vld [vmem:[#allocation2 + $0xf0] sm:$0xff] }
 0x210   : > { %8686 = vmatpush3.bf16.msra.mxu0 %v8683_v40  ;;  %7534 = vmatprep.mubr.f32.mxu0 %v10221_v62  ;;  %v2499_v62 = vld [vmem:[#allocation6 + $0x3d0] sm:$0xff] }
 0x211   : > { %8688 = vmatprep.subr.bf16.mxu0 %v8687_v27 }
 0x213   : > { %7535 = vmatmul.mubr.f32.gmra.mrb[2].mxu0 %v10225_v3  ;;  %v8703_v3 = vpack.c.bf16 %v2500_v37, %v2499_v62  ;;  %v2809_v37 = vld [vmem:[#allocation6 + $0x470] sm:$0xff] }
 0x214   : > { %7537 = vmatprep.mubr.f32.mxu0 %v10227_v4  ;;  %8690 = vmatpush3.bf16.msra.mxu0 %v8687_v27  ;;  %v2501_v4 = vld [vmem:[#allocation6 + $0x3e0] sm:$0xff]  ;;  %v3262_v27 = vld [vmem:[#allocation8 + $0xd0] sm:$0xff] }
 0x215   : > { %8692 = vmatprep.subr.bf16.mxu0 %v8691_v33  ;;  %v8767_v39 = vpack.c.bf16 %v3263_v28, %v3262_v27  ;;  %v3264_v27 = vld [vmem:[#allocation8 + $0xe0] sm:$0xff]  ;;  %v3265_v28 = vld [vmem:[#allocation8 + $0xe8] sm:$0xff] }
 0x217   : > { %7538 = vmatmul.mubr.f32.gmra.mrb[4].mxu0 %v10231_v7  ;;  %v8707_v7 = vpack.c.bf16 %v2502_v49, %v2501_v4  ;;  %v2469_v4 = vld [vmem:[#allocation2 + $0x110] sm:$0xff]  ;;  %v2470_v49 = vld [vmem:[#allocation2 + $0x128] sm:$0xff] }
 0x218   : > { %7540 = vmatprep.mubr.f32.mxu0 %v10233_v8  ;;  %8694 = vmatpush3.bf16.msra.mxu0 %v8691_v33  ;;  %v2503_v8 = vld [vmem:[#allocation6 + $0x3f0] sm:$0xff]  ;;  %v2466_v33 = vld [vmem:[#allocation2 + $0xe8] sm:$0xff] }
 0x219   : > { %8696 = vmatprep.subr.bf16.mxu0 %v8695_v35 }
 0x21b   : > { %7541 = vmatmul.mubr.f32.gmra.mrb[6].mxu0 %v10237_v19  ;;  %v8711_v19 = vpack.c.bf16 %v2504_v48, %v2503_v8  ;;  %v2471_v8 = vld [vmem:[#allocation2 + $0x130] sm:$0xff]  ;;  %v2472_v48 = vld [vmem:[#allocation2 + $0x148] sm:$0xff] }
 0x21c   : > { %7543 = vmatprep.mubr.f32.mxu0 %v10239_v20  ;;  %8698 = vmatpush3.bf16.msra.mxu0 %v8695_v35  ;;  %v2795_v20 = vld [vmem:[#allocation6 + $0x400] sm:$0xff] }
 0x21d   : > { %8700 = vmatprep.subr.bf16.mxu0 %v8699_v61  ;;  %v2807_v35 = vld [vmem:[#allocation6 + $0x460] sm:$0xff] }
 0x21e   : > { %v8739_v62 = vpack.c.bf16 %v2808_v57, %v2807_v35  ;;  %v3203_v35 = vld [vmem:[#allocation8] sm:$0xff] }
 0x21f   : > { %7544 = vmatmul.mubr.f32.gmra.mrb[8].mxu0 %v10243_v32  ;;  %v8715_v32 = vpack.c.bf16 %v2796_v52, %v2795_v20  ;;  %v2474_v20 = vld [vmem:[#allocation2 + $0x168] sm:$0xff]  ;;  %v2475_v52 = vld [vmem:[#allocation2 + $0x170] sm:$0xff] }
 0x220   : > { %7546 = vmatprep.mubr.f32.mxu0 %v10245_v41  ;;  %8702 = vmatpush3.bf16.msra.mxu0 %v8699_v61  ;;  %v2180_v41 = vld [vmem:[#allocation2 + $0x227] sm:$0xff] }
 0x221   : > { %8704 = vmatprep.subr.bf16.mxu0 %v8703_v3  ;;  %v2468_v61 = vld [vmem:[#allocation2 + $0x108] sm:$0xff] }
 0x223   : > { %7547 = vmatmul.mubr.f32.gmra.mrb[10].mxu0 %v10249_v53  ;;  %v2181_v53 = vld [vmem:[#allocation2 + $0x22f] sm:$0xff] }
 0x224   : > { %7549 = vmatprep.mubr.f32.mxu0 %v10251_v54  ;;  %8706 = vmatpush3.bf16.msra.mxu0 %v8703_v3  ;;  %v2456_v54 = vld [vmem:[#allocation2 + $0x48] sm:$0xff]  ;;  %v2810_v3 = vld [vmem:[#allocation6 + $0x478] sm:$0xff] }
 0x225   : > { %8708 = vmatprep.subr.bf16.mxu0 %v8707_v7 }
 0x227   : > { %7550 = vmatmul.mubr.f32.gmra.mrb[12].mxu0 %v10255_v58  ;;  %v2797_v58 = vld [vmem:[#allocation6 + $0x410] sm:$0xff] }
 0x228   : > { %7552 = vmatprep.mubr.f32.mxu0 %v10257_v59  ;;  %8710 = vmatpush3.bf16.msra.mxu0 %v8707_v7  ;;  %v2798_v59 = vld [vmem:[#allocation6 + $0x418] sm:$0xff]  ;;  %v8743_v7 = vpack.c.bf16 %v2810_v3, %v2809_v37  ;;  %v3208_v37 = vld [vmem:[#allocation8 + $0x28] sm:$0xff] }
 0x229   : > { %8712 = vmatprep.subr.bf16.mxu0 %v8711_v19 }
 0x22b   : > { %7553 = vmatmul.mubr.f32.gmra.mrb[14].mxu0 %v10261_v60  ;;  %v3252_v60 = vld [vmem:[#allocation8 + $0x80] sm:$0xff] }
 0x22c   : > { %7555 = vmatprep.mubr.f32.mxu0 %v10263_v63  ;;  %8714 = vmatpush3.bf16.msra.mxu0 %v8711_v19  ;;  %v3253_v63 = vld [vmem:[#allocation8 + $0x88] sm:$0xff]  ;;  %v2473_v19 = vld [vmem:[#allocation2 + $0x150] sm:$0xff] }
 0x22d   : > { %8716 = vmatprep.subr.bf16.mxu0 %v8715_v32 }
 0x22f   : > { %7556 = vmatmul.mubr.f32.gmra.mrb[16].mxu0 %v10267_v1  ;;  %v3254_v1 = vld [vmem:[#allocation8 + $0x90] sm:$0xff] }
 0x230   : > { %7558 = vmatprep.mubr.f32.mxu0 %v10269_v2  ;;  %v2457_v2 = vld [vmem:[#allocation2 + $0x50] sm:$0xff] }
 0x233   : > { %7559 = vmatmul.mubr.f32.gmra.mrb[18].mxu0 %v10273_v5  ;;  %v8747_v5 = vpack.c.bf16 %v3253_v63, %v3252_v60  ;;  %v2482_v60 = vld [vmem:[#allocation2 + $0x1e8] sm:$0xff]  ;;  %v2483_v63 = vld [vmem:[#allocation2 + $0x1f0] sm:$0xff] }
 0x234   : > { %7561 = vmatprep.mubr.f32.mxu0 %v10275_v0  ;;  %v3255_v0 = vld [vmem:[#allocation8 + $0x98] sm:$0xff] }
 0x235   : > { %8748 = vmatprep.subr.bf16.mxu1 %v8747_v5 }
 0x236   : > { %8750 = vmatpush3.bf16.msra.mxu1 %v8747_v5  ;;  %v10532_v5 = vld [vmem:[#allocation2 + $0x8] sm:$0xff] }
 0x237   : > { %7562 = vmatmul.mubr.f32.gmra.mrb[20].mxu0 %v10279_v6  ;;  %v2458_v6 = vld [vmem:[#allocation2 + $0x68] sm:$0xff] }
 0x238   : > { %7564 = vmatprep.mubr.f32.mxu0 %v10281_v9  ;;  %v8719_v9 = vpack.c.bf16 %v2798_v59, %v2797_v58  ;;  %v2480_v58 = vld [vmem:[#allocation2 + $0x1c8] sm:$0xff]  ;;  %v2481_v59 = vld [vmem:[#allocation2 + $0x1d0] sm:$0xff] }
 0x23b   : > { %7565 = vmatmul.mubr.f32.gmra.mrb[22].mxu0 %v10285_v10  ;;  %v2799_v10 = vld [vmem:[#allocation6 + $0x420] sm:$0xff] }
 0x23c   : > { %7567 = vmatprep.mubr.f32.mxu0 %v10287_v11  ;;  %v8751_v11 = vpack.c.bf16 %v3255_v0, %v3254_v1  ;;  %v9619_v1 = vld [vmem:[#allocation2 + $0x208] sm:$0xff] }
 0x23d   : > { %v2762_v0 = vld [vmem:[#allocation2 + $0x49] sm:$0xff] }
 0x23e   : > { %8752 = vmatprep.subr.bf16.mxu1 %v8751_v11 }
 0x23f   : > { %7568 = vmatmul.mubr.f32.gmra.mrb[24].mxu0 %v10299_v31  ;;  %v2800_v31 = vld [vmem:[#allocation6 + $0x428] sm:$0xff]  ;;  %8754 = vmatpush3.bf16.msra.mxu1 %v8751_v11 }
 0x240   : > { %7570 = vmatprep.mubr.f32.mxu0 %v10301_v42  ;;  %v3256_v42 = vld [vmem:[#allocation8 + $0xa0] sm:$0xff]  ;;  %v8723_v46 = vpack.c.bf16 %v2800_v31, %v2799_v10  ;;  %v2765_v10 = vld [vmem:[#allocation2 + $0x71] sm:$0xff]  ;;  %v2766_v11 = vld [vmem:[#allocation2 + $0x89] sm:$0xff] }
 0x241   : > { %v2767_v31 = vld [vmem:[#allocation2 + $0x91] sm:$0xff] }
 0x243   : > { %7571 = vmatmul.mubr.f32.gmra.mrb[26].mxu0 %v10305_v43  ;;  %v3257_v43 = vld [vmem:[#allocation8 + $0xa8] sm:$0xff] }
 0x244   : > { %7573 = vmatprep.mubr.f32.mxu0 %v10427_v50  ;;  %v2459_v50 = vld [vmem:[#allocation2 + $0x70] sm:$0xff]  ;;  %v8755_v40 = vpack.c.bf16 %v3257_v43, %v3256_v42 }
 0x245   : > { %v2768_v42 = vld [vmem:[#allocation2 + $0xa9] sm:$0xff]  ;;  %v2769_v43 = vld [vmem:[#allocation2 + $0xb1] sm:$0xff] }
 0x246   : > { %8756 = vmatprep.subr.bf16.mxu1 %v8755_v40 }
 0x247   : > { %7574 = vmatmul.mubr.f32.gmra.mrb[28].mxu0 %v10431_v44  ;;  %v2460_v44 = vld [vmem:[#allocation2 + $0x88] sm:$0xff]  ;;  %8758 = vmatpush3.bf16.msra.mxu1 %v8755_v40 }
 0x248   : > { %7576 = vmatprep.mubr.f32.mxu0 %v2180_v41  ;;  %8760 = vmatprep.subr.bf16.mxu1 %v8759_v15  ;;  %v2477_v41 = vld [vmem:[#allocation2 + $0x190] sm:$0xff] }
 0x249   : > { %v2774_v40 = vld [vmem:[#allocation2 + $0x109] sm:$0xff] }
 0x24b   : > { %7577 = vmatmul.mubr.f32.gmra.mrb[30].mxu0 %v2181_v53  ;;  %8762 = vmatpush3.bf16.msra.mxu1 %v8759_v15  ;;  %v2478_v53 = vld [vmem:[#allocation2 + $0x1a8] sm:$0xff] }
 0x24c   : > { %7611 = vmatprep.mubr.f32.mxu0 %v2456_v54  ;;  %8764 = vmatprep.subr.bf16.mxu1 %v8763_v24  ;;  %v2479_v54 = vld [vmem:[#allocation2 + $0x1b0] sm:$0xff] }
 0x24d   : > { %v2782_v15 = vld [vmem:[#allocation2 + $0x189] sm:$0xff] }
 0x24f   : > { %7612 = vmatmul.mubr.f32.vlgmr.msra.gmra.mrb[0].mxu0 %v2457_v2  ;;  %8766 = vmatpush3.bf16.msra.mxu1 %v8763_v24  ;;  %v9620_v2 = vld [vmem:[#allocation2 + $0x210] sm:$0xff] }
 0x250   : > { %8718 = vmatpush3.bf16.msra.mxu0 %v8715_v32  ;;  %7614 = vmatprep.mubr.f32.mxu0 %v2458_v6  ;;  %v2476_v32 = vld [vmem:[#allocation2 + $0x188] sm:$0xff]  ;;  %v2763_v6 = vld [vmem:[#allocation2 + $0x51] sm:$0xff] }
 0x251   : > { %8720 = vmatprep.subr.bf16.mxu0 %v8719_v9  ;;  %8768 = vmatprep.subr.bf16.mxu1 %v8767_v39  ;;  %v2792_v24 = vld [vmem:[#allocation2 + $0x229] sm:$0xff] }
 0x253   : > { %7615 = vmatmul.mubr.f32.gmra.mrb[2].mxu0 %v2459_v50  ;;  %8770 = vmatpush3.bf16.msra.mxu1 %v8767_v39  ;;  %v2770_v50 = vld [vmem:[#allocation2 + $0xc9] sm:$0xff] }
 0x254   : > { %7617 = vmatprep.mubr.f32.mxu0 %v2460_v44  ;;  %8722 = vmatpush3.bf16.msra.mxu0 %v8719_v9  ;;  %v2764_v9 = vld [vmem:[#allocation2 + $0x69] sm:$0xff]  ;;  %v2771_v44 = vld [vmem:[#allocation2 + $0xd1] sm:$0xff] }
 0x255   : > { %8724 = vmatprep.subr.bf16.mxu0 %v8723_v46 }
 0x257   : > { %7618 = vmatmul.mubr.f32.gmra.mrb[4].mxu0 %v2461_v30  ;;  %v2778_v30 = vld [vmem:[#allocation2 + $0x149] sm:$0xff] }
 0x258   : > { %7620 = vmatprep.mubr.f32.mxu0 %v2462_v13  ;;  %8726 = vmatpush3.bf16.msra.mxu0 %v8723_v46  ;;  %v2772_v46 = vld [vmem:[#allocation2 + $0xe9] sm:$0xff]  ;;  %v2779_v13 = vld [vmem:[#allocation2 + $0x151] sm:$0xff] }
 0x259   : > { %8728 = vmatprep.subr.bf16.mxu0 %v8727_v14 }
 0x25b   : > { %7621 = vmatmul.mubr.f32.gmra.mrb[6].mxu0 %v2463_v18  ;;  %v2786_v18 = vld [vmem:[#allocation2 + $0x1c9] sm:$0xff] }
 0x25c   : > { %7623 = vmatprep.mubr.f32.mxu0 %v2464_v21  ;;  %8730 = vmatpush3.bf16.msra.mxu0 %v8727_v14  ;;  %v2780_v14 = vld [vmem:[#allocation2 + $0x169] sm:$0xff]  ;;  %v2787_v21 = vld [vmem:[#allocation2 + $0x1d1] sm:$0xff] }
 0x25d   : > { %8732 = vmatprep.subr.bf16.mxu0 %v8731_v22 }
 0x25f   : > { %7624 = vmatmul.mubr.f32.gmra.mrb[8].mxu0 %v2465_v29  ;;  %v8771_v29 = vpack.c.bf16 %v3265_v28, %v3264_v27 }
 0x260   : > { %7626 = vmatprep.mubr.f32.mxu0 %v2466_v33  ;;  %8734 = vmatpush3.bf16.msra.mxu0 %v8731_v22  ;;  %v2788_v22 = vld [vmem:[#allocation2 + $0x1e9] sm:$0xff] }
 0x261   : > { %8736 = vmatprep.subr.bf16.mxu0 %v8735_v34  ;;  %8772 = vmatprep.subr.bf16.mxu1 %v8771_v29  ;;  %v3266_v33 = vld [vmem:[#allocation8 + $0xf0] sm:$0xff] }
 0x262   : > { %8774 = vmatpush3.bf16.msra.mxu1 %v8771_v29 }
 0x263   : > { %7627 = vmatmul.mubr.f32.gmra.mrb[10].mxu0 %v2467_v36  ;;  %v3206_v36 = vld [vmem:[#allocation8 + $0x18] sm:$0xff] }
 0x264   : > { %7629 = vmatprep.mubr.f32.mxu0 %v2468_v61  ;;  %8738 = vmatpush3.bf16.msra.mxu0 %v8735_v34  ;;  %v3267_v34 = vld [vmem:[#allocation8 + $0xf8] sm:$0xff] }
 0x265   : > { %8740 = vmatprep.subr.bf16.mxu0 %v8739_v62  ;;  %v8775_v39 = vpack.c.bf16 %v3267_v34, %v3266_v33 }
 0x267   : > { %7630 = vmatmul.mubr.f32.gmra.mrb[12].mxu0 %v2469_v4  ;;  %8776 = vmatprep.subr.bf16.mxu1 %v8775_v39  ;;  %v3209_v4 = vld [vmem:[#allocation8 + $0x30] sm:$0xff] }
 0x268   : > { %7632 = vmatprep.mubr.f32.mxu0 %v2470_v49  ;;  %8742 = vmatpush3.bf16.msra.mxu0 %v8739_v62  ;;  %v3207_v62 = vld [vmem:[#allocation8 + $0x20] sm:$0xff]  ;;  %v3210_v49 = vld [vmem:[#allocation8 + $0x38] sm:$0xff] }
 0x269   : > { %8744 = vmatprep.subr.bf16.mxu0 %v8743_v7  ;;  %8778 = vmatpush3.bf16.msra.mxu1 %v8775_v39  ;;  %v8787_v3 = vpack.c.bf16 %v3208_v37, %v3207_v62 }
 0x26b   : > { %7633 = vmatmul.mubr.f32.gmra.mrb[14].mxu0 %v2471_v8  ;;  %v3211_v8 = vld [vmem:[#allocation8 + $0x40] sm:$0xff] }
 0x26c   : > { %7635 = vmatprep.mubr.f32.mxu0 %v2472_v48  ;;  %8746 = vmatpush3.bf16.msra.mxu0 %v8743_v7  ;;  %v8791_v7 = vpack.c.bf16 %v3210_v49, %v3209_v4  ;;  %v3212_v48 = vld [vmem:[#allocation8 + $0x48] sm:$0xff] }
 0x26d   : > { %7772 = vmatmul.mubr.f32.vlgmr.msra.gmra.mrb[0].mxu1 %v10532_v5 }
 0x26f   : > { %7636 = vmatmul.mubr.f32.gmra.mrb[16].mxu0 %v2473_v19  ;;  %v8795_v19 = vpack.c.bf16 %v3212_v48, %v3211_v8 }
 0x270   : > { %7638 = vmatprep.mubr.f32.mxu0 %v2474_v20  ;;  %v3213_v20 = vld [vmem:[#allocation8 + $0x50] sm:$0xff] }
 0x273   : > { %7639 = vmatmul.mubr.f32.gmra.mrb[18].mxu0 %v2475_v52  ;;  %v3214_v52 = vld [vmem:[#allocation8 + $0x58] sm:$0xff] }
 0x274   : > { %7641 = vmatprep.mubr.f32.mxu0 %v2476_v32  ;;  %v8799_v32 = vpack.c.bf16 %v3214_v52, %v3213_v20 }
 0x277   : > { %7642 = vmatmul.mubr.f32.gmra.mrb[20].mxu0 %v2477_v41  ;;  %v3215_v41 = vld [vmem:[#allocation8 + $0x60] sm:$0xff] }
 0x278   : > { %7644 = vmatprep.mubr.f32.mxu0 %v2478_v53  ;;  %v3216_v53 = vld [vmem:[#allocation8 + $0x68] sm:$0xff] }
 0x27b   : > { %7645 = vmatmul.mubr.f32.gmra.mrb[22].mxu0 %v2479_v54  ;;  %v8803_v54 = vpack.c.bf16 %v3216_v53, %v3215_v41 }
 0x27c   : > { %7647 = vmatprep.mubr.f32.mxu0 %v2480_v58  ;;  %v3217_v58 = vld [vmem:[#allocation8 + $0x70] sm:$0xff] }
 0x27f   : > { %7648 = vmatmul.mubr.f32.gmra.mrb[24].mxu0 %v2481_v59  ;;  %v3218_v59 = vld [vmem:[#allocation8 + $0x78] sm:$0xff] }
 0x280   : > { %7650 = vmatprep.mubr.f32.mxu0 %v2482_v60  ;;  %v8807_v60 = vpack.c.bf16 %v3218_v59, %v3217_v58 }
 0x283   : > { %7651 = vmatmul.mubr.f32.gmra.mrb[26].mxu0 %v2483_v63  ;;  %v3751_v63 = vld [vmem:[#allocation8 + $0x100] sm:$0xff] }
 0x284   : > { %7653 = vmatprep.mubr.f32.mxu0 %v9619_v1  ;;  %v3752_v1 = vld [vmem:[#allocation8 + $0x108] sm:$0xff] }
 0x287   : > { %7654 = vmatmul.mubr.f32.gmra.mrb[28].mxu0 %v9620_v2  ;;  %v10539_v2 = vpack.c.bf16 %v3752_v1, %v3751_v63 }
 0x288   : > { %7656 = vmatprep.mubr.f32.mxu0 %v10532_v5 }
 0x28b   : > { %7657 = vmatmul.mubr.f32.gmra.mrb[30].mxu0 %v10532_v5  ;;  %v10545_v5 = vld [vmem:[%s11167_s2] ss:$0 sm:$0xff] }
 0x28c   : > { %7691 = vmatprep.mubr.f32.mxu0 %v2762_v0 }
 0x28f   : > { %7692 = vmatmul.mubr.f32.vlgmr.msra.gmra.mrb[0].mxu0 %v2763_v6 }
 0x290   : > { %7694 = vmatprep.mubr.f32.mxu0 %v2764_v9 }
 0x293   : > { %7695 = vmatmul.mubr.f32.gmra.mrb[2].mxu0 %v2765_v10 }
 0x294   : > { %7697 = vmatprep.mubr.f32.mxu0 %v2766_v11 }
 0x297   : > { %7698 = vmatmul.mubr.f32.gmra.mrb[4].mxu0 %v2767_v31 }
 0x298   : > { %7700 = vmatprep.mubr.f32.mxu0 %v2768_v42 }
 0x29b   : > { %7701 = vmatmul.mubr.f32.gmra.mrb[6].mxu0 %v2769_v43 }
 0x29c   : > { %7703 = vmatprep.mubr.f32.mxu0 %v2770_v50 }
 0x29f   : > { %7704 = vmatmul.mubr.f32.gmra.mrb[8].mxu0 %v2771_v44 }
 0x2a0   : > { %7706 = vmatprep.mubr.f32.mxu0 %v2772_v46 }
 0x2a3   : > { %7707 = vmatmul.mubr.f32.gmra.mrb[10].mxu0 %v2773_v12 }
 0x2a4   : > { %7709 = vmatprep.mubr.f32.mxu0 %v2774_v40 }
 0x2a7   : > { %7710 = vmatmul.mubr.f32.gmra.mrb[12].mxu0 %v2775_v55 }
 0x2a8   : > { %7712 = vmatprep.mubr.f32.mxu0 %v2776_v51 }
 0x2ab   : > { %7713 = vmatmul.mubr.f32.gmra.mrb[14].mxu0 %v2777_v45 }
 0x2ac   : > { %7715 = vmatprep.mubr.f32.mxu0 %v2778_v30 }
 0x2af   : > { %7716 = vmatmul.mubr.f32.gmra.mrb[16].mxu0 %v2779_v13 }
 0x2b0   : > { %7718 = vmatprep.mubr.f32.mxu0 %v2780_v14 }
 0x2b3   : > { %7719 = vmatmul.mubr.f32.gmra.mrb[18].mxu0 %v2781_v56 }
 0x2b4   : > { %7721 = vmatprep.mubr.f32.mxu0 %v2782_v15 }
 0x2b7   : > { %7722 = vmatmul.mubr.f32.gmra.mrb[20].mxu0 %v2783_v16 }
 0x2b8   : > { %7724 = vmatprep.mubr.f32.mxu0 %v2784_v47 }
 0x2bb   : > { %7725 = vmatmul.mubr.f32.gmra.mrb[22].mxu0 %v2785_v17 }
 0x2bc   : > { %7727 = vmatprep.mubr.f32.mxu0 %v2786_v18 }
 0x2bf   : > { %7728 = vmatmul.mubr.f32.gmra.mrb[24].mxu0 %v2787_v21 }
 0x2c0   : > { %7730 = vmatprep.mubr.f32.mxu0 %v2788_v22 }
 0x2c3   : > { %7731 = vmatmul.mubr.f32.gmra.mrb[26].mxu0 %v2789_v38 }
 0x2c4   : > { %7733 = vmatprep.mubr.f32.mxu0 %v10495_v23  ;;  %v3204_v23 = vld [vmem:[#allocation8 + $0x8] sm:$0xff] }
 0x2c5   : > { %v8779_v57 = vpack.c.bf16 %v3204_v23, %v3203_v35 }
 0x2c7   : > { %7734 = vmatmul.mubr.f32.gmra.mrb[28].mxu0 %v10499_v25  ;;  %8780 = vmatprep.subr.bf16.mxu1 %v8779_v57  ;;  %v3205_v25 = vld [vmem:[#allocation8 + $0x10] sm:$0xff] }
 0x2c8   : > { %7736 = vmatprep.mubr.f32.mxu0 %v2792_v24  ;;  %8782 = vmatpush3.bf16.msra.mxu1 %v8779_v57  ;;  %v8783_v61 = vpack.c.bf16 %v3206_v36, %v3205_v25 }
 0x2ca   : > { %8784 = vmatprep.subr.bf16.mxu1 %v8783_v61 }
 0x2cb   : > { %7737 = vmatmul.mubr.f32.gmra.mrb[30].mxu0 %v2793_v26 }
 0x2cc   : > { %8786 = vmatpush3.bf16.msra.mxu1 %v8783_v61 }
 0x2cd   : > { %8788 = vmatprep.subr.bf16.mxu1 %v8787_v3 }
 0x2d0   : > { %8790 = vmatpush3.bf16.msra.mxu1 %v8787_v3 }
 0x2d1   : > { %8792 = vmatprep.subr.bf16.mxu1 %v8791_v7 }
 0x2d4   : > { %8794 = vmatpush3.bf16.msra.mxu1 %v8791_v7 }
 0x2d5   : > { %8796 = vmatprep.subr.bf16.mxu1 %v8795_v19 }
 0x2d8   : > { %8798 = vmatpush3.bf16.msra.mxu1 %v8795_v19 }
 0x2d9   : > { %8800 = vmatprep.subr.bf16.mxu1 %v8799_v32 }
 0x2dc   : > { %8802 = vmatpush3.bf16.msra.mxu1 %v8799_v32 }
 0x2dd   : > { %8804 = vmatprep.subr.bf16.mxu1 %v8803_v54 }
 0x2e0   : > { %8806 = vmatpush3.bf16.msra.mxu1 %v8803_v54 }
 0x2e1   : > { %8808 = vmatprep.subr.bf16.mxu1 %v8807_v60 }
 0x2e4   : > { %8810 = vmatpush3.bf16.msra.mxu1 %v8807_v60 }
 0x2e5   : > { %8812 = vmatprep.subr.bf16.mxu1 %v10539_v2 }
 0x362   : > { %v7693_v0 = vpop.f32.mrb[0].mxu0 }
 0x363   : > { %v3076_v6 = vadd.f32 %v7693_v0, %v10545_v5  ;;  %v2877_v9 = vpop.f32.mrb[1].mxu0 }
 0x364   : > { %v3075_v10 = vadd.f32 %v10545_v5, %v2877_v9 }
 0x365   : > { %v3108_v11 = vmax.f32 %v3076_v6, 0.0 }
 0x366   : > { %v3107_v31 = vmax.f32 %v3075_v10, 0.0  ;;  %v7696_v42 = vpop.f32.mrb[2].mxu0 }
 0x367   : > { %3140 = vst [vmem:[#allocation2 + $0x30] sm:$0xff] %v3108_v11  ;;  %v3078_v43 = vadd.f32 %v7696_v42, %v10545_v5  ;;  %v2887_v50 = vpop.f32.mrb[3].mxu0 }
 0x368   : > { %3139 = vst [vmem:[#allocation2 + $0x28] sm:$0xff] %v3107_v31  ;;  %v3077_v44 = vadd.f32 %v10545_v5, %v2887_v50  ;;  %7774 = vmatprep.mubr.f32.mxu1 %v3107_v31 }
 0x369   : > { %v3110_v46 = vmax.f32 %v3078_v43, 0.0  ;;  %7775 = vmatmul.mubr.f32.gmra.mrb[2].mxu1 %v3108_v11 }
 0x36a   : > { %v3109_v12 = vmax.f32 %v3077_v44, 0.0  ;;  %v7699_v40 = vpop.f32.mrb[4].mxu0 }
 0x36b   : > { %3142 = vst [vmem:[#allocation2 + $0x50] sm:$0xff] %v3110_v46  ;;  %v3080_v55 = vadd.f32 %v7699_v40, %v10545_v5  ;;  %v2897_v51 = vpop.f32.mrb[5].mxu0 }
 0x36c   : > { %3141 = vst [vmem:[#allocation2 + $0x48] sm:$0xff] %v3109_v12  ;;  %v3079_v45 = vadd.f32 %v10545_v5, %v2897_v51  ;;  %7777 = vmatprep.mubr.f32.mxu1 %v3109_v12 }
 0x36d   : > { %v3112_v30 = vmax.f32 %v3080_v55, 0.0  ;;  %7778 = vmatmul.mubr.f32.gmra.mrb[4].mxu1 %v3110_v46 }
 0x36e   : > { %v3111_v13 = vmax.f32 %v3079_v45, 0.0  ;;  %v7702_v14 = vpop.f32.mrb[6].mxu0 }
 0x36f   : > { %3144 = vst [vmem:[#allocation2 + $0x70] sm:$0xff] %v3112_v30  ;;  %v3082_v56 = vadd.f32 %v7702_v14, %v10545_v5  ;;  %v2907_v15 = vpop.f32.mrb[7].mxu0 }
 0x370   : > { %3143 = vst [vmem:[#allocation2 + $0x68] sm:$0xff] %v3111_v13  ;;  %v3081_v16 = vadd.f32 %v10545_v5, %v2907_v15  ;;  %7780 = vmatprep.mubr.f32.mxu1 %v3111_v13 }
 0x371   : > { %v3114_v47 = vmax.f32 %v3082_v56, 0.0  ;;  %7781 = vmatmul.mubr.f32.gmra.mrb[6].mxu1 %v3112_v30 }
 0x372   : > { %v3113_v17 = vmax.f32 %v3081_v16, 0.0  ;;  %v7705_v18 = vpop.f32.mrb[8].mxu0 }
 0x373   : > { %3146 = vst [vmem:[#allocation2 + $0x90] sm:$0xff] %v3114_v47  ;;  %v3084_v21 = vadd.f32 %v7705_v18, %v10545_v5  ;;  %v2917_v22 = vpop.f32.mrb[9].mxu0 }
 0x374   : > { %3145 = vst [vmem:[#allocation2 + $0x88] sm:$0xff] %v3113_v17  ;;  %v3083_v38 = vadd.f32 %v10545_v5, %v2917_v22  ;;  %7783 = vmatprep.mubr.f32.mxu1 %v3113_v17 }
 0x375   : > { %v3116_v24 = vmax.f32 %v3084_v21, 0.0  ;;  %7784 = vmatmul.mubr.f32.gmra.mrb[8].mxu1 %v3114_v47 }
 0x376   : > { %v3115_v26 = vmax.f32 %v3083_v38, 0.0  ;;  %v7708_v27 = vpop.f32.mrb[10].mxu0 }
 0x377   : > { %3148 = vst [vmem:[#allocation2 + $0xb0] sm:$0xff] %v3116_v24  ;;  %v3086_v28 = vadd.f32 %v7708_v27, %v10545_v5  ;;  %v2927_v29 = vpop.f32.mrb[11].mxu0 }
 0x378   : > { %3147 = vst [vmem:[#allocation2 + $0xa8] sm:$0xff] %v3115_v26  ;;  %v3085_v33 = vadd.f32 %v10545_v5, %v2927_v29  ;;  %7786 = vmatprep.mubr.f32.mxu1 %v3115_v26 }
 0x379   : > { %v3118_v34 = vmax.f32 %v3086_v28, 0.0  ;;  %7787 = vmatmul.mubr.f32.gmra.mrb[10].mxu1 %v3116_v24  ;;  %v3171_v28 = vld [vmem:[#allocation2 + $0x7] sm:$0xff] }
 0x37a   : > { %v10559_v39 = vmax.f32 %v3085_v33, 0.0  ;;  %v7711_v35 = vpop.f32.mrb[12].mxu0  ;;  %v3753_v33 = vld [vmem:[#allocation8 + $0x110] sm:$0xff] }
 0x37b   : > { %3150 = vst [vmem:[#allocation2 + $0xd0] sm:$0xff] %v3118_v34  ;;  %v3088_v23 = vadd.f32 %v7711_v35, %v10545_v5  ;;  %v2937_v57 = vpop.f32.mrb[13].mxu0 }
 0x37c   : > { %3149 = vst [vmem:[#allocation2 + $0xc8] sm:$0xff] %v10559_v39  ;;  %v3087_v25 = vadd.f32 %v10545_v5, %v2937_v57  ;;  %7789 = vmatprep.mubr.f32.mxu1 %v10559_v39  ;;  %v3172_v57 = vld [vmem:[#allocation2 + $0xf] sm:$0xff] }
 0x37d   : > { %v10565_v36 = vmax.f32 %v3088_v23, 0.0  ;;  %7790 = vmatmul.mubr.f32.gmra.mrb[12].mxu1 %v3118_v34  ;;  %v3754_v34 = vld [vmem:[#allocation8 + $0x118] sm:$0xff] }
 0x37e   : > { %v10567_v61 = vmax.f32 %v3087_v25, 0.0  ;;  %v7714_v62 = vpop.f32.mrb[14].mxu0  ;;  %v8815_v25 = vpack.c.bf16 %v3754_v34, %v3753_v33 }
 0x37f   : > { %3152 = vst [vmem:[#allocation2 + $0xf0] sm:$0xff] %v10565_v36  ;;  %v3090_v37 = vadd.f32 %v7714_v62, %v10545_v5  ;;  %v2947_v3 = vpop.f32.mrb[15].mxu0  ;;  %v3756_v62 = vld [vmem:[#allocation8 + $0x128] sm:$0xff] }
 0x380   : > { %3151 = vst [vmem:[#allocation2 + $0xe8] sm:$0xff] %v10567_v61  ;;  %v3089_v4 = vadd.f32 %v10545_v5, %v2947_v3  ;;  %7792 = vmatprep.mubr.f32.mxu1 %v10567_v61 }
 0x381   : > { %v10574_v49 = vmax.f32 %v3090_v37, 0.0  ;;  %7793 = vmatmul.mubr.f32.gmra.mrb[14].mxu1 %v10565_v36  ;;  %v10665_v37 = vld [vmem:[#allocation2 + $0x27] sm:$0xff] }
 0x382   : > { %v10577_v7 = vmax.f32 %v3089_v4, 0.0  ;;  %v7717_v8 = vpop.f32.mrb[16].mxu0  ;;  %v10669_v4 = vld [vmem:[#allocation2 + $0x2f] sm:$0xff] }
 0x383   : > { %3154 = vst [vmem:[#allocation2 + $0x110] sm:$0xff] %v10574_v49  ;;  %v3092_v48 = vadd.f32 %v7717_v8, %v10545_v5  ;;  %v2957_v19 = vpop.f32.mrb[17].mxu0  ;;  %v3757_v8 = vld [vmem:[#allocation8 + $0x130] sm:$0xff] }
 0x384   : > { %3153 = vst [vmem:[#allocation2 + $0x108] sm:$0xff] %v10577_v7  ;;  %v3091_v20 = vadd.f32 %v10545_v5, %v2957_v19  ;;  %7795 = vmatprep.mubr.f32.mxu1 %v10577_v7  ;;  %v10672_v19 = vld [vmem:[#allocation2 + $0x47] sm:$0xff] }
 0x385   : > { %v10584_v52 = vmax.f32 %v3092_v48, 0.0  ;;  %7796 = vmatmul.mubr.f32.gmra.mrb[16].mxu1 %v10574_v49  ;;  %v3758_v48 = vld [vmem:[#allocation8 + $0x138] sm:$0xff] }
 0x386   : > { %v10587_v32 = vmax.f32 %v3091_v20, 0.0  ;;  %v7720_v41 = vpop.f32.mrb[18].mxu0  ;;  %v8823_v20 = vpack.c.bf16 %v3758_v48, %v3757_v8 }
 0x387   : > { %3156 = vst [vmem:[#allocation2 + $0x130] sm:$0xff] %v10584_v52  ;;  %v3094_v53 = vadd.f32 %v7720_v41, %v10545_v5  ;;  %v2967_v54 = vpop.f32.mrb[19].mxu0  ;;  %v10675_v41 = vld [vmem:[#allocation2 + $0x4f] sm:$0xff] }
 0x388   : > { %3155 = vst [vmem:[#allocation2 + $0x128] sm:$0xff] %v10587_v32  ;;  %v3093_v58 = vadd.f32 %v10545_v5, %v2967_v54  ;;  %7798 = vmatprep.mubr.f32.mxu1 %v10587_v32  ;;  %v3760_v54 = vld [vmem:[#allocation8 + $0x148] sm:$0xff] }
 0x389   : > { %v10594_v59 = vmax.f32 %v3094_v53, 0.0  ;;  %7799 = vmatmul.mubr.f32.gmra.mrb[18].mxu1 %v10584_v52  ;;  %v3759_v53 = vld [vmem:[#allocation8 + $0x140] sm:$0xff] }
 0x38a   : > { %v10597_v60 = vmax.f32 %v3093_v58, 0.0  ;;  %v7723_v63 = vpop.f32.mrb[20].mxu0  ;;  %v8827_v58 = vpack.c.bf16 %v3760_v54, %v3759_v53 }
 0x38b   : > { %3158 = vst [vmem:[#allocation2 + $0x150] sm:$0xff] %v10594_v59  ;;  %v3096_v1 = vadd.f32 %v7723_v63, %v10545_v5  ;;  %v2977_v0 = vpop.f32.mrb[21].mxu0  ;;  %v10681_v63 = vld [vmem:[#allocation2 + $0x6f] sm:$0xff] }
 0x38c   : > { %3157 = vst [vmem:[#allocation2 + $0x148] sm:$0xff] %v10597_v60  ;;  %v3095_v6 = vadd.f32 %v10545_v5, %v2977_v0  ;;  %7801 = vmatprep.mubr.f32.mxu1 %v10597_v60  ;;  %v3762_v0 = vld [vmem:[#allocation8 + $0x158] sm:$0xff] }
 0x38d   : > { %v10604_v9 = vmax.f32 %v3096_v1, 0.0  ;;  %7802 = vmatmul.mubr.f32.gmra.mrb[20].mxu1 %v10594_v59  ;;  %v3761_v1 = vld [vmem:[#allocation8 + $0x150] sm:$0xff] }
 0x38e   : > { %v10607_v10 = vmax.f32 %v3095_v6, 0.0  ;;  %v7726_v11 = vpop.f32.mrb[22].mxu0  ;;  %v10684_v6 = vld [vmem:[#allocation2 + $0x87] sm:$0xff] }
 0x38f   : > { %3160 = vst [vmem:[#allocation2 + $0x170] sm:$0xff] %v10604_v9  ;;  %v3098_v31 = vadd.f32 %v7726_v11, %v10545_v5  ;;  %v2987_v42 = vpop.f32.mrb[23].mxu0  ;;  %v8831_v11 = vpack.c.bf16 %v3762_v0, %v3761_v1  ;;  %v10714_v33 = vld [vmem:[#allocation2 + $0x127] sm:$0xff]  ;;  %v10717_v34 = vld [vmem:[#allocation2 + $0x12f] sm:$0xff] }
 0x390   : > { %3159 = vst [vmem:[#allocation2 + $0x168] sm:$0xff] %v10607_v10  ;;  %v3097_v43 = vadd.f32 %v10545_v5, %v2987_v42  ;;  %7804 = vmatprep.mubr.f32.mxu1 %v10607_v10  ;;  %v3763_v42 = vld [vmem:[#allocation8 + $0x160] sm:$0xff]  ;;  %v3718_v1 = vld [vmem:[#allocation2 + $0x9] sm:$0xff] }
 0x391   : > { %v10614_v50 = vmax.f32 %v3098_v31, 0.0  ;;  %7805 = vmatmul.mubr.f32.gmra.mrb[22].mxu1 %v10604_v9  ;;  %v10687_v31 = vld [vmem:[#allocation2 + $0x8f] sm:$0xff] }
 0x392   : > { %v10617_v44 = vmax.f32 %v3097_v43, 0.0  ;;  %v7729_v46 = vpop.f32.mrb[24].mxu0  ;;  %v3764_v43 = vld [vmem:[#allocation8 + $0x168] sm:$0xff] }
 0x393   : > { %3162 = vst [vmem:[#allocation2 + $0x190] sm:$0xff] %v10614_v50  ;;  %v3100_v12 = vadd.f32 %v7729_v46, %v10545_v5  ;;  %v2997_v40 = vpop.f32.mrb[25].mxu0  ;;  %v10690_v46 = vld [vmem:[#allocation2 + $0xa7] sm:$0xff] }
 0x394   : > { %3161 = vst [vmem:[#allocation2 + $0x188] sm:$0xff] %v10617_v44  ;;  %v3099_v55 = vadd.f32 %v10545_v5, %v2997_v40  ;;  %7807 = vmatprep.mubr.f32.mxu1 %v10617_v44  ;;  %v10693_v40 = vld [vmem:[#allocation2 + $0xaf] sm:$0xff] }
 0x395   : > { %v10624_v51 = vmax.f32 %v3100_v12, 0.0  ;;  %7808 = vmatmul.mubr.f32.gmra.mrb[24].mxu1 %v10614_v50  ;;  %v8835_v12 = vpack.c.bf16 %v3764_v43, %v3763_v42  ;;  %v4060_v42 = vld [vmem:[#allocation8 + $0x198] sm:$0xff] }
 0x396   : > { %v10627_v45 = vmax.f32 %v3099_v55, 0.0  ;;  %v7732_v30 = vpop.f32.mrb[26].mxu0  ;;  %v3765_v55 = vld [vmem:[#allocation8 + $0x170] sm:$0xff] }
 0x397   : > { %3164 = vst [vmem:[#allocation2 + $0x1b0] sm:$0xff] %v10624_v51  ;;  %v3102_v13 = vadd.f32 %v7732_v30, %v10545_v5  ;;  %v3007_v14 = vpop.f32.mrb[27].mxu0  ;;  %v3766_v30 = vld [vmem:[#allocation8 + $0x178] sm:$0xff] }
 0x398   : > { %3163 = vst [vmem:[#allocation2 + $0x1a8] sm:$0xff] %v10627_v45  ;;  %v3101_v56 = vadd.f32 %v10545_v5, %v3007_v14  ;;  %7810 = vmatprep.mubr.f32.mxu1 %v10627_v45  ;;  %v8839_v14 = vpack.c.bf16 %v3766_v30, %v3765_v55  ;;  %v3719_v43 = vld [vmem:[#allocation2 + $0x11] sm:$0xff]  ;;  %v4061_v55 = vld [vmem:[#allocation8 + $0x1a0] sm:$0xff]  ;;  %v4062_v30 = vld [vmem:[#allocation8 + $0x1a8] sm:$0xff] }
 0x399   : > { %v10634_v15 = vmax.f32 %v3102_v13, 0.0  ;;  %7811 = vmatmul.mubr.f32.gmra.mrb[26].mxu1 %v10624_v51  ;;  %v10696_v13 = vld [vmem:[#allocation2 + $0xc7] sm:$0xff] }
 0x39a   : > { %v10637_v16 = vmax.f32 %v3101_v56, 0.0  ;;  %v7735_v47 = vpop.f32.mrb[28].mxu0  ;;  %v10699_v56 = vld [vmem:[#allocation2 + $0xcf] sm:$0xff] }
 0x39b   : > { %3166 = vst [vmem:[#allocation2 + $0x1d0] sm:$0xff] %v10634_v15  ;;  %v3104_v17 = vadd.f32 %v7735_v47, %v10545_v5  ;;  %v3017_v18 = vpop.f32.mrb[29].mxu0  ;;  %v4057_v47 = vld [vmem:[#allocation8 + $0x180] sm:$0xff]  ;;  %v10735_v8 = vld [vmem:[#allocation2 + $0x18f] sm:$0xff] }
 0x39c   : > { %3165 = vst [vmem:[#allocation2 + $0x1c8] sm:$0xff] %v10637_v16  ;;  %v3103_v21 = vadd.f32 %v10545_v5, %v3017_v18  ;;  %7813 = vmatprep.mubr.f32.mxu1 %v10637_v16  ;;  %v10702_v18 = vld [vmem:[#allocation2 + $0xe7] sm:$0xff] }
 0x39d   : > { %v10644_v22 = vmax.f32 %v3104_v17, 0.0  ;;  %7814 = vmatmul.mubr.f32.gmra.mrb[28].mxu1 %v10634_v15  ;;  %v4058_v17 = vld [vmem:[#allocation8 + $0x188] sm:$0xff] }
 0x39e   : > { %v10647_v38 = vmax.f32 %v3103_v21, 0.0  ;;  %v7738_v24 = vpop.f32.mrb[30].mxu0  ;;  %v8843_v21 = vpack.c.bf16 %v4058_v17, %v4057_v47  ;;  %v8851_v47 = vpack.c.bf16 %v4062_v30, %v4061_v55  ;;  %v10759_v17 = vld [vmem:[#allocation2 + $0x31] sm:$0xff] }
 0x39f   : > { %3168 = vst [vmem:[#allocation2 + $0x1f0] sm:$0xff] %v10644_v22  ;;  %v10651_v26 = vadd.f32 %v7738_v24, %v10545_v5  ;;  %v3027_v27 = vpop.f32.mrb[31].mxu0  ;;  %v10705_v24 = vld [vmem:[#allocation2 + $0xef] sm:$0xff]  ;;  %v10738_v48 = vld [vmem:[#allocation2 + $0x1a7] sm:$0xff]  ;;  %11339 = vst [vmem:[#allocation16_spill] sm:$0xff] %v10759_v17 }
 0x3a0   : > { %3167 = vst [vmem:[#allocation2 + $0x1e8] sm:$0xff] %v10647_v38  ;;  %v10655_v29 = vadd.f32 %v10545_v5, %v3027_v27  ;;  %7816 = vmatprep.mubr.f32.mxu1 %v10647_v38  ;;  %v3755_v5 = vld [vmem:[#allocation8 + $0x120] sm:$0xff]  ;;  %v10771_v30 = vld [vmem:[#allocation2 + $0x71] sm:$0xff] }
 0x3a1   : > { %11336 = vst [vmem:[#allocation13_spill] sm:$0xff] %v10651_v26  ;;  %v11212_v35 = vmax.f32 %v10651_v26, 0.0  ;;  %7817 = vmatmul.mubr.f32.gmra.mrb[30].mxu1 %v10644_v22  ;;  %v8819_v3 = vpack.c.bf16 %v3756_v62, %v3755_v5  ;;  %v10708_v27 = vld [vmem:[#allocation2 + $0x107] sm:$0xff]  ;;  %v10729_v62 = vld [vmem:[#allocation2 + $0x16f] sm:$0xff]  ;;  %11343 = vst [vmem:[#allocation20_spill] sm:$0xff] %v10771_v30 }
 0x3a2   : > { %v11213_v23 = vmax.f32 %v10655_v29, 0.0  ;;  %7851 = vmatprep.mubr.f32.mxu1 %v3171_v28  ;;  %v10711_v28 = vld [vmem:[#allocation2 + $0x10f] sm:$0xff]  ;;  %v10726_v5 = vld [vmem:[#allocation2 + $0x167] sm:$0xff] }
 0x3a3   : > { %3170 = vst [vmem:[#allocation2 + $0x210] sm:$0xff] %v11212_v35  ;;  %v10744_v53 = vld [vmem:[#allocation2 + $0x1c7] sm:$0xff]  ;;  %v10747_v54 = vld [vmem:[#allocation2 + $0x1cf] sm:$0xff] }
 0x3a4   : > { %3169 = vst [vmem:[#allocation2 + $0x208] sm:$0xff] %v11213_v23  ;;  %v4063_v35 = vld [vmem:[#allocation8 + $0x1b0] sm:$0xff]  ;;  %v4064_v23 = vld [vmem:[#allocation8 + $0x1b8] sm:$0xff] }
 0x3a5   : > { %7852 = vmatmul.mubr.f32.vlgmr.msra.gmra.mrb[0].mxu1 %v3172_v57  ;;  %v10720_v57 = vld [vmem:[#allocation2 + $0x147] sm:$0xff] }
 0x3a6   : > { %7854 = vmatprep.mubr.f32.mxu1 %v10665_v37  ;;  %8814 = vmatpush3.bf16.msra.mxu1 %v10539_v2  ;;  %v10678_v2 = vld [vmem:[#allocation2 + $0x67] sm:$0xff] }
 0x3a7   : > { %8816 = vmatprep.subr.bf16.mxu1 %v8815_v25  ;;  %v10753_v0 = vld [vmem:[#allocation2 + $0x1ef] sm:$0xff] }
 0x3a8   : > { %11338 = vst [vmem:[#allocation15_spill] sm:$0xff] %v10753_v0  ;;  %v10762_v26 = vld [vmem:[#allocation2 + $0x49] sm:$0xff] }
 0x3a9   : > { %7855 = vmatmul.mubr.f32.gmra.mrb[2].mxu1 %v10669_v4  ;;  %11340 = vst [vmem:[#allocation17_spill] sm:$0xff] %v10762_v26 }
 0x3aa   : > { %7857 = vmatprep.mubr.f32.mxu1 %v10672_v19  ;;  %8818 = vmatpush3.bf16.msra.mxu1 %v8815_v25  ;;  %v10723_v25 = vld [vmem:[#allocation2 + $0x14f] sm:$0xff] }
 0x3ab   : > { %8820 = vmatprep.subr.bf16.mxu1 %v8819_v3 }
 0x3ad   : > { %7858 = vmatmul.mubr.f32.gmra.mrb[4].mxu1 %v10675_v41 }
 0x3ae   : > { %7860 = vmatprep.mubr.f32.mxu1 %v10678_v2  ;;  %8822 = vmatpush3.bf16.msra.mxu1 %v8819_v3  ;;  %v10732_v3 = vld [vmem:[#allocation2 + $0x187] sm:$0xff] }
 0x3af   : > { %8824 = vmatprep.subr.bf16.mxu1 %v8823_v20 }
 0x3b1   : > { %7861 = vmatmul.mubr.f32.gmra.mrb[6].mxu1 %v10681_v63 }
 0x3b2   : > { %7863 = vmatprep.mubr.f32.mxu1 %v10684_v6  ;;  %8826 = vmatpush3.bf16.msra.mxu1 %v8823_v20  ;;  %v10741_v20 = vld [vmem:[#allocation2 + $0x1af] sm:$0xff] }
 0x3b3   : > { %8828 = vmatprep.subr.bf16.mxu1 %v8827_v58 }
 0x3b5   : > { %7864 = vmatmul.mubr.f32.gmra.mrb[8].mxu1 %v10687_v31 }
 0x3b6   : > { %7866 = vmatprep.mubr.f32.mxu1 %v10690_v46  ;;  %8830 = vmatpush3.bf16.msra.mxu1 %v8827_v58  ;;  %v10750_v58 = vld [vmem:[#allocation2 + $0x1e7] sm:$0xff] }
 0x3b7   : > { %8832 = vmatprep.subr.bf16.mxu1 %v8831_v11  ;;  %11337 = vst [vmem:[#allocation14_spill] sm:$0xff] %v10750_v58 }
 0x3b9   : > { %7867 = vmatmul.mubr.f32.gmra.mrb[10].mxu1 %v10693_v40 }
 0x3ba   : > { %7869 = vmatprep.mubr.f32.mxu1 %v10696_v13  ;;  %8834 = vmatpush3.bf16.msra.mxu1 %v8831_v11  ;;  %v4059_v11 = vld [vmem:[#allocation8 + $0x190] sm:$0xff] }
 0x3bb   : > { %8836 = vmatprep.subr.bf16.mxu1 %v8835_v12 }
 0x3bd   : > { %7870 = vmatmul.mubr.f32.gmra.mrb[12].mxu1 %v10699_v56 }
 0x3be   : > { %7872 = vmatprep.mubr.f32.mxu1 %v10702_v18  ;;  %8838 = vmatpush3.bf16.msra.mxu1 %v8835_v12  ;;  %v8847_v12 = vpack.c.bf16 %v4060_v42, %v4059_v11  ;;  %v10765_v11 = vld [vmem:[#allocation2 + $0x51] sm:$0xff]  ;;  %v4065_v42 = vld [vmem:[#allocation8 + $0x1c0] sm:$0xff] }
 0x3bf   : > { %8840 = vmatprep.subr.bf16.mxu1 %v8839_v14  ;;  %11341 = vst [vmem:[#allocation18_spill] sm:$0xff] %v10765_v11 }
 0x3c1   : > { %7873 = vmatmul.mubr.f32.gmra.mrb[14].mxu1 %v10705_v24 }
 0x3c2   : > { %7875 = vmatprep.mubr.f32.mxu1 %v10708_v27  ;;  %8842 = vmatpush3.bf16.msra.mxu1 %v8839_v14  ;;  %v10756_v14 = vld [vmem:[#allocation2 + $0x29] sm:$0xff] }
 0x3c3   : > { %8844 = vmatprep.subr.bf16.mxu1 %v8843_v21 }
 0x3c5   : > { %7876 = vmatmul.mubr.f32.gmra.mrb[16].mxu1 %v10711_v28 }
 0x3c6   : > { %7878 = vmatprep.mubr.f32.mxu1 %v10714_v33 }
 0x3c9   : > { %7879 = vmatmul.mubr.f32.gmra.mrb[18].mxu1 %v10717_v34 }
 0x3ca   : > { %7881 = vmatprep.mubr.f32.mxu1 %v10720_v57 }
 0x3cd   : > { %7882 = vmatmul.mubr.f32.gmra.mrb[20].mxu1 %v10723_v25 }
 0x3ce   : > { %7884 = vmatprep.mubr.f32.mxu1 %v10726_v5 }
 0x3d1   : > { %7885 = vmatmul.mubr.f32.gmra.mrb[22].mxu1 %v10729_v62 }
 0x3d2   : > { %7887 = vmatprep.mubr.f32.mxu1 %v10732_v3 }
 0x3d5   : > { %7888 = vmatmul.mubr.f32.gmra.mrb[24].mxu1 %v10735_v8 }
 0x3d6   : > { %7890 = vmatprep.mubr.f32.mxu1 %v10738_v48 }
 0x3d9   : > { %7891 = vmatmul.mubr.f32.gmra.mrb[26].mxu1 %v10741_v20 }
 0x3da   : > { %7893 = vmatprep.mubr.f32.mxu1 %v10744_v53 }
 0x3dd   : > { %7894 = vmatmul.mubr.f32.gmra.mrb[28].mxu1 %v10747_v54 }
 0x3de   : > { %7896 = vmatprep.mubr.f32.mxu1 %v10750_v58 }
 0x3e1   : > { %7897 = vmatmul.mubr.f32.gmra.mrb[30].mxu1 %v10753_v0 }
 0x3e2   : > { %7931 = vmatprep.mubr.f32.mxu1 %v3718_v1  ;;  %v8855_v1 = vpack.c.bf16 %v4064_v23, %v4063_v35  ;;  %v10774_v35 = vld [vmem:[#allocation2 + $0x89] sm:$0xff] }
 0x3e3   : > { %11344 = vst [vmem:[#allocation21_spill] sm:$0xff] %v10774_v35 }
 0x3e5   : > { %7932 = vmatmul.mubr.f32.vlgmr.msra.gmra.mrb[0].mxu1 %v3719_v43  ;;  %v4066_v43 = vld [vmem:[#allocation8 + $0x1c8] sm:$0xff] }
 0x3e6   : > { %7934 = vmatprep.mubr.f32.mxu1 %v10756_v14  ;;  %8846 = vmatpush3.bf16.msra.mxu1 %v8843_v21  ;;  %v10768_v21 = vld [vmem:[#allocation2 + $0x69] sm:$0xff]  ;;  %v8859_v55 = vpack.c.bf16 %v4066_v43, %v4065_v42  ;;  %v10783_v43 = vld [vmem:[#allocation2 + $0xb1] sm:$0xff] }
 0x3e7   : > { %8848 = vmatprep.subr.bf16.mxu1 %v8847_v12  ;;  %11342 = vst [vmem:[#allocation19_spill] sm:$0xff] %v10768_v21 }
 0x3e9   : > { %7935 = vmatmul.mubr.f32.gmra.mrb[2].mxu1 %v10759_v17  ;;  %v4067_v17 = vld [vmem:[#allocation8 + $0x1d0] sm:$0xff] }
 0x3ea   : > { %7937 = vmatprep.mubr.f32.mxu1 %v10762_v26  ;;  %8850 = vmatpush3.bf16.msra.mxu1 %v8847_v12  ;;  %v4068_v26 = vld [vmem:[#allocation8 + $0x1d8] sm:$0xff] }
 0x3eb   : > { %8852 = vmatprep.subr.bf16.mxu1 %v8851_v47  ;;  %v8863_v23 = vpack.c.bf16 %v4068_v26, %v4067_v17  ;;  %v10777_v12 = vld [vmem:[#allocation2 + $0x91] sm:$0xff]  ;;  %v10786_v26 = vld [vmem:[#allocation2 + $0xc9] sm:$0xff] }
 0x3ec   : > { %11345 = vst [vmem:[#allocation22_spill] sm:$0xff] %v10777_v12 }
 0x3ed   : > { %7938 = vmatmul.mubr.f32.gmra.mrb[4].mxu1 %v10765_v11  ;;  %v4069_v11 = vld [vmem:[#allocation8 + $0x1e0] sm:$0xff] }
 0x3ee   : > { %7940 = vmatprep.mubr.f32.mxu1 %v10768_v21  ;;  %8854 = vmatpush3.bf16.msra.mxu1 %v8851_v47  ;;  %v4070_v21 = vld [vmem:[#allocation8 + $0x1e8] sm:$0xff] }
 0x3ef   : > { %8856 = vmatprep.subr.bf16.mxu1 %v8855_v1  ;;  %v10780_v47 = vld [vmem:[#allocation2 + $0xa9] sm:$0xff]  ;;  %v8867_v42 = vpack.c.bf16 %v4070_v21, %v4069_v11 }
 0x3f0   : > { %11346 = vst [vmem:[#allocation23_spill] sm:$0xff] %v10780_v47  ;;  %v10792_v11 = vld [vmem:[#allocation2 + $0xe9] sm:$0xff] }
 0x3f1   : > { %7941 = vmatmul.mubr.f32.gmra.mrb[6].mxu1 %v10771_v30  ;;  %v4071_v30 = vld [vmem:[#allocation8 + $0x1f0] sm:$0xff]  ;;  %11347 = vst [vmem:[#allocation24_spill] sm:$0xff] %v10792_v11 }
 0x3f2   : > { %7943 = vmatprep.mubr.f32.mxu1 %v10774_v35  ;;  %8858 = vmatpush3.bf16.msra.mxu1 %v8855_v1  ;;  %v4072_v35 = vld [vmem:[#allocation8 + $0x1f8] sm:$0xff] }
 0x3f3   : > { %8860 = vmatprep.subr.bf16.mxu1 %v8859_v55  ;;  %v8871_v17 = vpack.c.bf16 %v4072_v35, %v4071_v30  ;;  %v10789_v1 = vld [vmem:[#allocation2 + $0xd1] sm:$0xff]  ;;  %v10804_v35 = vld [vmem:[#allocation2 + $0x129] sm:$0xff] }
 0x3f4   : > { %v10801_v30 = vld [vmem:[#allocation2 + $0x111] sm:$0xff]  ;;  %11351 = vst [vmem:[#allocation28_spill] sm:$0xff] %v10804_v35 }
 0x3f5   : > { %7944 = vmatmul.mubr.f32.gmra.mrb[8].mxu1 %v10777_v12  ;;  %v4363_v12 = vld [vmem:[#allocation8 + $0x200] sm:$0xff]  ;;  %11350 = vst [vmem:[#allocation27_spill] sm:$0xff] %v10801_v30 }
 0x3f6   : > { %7946 = vmatprep.mubr.f32.mxu1 %v10780_v47  ;;  %8862 = vmatpush3.bf16.msra.mxu1 %v8859_v55  ;;  %v4364_v47 = vld [vmem:[#allocation8 + $0x208] sm:$0xff]  ;;  %v10795_v55 = vld [vmem:[#allocation2 + $0xf1] sm:$0xff] }
 0x3f7   : > { %8864 = vmatprep.subr.bf16.mxu1 %v8863_v23  ;;  %v8875_v21 = vpack.c.bf16 %v4364_v47, %v4363_v12  ;;  %11348 = vst [vmem:[#allocation25_spill] sm:$0xff] %v10795_v55  ;;  %v10810_v12 = vld [vmem:[#allocation2 + $0x149] sm:$0xff]  ;;  %v10813_v47 = vld [vmem:[#allocation2 + $0x151] sm:$0xff] }
 0x3f8   : > { %11353 = vst [vmem:[#allocation30_spill] sm:$0xff] %v10810_v12  ;;  %11354 = vst [vmem:[#allocation31_spill] sm:$0xff] %v10813_v47 }
 0x3f9   : > { %7947 = vmatmul.mubr.f32.gmra.mrb[10].mxu1 %v10783_v43 }
 0x3fa   : > { %7949 = vmatprep.mubr.f32.mxu1 %v10786_v26  ;;  %8866 = vmatpush3.bf16.msra.mxu1 %v8863_v23  ;;  %v10798_v23 = vld [vmem:[#allocation2 + $0x109] sm:$0xff] }
 0x3fb   : > { %8868 = vmatprep.subr.bf16.mxu1 %v8867_v42  ;;  %11349 = vst [vmem:[#allocation26_spill] sm:$0xff] %v10798_v23 }
 0x3fd   : > { %7950 = vmatmul.mubr.f32.gmra.mrb[12].mxu1 %v10789_v1 }
 0x3fe   : > { %7952 = vmatprep.mubr.f32.mxu1 %v10792_v11  ;;  %8870 = vmatpush3.bf16.msra.mxu1 %v8867_v42  ;;  %v10807_v42 = vld [vmem:[#allocation2 + $0x131] sm:$0xff]  ;;  %v4368_v11 = vld [vmem:[#allocation8 + $0x228] sm:$0xff] }
 0x3ff   : > { %8872 = vmatprep.subr.bf16.mxu1 %v8871_v17  ;;  %11352 = vst [vmem:[#allocation29_spill] sm:$0xff] %v10807_v42 }
 0x401   : > { %7953 = vmatmul.mubr.f32.gmra.mrb[14].mxu1 %v10795_v55  ;;  %v4367_v55 = vld [vmem:[#allocation8 + $0x220] sm:$0xff] }
 0x402   : > { %7955 = vmatprep.mubr.f32.mxu1 %v10798_v23  ;;  %8874 = vmatpush3.bf16.msra.mxu1 %v8871_v17  ;;  %v10816_v17 = vld [vmem:[#allocation2 + $0x169] sm:$0xff] }
 0x403   : > { %8876 = vmatprep.subr.bf16.mxu1 %v8875_v21  ;;  %11355 = vst [vmem:[#allocation32_spill] sm:$0xff] %v10816_v17  ;;  %v4365_v23 = vld [vmem:[#allocation8 + $0x210] sm:$0xff] }
 0x405   : > { %7956 = vmatmul.mubr.f32.gmra.mrb[16].mxu1 %v10801_v30  ;;  %v10819_v30 = vld [vmem:[#allocation2 + $0x171] sm:$0xff] }
 0x406   : > { %7958 = vmatprep.mubr.f32.mxu1 %v10804_v35  ;;  %11356 = vst [vmem:[#allocation33_spill] sm:$0xff] %v10819_v30  ;;  %v10822_v35 = vld [vmem:[#allocation2 + $0x189] sm:$0xff] }
 0x407   : > { %11357 = vst [vmem:[#allocation34_spill] sm:$0xff] %v10822_v35 }
 0x409   : > { %7959 = vmatmul.mubr.f32.gmra.mrb[18].mxu1 %v10807_v42  ;;  %v10825_v42 = vld [vmem:[#allocation2 + $0x191] sm:$0xff] }
 0x40a   : > { %7961 = vmatprep.mubr.f32.mxu1 %v10810_v12  ;;  %11358 = vst [vmem:[#allocation35_spill] sm:$0xff] %v10825_v42  ;;  %v10828_v12 = vld [vmem:[#allocation2 + $0x1a9] sm:$0xff] }
 0x40b   : > { %11359 = vst [vmem:[#allocation36_spill] sm:$0xff] %v10828_v12 }
 0x40d   : > { %7962 = vmatmul.mubr.f32.gmra.mrb[20].mxu1 %v10813_v47  ;;  %v10831_v47 = vld [vmem:[#allocation2 + $0x1b1] sm:$0xff] }
 0x40e   : > { %7964 = vmatprep.mubr.f32.mxu1 %v10816_v17  ;;  %11360 = vst [vmem:[#allocation37_spill] sm:$0xff] %v10831_v47  ;;  %v10834_v17 = vld [vmem:[#allocation2 + $0x1c9] sm:$0xff] }
 0x40f   : > { %11361 = vst [vmem:[#allocation38_spill] sm:$0xff] %v10834_v17 }
 0x411   : > { %7965 = vmatmul.mubr.f32.gmra.mrb[22].mxu1 %v10819_v30  ;;  %v10837_v30 = vld [vmem:[#allocation2 + $0x1d1] sm:$0xff] }
 0x412   : > { %7967 = vmatprep.mubr.f32.mxu1 %v10822_v35  ;;  %11362 = vst [vmem:[#allocation39_spill] sm:$0xff] %v10837_v30  ;;  %v10840_v35 = vld [vmem:[#allocation2 + $0x1e9] sm:$0xff] }
 0x413   : > { %11363 = vst [vmem:[#allocation40_spill] sm:$0xff] %v10840_v35 }
 0x415   : > { %7968 = vmatmul.mubr.f32.gmra.mrb[24].mxu1 %v10825_v42  ;;  %v10843_v42 = vld [vmem:[#allocation2 + $0x1f1] sm:$0xff] }
 0x416   : > { %7970 = vmatprep.mubr.f32.mxu1 %v10828_v12  ;;  %11364 = vst [vmem:[#allocation41_spill] sm:$0xff] %v10843_v42  ;;  %v4366_v12 = vld [vmem:[#allocation8 + $0x218] sm:$0xff] }
 0x419   : > { %7971 = vmatmul.mubr.f32.gmra.mrb[26].mxu1 %v10831_v47  ;;  %v8879_v47 = vpack.c.bf16 %v4366_v12, %v4365_v23  ;;  %v4372_v23 = vld [vmem:[#allocation8 + $0x248] sm:$0xff]  ;;  %v4375_v12 = vld [vmem:[#allocation8 + $0x260] sm:$0xff] }
 0x41a   : > { %7973 = vmatprep.mubr.f32.mxu1 %v10834_v17  ;;  %v4369_v17 = vld [vmem:[#allocation8 + $0x230] sm:$0xff] }
 0x41d   : > { %7974 = vmatmul.mubr.f32.gmra.mrb[28].mxu1 %v10837_v30  ;;  %v8883_v30 = vpack.c.bf16 %v4368_v11, %v4367_v55  ;;  %v4374_v11 = vld [vmem:[#allocation8 + $0x258] sm:$0xff] }
 0x41e   : > { %7976 = vmatprep.mubr.f32.mxu1 %v10840_v35  ;;  %v4370_v35 = vld [vmem:[#allocation8 + $0x238] sm:$0xff] }
 0x421   : > { %7977 = vmatmul.mubr.f32.gmra.mrb[30].mxu1 %v10843_v42  ;;  %v8887_v42 = vpack.c.bf16 %v4370_v35, %v4369_v17  ;;  %v4376_v35 = vld [vmem:[#allocation8 + $0x268] sm:$0xff]  ;;  %v4378_v17 = vld [vmem:[#allocation8 + $0x278] sm:$0xff] }
 0x422   : > { %8011 = vmatprep.mubr.f32.mxu1 %v10665_v37  ;;  %v4371_v37 = vld [vmem:[#allocation8 + $0x240] sm:$0xff] }
 0x425   : > { %8012 = vmatmul.mubr.f32.vlgmr.msra.gmra.mrb[0].mxu1 %v10669_v4  ;;  %v8891_v4 = vpack.c.bf16 %v4372_v23, %v4371_v37  ;;  %v4669_v37 = vld [vmem:[#allocation8 + $0x280] sm:$0xff]  ;;  %v4670_v23 = vld [vmem:[#allocation8 + $0x288] sm:$0xff] }
 0x426   : > { %8014 = vmatprep.mubr.f32.mxu1 %v10672_v19  ;;  %8878 = vmatpush3.bf16.msra.mxu1 %v8875_v21  ;;  %v4373_v21 = vld [vmem:[#allocation8 + $0x250] sm:$0xff] }
 0x427   : > { %8880 = vmatprep.subr.bf16.mxu1 %v8879_v47  ;;  %v8895_v55 = vpack.c.bf16 %v4374_v11, %v4373_v21  ;;  %v10876_v21 = vld [vmem:[#allocation2 + $0x207] sm:$0xff]  ;;  %v10879_v11 = vld [vmem:[#allocation2 + $0x20f] sm:$0xff] }
 0x428   : > { %11365 = vst [vmem:[#allocation42_spill] sm:$0xff] %v10876_v21  ;;  %11366 = vst [vmem:[#allocation43_spill] sm:$0xff] %v10879_v11 }
 0x429   : > { %8015 = vmatmul.mubr.f32.gmra.mrb[2].mxu1 %v10675_v41 }
 0x42a   : > { %8017 = vmatprep.mubr.f32.mxu1 %v10678_v2  ;;  %8882 = vmatpush3.bf16.msra.mxu1 %v8879_v47  ;;  %v4377_v47 = vld [vmem:[#allocation8 + $0x270] sm:$0xff] }
 0x42b   : > { %8884 = vmatprep.subr.bf16.mxu1 %v8883_v30 }
 0x42d   : > { %8018 = vmatmul.mubr.f32.gmra.mrb[4].mxu1 %v10681_v63 }
 0x42e   : > { %8020 = vmatprep.mubr.f32.mxu1 %v10684_v6  ;;  %8886 = vmatpush3.bf16.msra.mxu1 %v8883_v30  ;;  %v8899_v30 = vpack.c.bf16 %v4376_v35, %v4375_v12  ;;  %v4672_v12 = vld [vmem:[#allocation8 + $0x298] sm:$0xff]  ;;  %v4330_v35 = vld [vmem:[#allocation2 + $0x28] sm:$0xff] }
 0x42f   : > { %8888 = vmatprep.subr.bf16.mxu1 %v8887_v42 }
 0x431   : > { %8021 = vmatmul.mubr.f32.gmra.mrb[6].mxu1 %v10687_v31 }
 0x432   : > { %8023 = vmatprep.mubr.f32.mxu1 %v10690_v46  ;;  %8890 = vmatpush3.bf16.msra.mxu1 %v8887_v42  ;;  %v8903_v42 = vpack.c.bf16 %v4378_v17, %v4377_v47  ;;  %v4331_v47 = vld [vmem:[#allocation2 + $0x30] sm:$0xff]  ;;  %v4673_v17 = vld [vmem:[#allocation8 + $0x2a0] sm:$0xff] }
 0x433   : > { %8892 = vmatprep.subr.bf16.mxu1 %v8891_v4 }
 0x435   : > { %8024 = vmatmul.mubr.f32.gmra.mrb[8].mxu1 %v10693_v40 }
 0x436   : > { %8026 = vmatprep.mubr.f32.mxu1 %v10696_v13  ;;  %8894 = vmatpush3.bf16.msra.mxu1 %v8891_v4  ;;  %v8907_v4 = vpack.c.bf16 %v4670_v23, %v4669_v37  ;;  %v10882_v37 = vld [vmem:[#allocation2 + $0x48] sm:$0xff] }
 0x437   : > { %8896 = vmatprep.subr.bf16.mxu1 %v8895_v55 }
 0x439   : > { %8027 = vmatmul.mubr.f32.gmra.mrb[10].mxu1 %v10699_v56 }
 0x43a   : > { %8029 = vmatprep.mubr.f32.mxu1 %v10702_v18  ;;  %8898 = vmatpush3.bf16.msra.mxu1 %v8895_v55  ;;  %v4671_v55 = vld [vmem:[#allocation8 + $0x290] sm:$0xff] }
 0x43b   : > { %8900 = vmatprep.subr.bf16.mxu1 %v8899_v30 }
 0x43d   : > { %8030 = vmatmul.mubr.f32.gmra.mrb[12].mxu1 %v10705_v24 }
 0x43e   : > { %8032 = vmatprep.mubr.f32.mxu1 %v10708_v27  ;;  %8902 = vmatpush3.bf16.msra.mxu1 %v8899_v30  ;;  %v8911_v30 = vpack.c.bf16 %v4672_v12, %v4671_v55  ;;  %v10891_v12 = vld [vmem:[#allocation2 + $0x70] sm:$0xff] }
 0x43f   : > { %8904 = vmatprep.subr.bf16.mxu1 %v8903_v42  ;;  %11369 = vst [vmem:[#allocation46_spill] sm:$0xff] %v10891_v12 }
 0x441   : > { %8033 = vmatmul.mubr.f32.gmra.mrb[14].mxu1 %v10711_v28 }
 0x442   : > { %8035 = vmatprep.mubr.f32.mxu1 %v10714_v33  ;;  %8906 = vmatpush3.bf16.msra.mxu1 %v8903_v42  ;;  %v4674_v42 = vld [vmem:[#allocation8 + $0x2a8] sm:$0xff] }
 0x443   : > { %8908 = vmatprep.subr.bf16.mxu1 %v8907_v4  ;;  %v8915_v23 = vpack.c.bf16 %v4674_v42, %v4673_v17  ;;  %v10897_v42 = vld [vmem:[#allocation2 + $0x90] sm:$0xff] }
 0x444   : > { %11371 = vst [vmem:[#allocation48_spill] sm:$0xff] %v10897_v42 }
 0x445   : > { %8036 = vmatmul.mubr.f32.gmra.mrb[16].mxu1 %v10717_v34 }
 0x446   : > { %8038 = vmatprep.mubr.f32.mxu1 %v10720_v57 }
 0x449   : > { %8039 = vmatmul.mubr.f32.gmra.mrb[18].mxu1 %v10723_v25 }
 0x44a   : > { %8041 = vmatprep.mubr.f32.mxu1 %v10726_v5 }
 0x44d   : > { %8042 = vmatmul.mubr.f32.gmra.mrb[20].mxu1 %v10729_v62 }
 0x44e   : > { %8044 = vmatprep.mubr.f32.mxu1 %v10732_v3 }
 0x451   : > { %8045 = vmatmul.mubr.f32.gmra.mrb[22].mxu1 %v10735_v8 }
 0x452   : > { %8047 = vmatprep.mubr.f32.mxu1 %v10738_v48 }
 0x455   : > { %8048 = vmatmul.mubr.f32.gmra.mrb[24].mxu1 %v10741_v20 }
 0x456   : > { %8050 = vmatprep.mubr.f32.mxu1 %v10744_v53 }
 0x459   : > { %8051 = vmatmul.mubr.f32.gmra.mrb[26].mxu1 %v10747_v54 }
 0x45a   : > { %8053 = vmatprep.mubr.f32.mxu1 %v10750_v58  ;;  %v4676_v58 = vld [vmem:[#allocation8 + $0x2b8] sm:$0xff] }
 0x45d   : > { %8054 = vmatmul.mubr.f32.gmra.mrb[28].mxu1 %v10753_v0  ;;  %v4675_v0 = vld [vmem:[#allocation8 + $0x2b0] sm:$0xff] }
 0x45e   : > { %8056 = vmatprep.mubr.f32.mxu1 %v10876_v21  ;;  %v10885_v21 = vld [vmem:[#allocation2 + $0x50] sm:$0xff]  ;;  %v8919_v55 = vpack.c.bf16 %v4676_v58, %v4675_v0  ;;  %v10900_v58 = vld [vmem:[#allocation2 + $0xa8] sm:$0xff] }
 0x45f   : > { %11367 = vst [vmem:[#allocation44_spill] sm:$0xff] %v10885_v21 }
 0x461   : > { %8057 = vmatmul.mubr.f32.gmra.mrb[30].mxu1 %v10879_v11  ;;  %v10888_v11 = vld [vmem:[#allocation2 + $0x68] sm:$0xff] }
 0x462   : > { %8091 = vmatprep.mubr.f32.mxu1 %v4330_v35  ;;  %11368 = vst [vmem:[#allocation45_spill] sm:$0xff] %v10888_v11  ;;  %v4677_v35 = vld [vmem:[#allocation8 + $0x2c0] sm:$0xff] }
 0x465   : > { %8092 = vmatmul.mubr.f32.vlgmr.msra.gmra.mrb[0].mxu1 %v4331_v47  ;;  %v4678_v47 = vld [vmem:[#allocation8 + $0x2c8] sm:$0xff] }
 0x466   : > { %8094 = vmatprep.mubr.f32.mxu1 %v10882_v37  ;;  %8910 = vmatpush3.bf16.msra.mxu1 %v8907_v4  ;;  %v10894_v4 = vld [vmem:[#allocation2 + $0x88] sm:$0xff]  ;;  %v8923_v17 = vpack.c.bf16 %v4678_v47, %v4677_v35  ;;  %v10907_v35 = vld [vmem:[#allocation2 + $0xd0] sm:$0xff] }
 0x467   : > { %8912 = vmatprep.subr.bf16.mxu1 %v8911_v30  ;;  %11370 = vst [vmem:[#allocation47_spill] sm:$0xff] %v10894_v4  ;;  %v4683_v47 = vld [vmem:[#allocation8 + $0x2f0] sm:$0xff] }
 0x469   : > { %8095 = vmatmul.mubr.f32.gmra.mrb[2].mxu1 %v10885_v21  ;;  %v4679_v21 = vld [vmem:[#allocation8 + $0x2d0] sm:$0xff] }
 0x46a   : > { %8097 = vmatprep.mubr.f32.mxu1 %v10888_v11  ;;  %8914 = vmatpush3.bf16.msra.mxu1 %v8911_v30  ;;  %v4680_v11 = vld [vmem:[#allocation8 + $0x2d8] sm:$0xff]  ;;  %v10903_v30 = vld [vmem:[#allocation2 + $0xb0] sm:$0xff] }
 0x46b   : > { %8916 = vmatprep.subr.bf16.mxu1 %v8915_v23  ;;  %v8927_v0 = vpack.c.bf16 %v4680_v11, %v4679_v21  ;;  %v4975_v11 = vld [vmem:[#allocation8 + $0x300] sm:$0xff] }
 0x46d   : > { %8098 = vmatmul.mubr.f32.gmra.mrb[4].mxu1 %v10891_v12  ;;  %v4681_v12 = vld [vmem:[#allocation8 + $0x2e0] sm:$0xff] }
 0x46e   : > { %8100 = vmatprep.mubr.f32.mxu1 %v10894_v4  ;;  %8918 = vmatpush3.bf16.msra.mxu1 %v8915_v23  ;;  %v4682_v4 = vld [vmem:[#allocation8 + $0x2e8] sm:$0xff] }
 0x46f   : > { %8920 = vmatprep.subr.bf16.mxu1 %v8919_v55  ;;  %v8931_v23 = vpack.c.bf16 %v4682_v4, %v4681_v12  ;;  %v4985_v4 = vld [vmem:[#allocation8 + $0x350] sm:$0xff] }
 0x471   : > { %8101 = vmatmul.mubr.f32.gmra.mrb[6].mxu1 %v10897_v42  ;;  %v4684_v42 = vld [vmem:[#allocation8 + $0x2f8] sm:$0xff] }
 0x472   : > { %8103 = vmatprep.mubr.f32.mxu1 %v10900_v58  ;;  %8922 = vmatpush3.bf16.msra.mxu1 %v8919_v55  ;;  %v8935_v21 = vpack.c.bf16 %v4684_v42, %v4683_v47  ;;  %v4976_v55 = vld [vmem:[#allocation8 + $0x308] sm:$0xff]  ;;  %v4987_v47 = vld [vmem:[#allocation8 + $0x360] sm:$0xff] }
 0x473   : > { %8924 = vmatprep.subr.bf16.mxu1 %v8923_v17  ;;  %v11381_v42 = vld [vmem:[#allocation22_spill] sm:$0xff] }
 0x475   : > { %8104 = vmatmul.mubr.f32.gmra.mrb[8].mxu1 %v10903_v30 }
 0x476   : > { %8106 = vmatprep.mubr.f32.mxu1 %v10559_v39  ;;  %8926 = vmatpush3.bf16.msra.mxu1 %v8923_v17  ;;  %v8939_v39 = vpack.c.bf16 %v4976_v55, %v4975_v11  ;;  %v4986_v17 = vld [vmem:[#allocation8 + $0x358] sm:$0xff]  ;;  %v4989_v55 = vld [vmem:[#allocation8 + $0x370] sm:$0xff] }
 0x477   : > { %8928 = vmatprep.subr.bf16.mxu1 %v8927_v0 }
 0x479   : > { %8107 = vmatmul.mubr.f32.gmra.mrb[10].mxu1 %v10907_v35 }
 0x47a   : > { %8109 = vmatprep.mubr.f32.mxu1 %v10567_v61  ;;  %8930 = vmatpush3.bf16.msra.mxu1 %v8927_v0  ;;  %v4977_v61 = vld [vmem:[#allocation8 + $0x310] sm:$0xff] }
 0x47b   : > { %8932 = vmatprep.subr.bf16.mxu1 %v8931_v23  ;;  %v11382_v0 = vld [vmem:[#allocation23_spill] sm:$0xff] }
 0x47d   : > { %8110 = vmatmul.mubr.f32.gmra.mrb[12].mxu1 %v10565_v36  ;;  %v11372_v36 = vmax.f32 %v10655_v29, 0.0  ;;  %v11379_v29 = vld [vmem:[#allocation20_spill] sm:$0xff] }
 0x47e   : > { %8112 = vmatprep.mubr.f32.mxu1 %v10577_v7  ;;  %8934 = vmatpush3.bf16.msra.mxu1 %v8931_v23  ;;  %v11373_v7 = vld [vmem:[#allocation13_spill] sm:$0xff]  ;;  %v8959_v23 = vpack.c.bf16 %v4986_v17, %v4985_v4  ;;  %v5283_v4 = vld [vmem:[#allocation8 + $0x390] sm:$0xff]  ;;  %v5284_v17 = vld [vmem:[#allocation8 + $0x398] sm:$0xff] }
 0x47f   : > { %8936 = vmatprep.subr.bf16.mxu1 %v8935_v21 }
 0x481   : > { %8113 = vmatmul.mubr.f32.gmra.mrb[14].mxu1 %v10574_v49  ;;  %v4978_v49 = vld [vmem:[#allocation8 + $0x318] sm:$0xff] }
 0x482   : > { %8115 = vmatprep.mubr.f32.mxu1 %v10587_v32  ;;  %8938 = vmatpush3.bf16.msra.mxu1 %v8935_v21  ;;  %v8943_v32 = vpack.c.bf16 %v4978_v49, %v4977_v61  ;;  %v4988_v21 = vld [vmem:[#allocation8 + $0x368] sm:$0xff]  ;;  %v5281_v49 = vld [vmem:[#allocation8 + $0x380] sm:$0xff] }
 0x483   : > { %8940 = vmatprep.subr.bf16.mxu1 %v8939_v39  ;;  %v8963_v11 = vpack.c.bf16 %v4988_v21, %v4987_v47  ;;  %v5287_v21 = vld [vmem:[#allocation8 + $0x3b0] sm:$0xff] }
 0x485   : > { %8116 = vmatmul.mubr.f32.gmra.mrb[16].mxu1 %v10584_v52  ;;  %v11374_v52 = vmax.f32 %v11373_v7, 0.0  ;;  %v5282_v7 = vld [vmem:[#allocation8 + $0x388] sm:$0xff] }
 0x486   : > { %8118 = vmatprep.mubr.f32.mxu1 %v10597_v60  ;;  %v4980_v60 = vld [vmem:[#allocation8 + $0x328] sm:$0xff] }
 0x489   : > { %8119 = vmatmul.mubr.f32.gmra.mrb[18].mxu1 %v10594_v59  ;;  %v4979_v59 = vld [vmem:[#allocation8 + $0x320] sm:$0xff] }
 0x48a   : > { %8121 = vmatprep.mubr.f32.mxu1 %v10607_v10  ;;  %v11376_v10 = vld [vmem:[#allocation17_spill] sm:$0xff] }
 0x48d   : > { %8122 = vmatmul.mubr.f32.gmra.mrb[20].mxu1 %v10604_v9  ;;  %v11375_v9 = vld [vmem:[#allocation16_spill] sm:$0xff] }
 0x48e   : > { %8124 = vmatprep.mubr.f32.mxu1 %v10617_v44  ;;  %v4981_v44 = vld [vmem:[#allocation8 + $0x330] sm:$0xff] }
 0x491   : > { %8125 = vmatmul.mubr.f32.gmra.mrb[22].mxu1 %v10614_v50  ;;  %v8947_v50 = vpack.c.bf16 %v4980_v60, %v4979_v59  ;;  %v11387_v59 = vld [vmem:[#allocation28_spill] sm:$0xff]  ;;  %v11389_v60 = vld [vmem:[#allocation30_spill] sm:$0xff] }
 0x492   : > { %8127 = vmatprep.mubr.f32.mxu1 %v10627_v45  ;;  %v11377_v45 = vld [vmem:[#allocation18_spill] sm:$0xff] }
 0x495   : > { %8128 = vmatmul.mubr.f32.gmra.mrb[24].mxu1 %v10624_v51  ;;  %v4982_v51 = vld [vmem:[#allocation8 + $0x338] sm:$0xff] }
 0x496   : > { %8130 = vmatprep.mubr.f32.mxu1 %v10637_v16  ;;  %v8951_v16 = vpack.c.bf16 %v4982_v51, %v4981_v44  ;;  %v11393_v44 = vld [vmem:[#allocation34_spill] sm:$0xff]  ;;  %v11394_v51 = vld [vmem:[#allocation35_spill] sm:$0xff] }
 0x499   : > { %8131 = vmatmul.mubr.f32.gmra.mrb[26].mxu1 %v10634_v15  ;;  %v11378_v15 = vld [vmem:[#allocation19_spill] sm:$0xff] }
 0x49a   : > { %8133 = vmatprep.mubr.f32.mxu1 %v10647_v38  ;;  %v4984_v38 = vld [vmem:[#allocation8 + $0x348] sm:$0xff] }
 0x49d   : > { %8134 = vmatmul.mubr.f32.gmra.mrb[28].mxu1 %v10644_v22  ;;  %v4983_v22 = vld [vmem:[#allocation8 + $0x340] sm:$0xff] }
 0x49e   : > { %8136 = vmatprep.mubr.f32.mxu1 %v11372_v36  ;;  %v8955_v12 = vpack.c.bf16 %v4984_v38, %v4983_v22  ;;  %v11383_v36 = vld [vmem:[#allocation24_spill] sm:$0xff]  ;;  %v11398_v22 = vld [vmem:[#allocation39_spill] sm:$0xff] }
 0x49f   : > { %v11399_v38 = vld [vmem:[#allocation40_spill] sm:$0xff] }
 0x4a1   : > { %8137 = vmatmul.mubr.f32.gmra.mrb[30].mxu1 %v11374_v52  ;;  %v11384_v52 = vld [vmem:[#allocation25_spill] sm:$0xff] }
 0x4a2   : > { %8171 = vmatprep.mubr.f32.mxu1 %v10756_v14  ;;  %v11380_v14 = vld [vmem:[#allocation21_spill] sm:$0xff] }
 0x4a5   : > { %8172 = vmatmul.mubr.f32.vlgmr.msra.gmra.mrb[0].mxu1 %v11375_v9  ;;  %v11390_v9 = vld [vmem:[#allocation31_spill] sm:$0xff] }
 0x4a6   : > { %8174 = vmatprep.mubr.f32.mxu1 %v11376_v10  ;;  %8942 = vmatpush3.bf16.msra.mxu1 %v8939_v39  ;;  %v4990_v39 = vld [vmem:[#allocation8 + $0x378] sm:$0xff] }
 0x4a7   : > { %8944 = vmatprep.subr.bf16.mxu1 %v8943_v32  ;;  %v8967_v61 = vpack.c.bf16 %v4990_v39, %v4989_v55  ;;  %v11391_v10 = vld [vmem:[#allocation32_spill] sm:$0xff]  ;;  %v5290_v39 = vld [vmem:[#allocation8 + $0x3c8] sm:$0xff] }
 0x4a9   : > { %8175 = vmatmul.mubr.f32.gmra.mrb[2].mxu1 %v11377_v45  ;;  %v11395_v45 = vld [vmem:[#allocation36_spill] sm:$0xff] }
 0x4aa   : > { %8177 = vmatprep.mubr.f32.mxu1 %v11378_v15  ;;  %8946 = vmatpush3.bf16.msra.mxu1 %v8943_v32  ;;  %v11385_v32 = vld [vmem:[#allocation26_spill] sm:$0xff]  ;;  %v11396_v15 = vld [vmem:[#allocation37_spill] sm:$0xff] }
 0x4ab   : > { %8948 = vmatprep.subr.bf16.mxu1 %v8947_v50 }
 0x4ad   : > { %8178 = vmatmul.mubr.f32.gmra.mrb[4].mxu1 %v11379_v29  ;;  %v11400_v29 = vld [vmem:[#allocation41_spill] sm:$0xff] }
 0x4ae   : > { %8180 = vmatprep.mubr.f32.mxu1 %v11380_v14  ;;  %8950 = vmatpush3.bf16.msra.mxu1 %v8947_v50  ;;  %v11392_v50 = vld [vmem:[#allocation33_spill] sm:$0xff]  ;;  %v10962_v14 = vld [vmem:[#allocation2 + $0x209] sm:$0xff] }
 0x4af   : > { %8952 = vmatprep.subr.bf16.mxu1 %v8951_v16 }
 0x4b1   : > { %8181 = vmatmul.mubr.f32.gmra.mrb[6].mxu1 %v11381_v42  ;;  %v8975_v42 = vpack.c.bf16 %v5284_v17, %v5283_v4  ;;  %v5262_v4 = vld [vmem:[#allocation2 + $0x128] sm:$0xff] }
 0x4b2   : > { %8183 = vmatprep.mubr.f32.mxu1 %v11382_v0  ;;  %8954 = vmatpush3.bf16.msra.mxu1 %v8951_v16  ;;  %v11397_v16 = vld [vmem:[#allocation38_spill] sm:$0xff]  ;;  %v5285_v0 = vld [vmem:[#allocation8 + $0x3a0] sm:$0xff] }
 0x4b3   : > { %8956 = vmatprep.subr.bf16.mxu1 %v8955_v12  ;;  %v5264_v17 = vld [vmem:[#allocation2 + $0x148] sm:$0xff] }
 0x4b5   : > { %8184 = vmatmul.mubr.f32.gmra.mrb[8].mxu1 %v10783_v43  ;;  %v8971_v43 = vpack.c.bf16 %v5282_v7, %v5281_v49  ;;  %v5296_v49 = vld [vmem:[#allocation8 + $0x3f8] sm:$0xff]  ;;  %v5588_v7 = vld [vmem:[#allocation8 + $0x408] sm:$0xff] }
 0x4b6   : > { %8186 = vmatprep.mubr.f32.mxu1 %v10786_v26  ;;  %8958 = vmatpush3.bf16.msra.mxu1 %v8955_v12  ;;  %v11386_v26 = vld [vmem:[#allocation27_spill] sm:$0xff] }
 0x4b7   : > { %8960 = vmatprep.subr.bf16.mxu1 %v8959_v23  ;;  %v10965_v12 = vld [vmem:[#allocation2 + $0x211] sm:$0xff] }
 0x4b9   : > { %8187 = vmatmul.mubr.f32.gmra.mrb[10].mxu1 %v10789_v1  ;;  %v11388_v1 = vld [vmem:[#allocation29_spill] sm:$0xff] }
 0x4ba   : > { %8189 = vmatprep.mubr.f32.mxu1 %v11383_v36  ;;  %8962 = vmatpush3.bf16.msra.mxu1 %v8959_v23  ;;  %v5286_v23 = vld [vmem:[#allocation8 + $0x3a8] sm:$0xff]  ;;  %v5292_v36 = vld [vmem:[#allocation8 + $0x3d8] sm:$0xff] }
 0x4bb   : > { %8964 = vmatprep.subr.bf16.mxu1 %v8963_v11  ;;  %v8979_v47 = vpack.c.bf16 %v5286_v23, %v5285_v0  ;;  %v5266_v0 = vld [vmem:[#allocation2 + $0x168] sm:$0xff]  ;;  %v5267_v23 = vld [vmem:[#allocation2 + $0x170] sm:$0xff] }
 0x4bd   : > { %8190 = vmatmul.mubr.f32.gmra.mrb[12].mxu1 %v11384_v52  ;;  %v11407_v52 = vld [vmem:[#allocation46_spill] sm:$0xff] }
 0x4be   : > { %8192 = vmatprep.mubr.f32.mxu1 %v11385_v32  ;;  %8966 = vmatpush3.bf16.msra.mxu1 %v8963_v11  ;;  %v5288_v11 = vld [vmem:[#allocation8 + $0x3b8] sm:$0xff]  ;;  %v11408_v32 = vld [vmem:[#allocation47_spill] sm:$0xff] }
 0x4bf   : > { %8968 = vmatprep.subr.bf16.mxu1 %v8967_v61  ;;  %v8983_v55 = vpack.c.bf16 %v5288_v11, %v5287_v21  ;;  %v5269_v21 = vld [vmem:[#allocation2 + $0x190] sm:$0xff]  ;;  %v5270_v11 = vld [vmem:[#allocation2 + $0x1a8] sm:$0xff] }
 0x4c1   : > { %8193 = vmatmul.mubr.f32.gmra.mrb[14].mxu1 %v11386_v26  ;;  %v5596_v26 = vld [vmem:[#allocation8 + $0x448] sm:$0xff] }
 0x4c2   : > { %8195 = vmatprep.mubr.f32.mxu1 %v11387_v59  ;;  %8970 = vmatpush3.bf16.msra.mxu1 %v8967_v61  ;;  %v5294_v61 = vld [vmem:[#allocation8 + $0x3e8] sm:$0xff]  ;;  %v11409_v59 = vld [vmem:[#allocation48_spill] sm:$0xff] }
 0x4c3   : > { %8972 = vmatprep.subr.bf16.mxu1 %v8971_v43 }
 0x4c5   : > { %8196 = vmatmul.mubr.f32.gmra.mrb[16].mxu1 %v11388_v1 }
 0x4c6   : > { %8198 = vmatprep.mubr.f32.mxu1 %v11389_v60  ;;  %v5597_v60 = vld [vmem:[#allocation8 + $0x450] sm:$0xff] }
 0x4c9   : > { %8199 = vmatmul.mubr.f32.gmra.mrb[18].mxu1 %v11390_v9  ;;  %v5598_v9 = vld [vmem:[#allocation8 + $0x458] sm:$0xff] }
 0x4ca   : > { %8201 = vmatprep.mubr.f32.mxu1 %v11391_v10  ;;  %v5256_v10 = vld [vmem:[#allocation2 + $0xc8] sm:$0xff] }
 0x4cd   : > { %8202 = vmatmul.mubr.f32.gmra.mrb[20].mxu1 %v11392_v50  ;;  %v9023_v50 = vpack.c.bf16 %v5598_v9, %v5597_v60  ;;  %v5900_v9 = vld [vmem:[%s10007_s12 + $0x8] sm:$0xff] }
 0x4ce   : > { %8204 = vmatprep.mubr.f32.mxu1 %v11393_v44  ;;  %v5599_v44 = vld [vmem:[#allocation8 + $0x460] sm:$0xff] }
 0x4d1   : > { %8205 = vmatmul.mubr.f32.gmra.mrb[22].mxu1 %v11394_v51  ;;  %v5600_v51 = vld [vmem:[#allocation8 + $0x468] sm:$0xff] }
 0x4d2   : > { %8207 = vmatprep.mubr.f32.mxu1 %v11395_v45  ;;  %v5258_v45 = vld [vmem:[#allocation2 + $0xe8] sm:$0xff] }
 0x4d5   : > { %8208 = vmatmul.mubr.f32.gmra.mrb[24].mxu1 %v11396_v15  ;;  %v5259_v15 = vld [vmem:[#allocation2 + $0xf0] sm:$0xff] }
 0x4d6   : > { %8210 = vmatprep.mubr.f32.mxu1 %v11397_v16  ;;  %v5601_v16 = vld [vmem:[#allocation8 + $0x470] sm:$0xff] }
 0x4d9   : > { %8211 = vmatmul.mubr.f32.gmra.mrb[26].mxu1 %v11398_v22  ;;  %v5602_v22 = vld [vmem:[#allocation8 + $0x478] sm:$0xff] }
 0x4da   : > { %8213 = vmatprep.mubr.f32.mxu1 %v11399_v38  ;;  %v5260_v38 = vld [vmem:[#allocation2 + $0x108] sm:$0xff] }
 0x4dd   : > { %8214 = vmatmul.mubr.f32.gmra.mrb[28].mxu1 %v11400_v29  ;;  %v5261_v29 = vld [vmem:[#allocation2 + $0x110] sm:$0xff] }
 0x4de   : > { %8216 = vmatprep.mubr.f32.mxu1 %v10962_v14 }
 0x4e1   : > { %8217 = vmatmul.mubr.f32.gmra.mrb[30].mxu1 %v10965_v12 }
 0x4e2   : > { %8251 = vmatprep.mubr.f32.mxu1 %v10672_v19  ;;  %v5289_v19 = vld [vmem:[#allocation8 + $0x3c0] sm:$0xff] }
 0x4e5   : > { %8252 = vmatmul.mubr.f32.vlgmr.msra.gmra.mrb[0].mxu1 %v10675_v41  ;;  %v8987_v41 = vpack.c.bf16 %v5290_v39, %v5289_v19  ;;  %v5272_v19 = vld [vmem:[#allocation2 + $0x1c8] sm:$0xff]  ;;  %v5273_v39 = vld [vmem:[#allocation2 + $0x1d0] sm:$0xff] }
 0x4e6   : > { %8254 = vmatprep.mubr.f32.mxu1 %v10678_v2  ;;  %8974 = vmatpush3.bf16.msra.mxu1 %v8971_v43  ;;  %v5291_v2 = vld [vmem:[#allocation8 + $0x3d0] sm:$0xff] }
 0x4e7   : > { %8976 = vmatprep.subr.bf16.mxu1 %v8975_v42 }
 0x4e9   : > { %8255 = vmatmul.mubr.f32.gmra.mrb[2].mxu1 %v10681_v63  ;;  %v8991_v63 = vpack.c.bf16 %v5292_v36, %v5291_v2  ;;  %v5275_v2 = vld [vmem:[#allocation2 + $0x1f0] sm:$0xff]  ;;  %v5276_v36 = vld [vmem:[#allocation2 + $0x208] sm:$0xff] }
 0x4ea   : > { %8257 = vmatprep.mubr.f32.mxu1 %v10684_v6  ;;  %8978 = vmatpush3.bf16.msra.mxu1 %v8975_v42  ;;  %v5293_v6 = vld [vmem:[#allocation8 + $0x3e0] sm:$0xff]  ;;  %v5265_v42 = vld [vmem:[#allocation2 + $0x150] sm:$0xff] }
 0x4eb   : > { %8980 = vmatprep.subr.bf16.mxu1 %v8979_v47 }
 0x4ed   : > { %8258 = vmatmul.mubr.f32.gmra.mrb[4].mxu1 %v10687_v31  ;;  %v8995_v31 = vpack.c.bf16 %v5294_v61, %v5293_v6  ;;  %v9622_v6 = vld [vmem:[#allocation2 + $0x8] sm:$0xff] }
 0x4ee   : > { %8260 = vmatprep.mubr.f32.mxu1 %v10690_v46  ;;  %8982 = vmatpush3.bf16.msra.mxu1 %v8979_v47  ;;  %v5295_v46 = vld [vmem:[#allocation8 + $0x3f0] sm:$0xff]  ;;  %v5268_v47 = vld [vmem:[#allocation2 + $0x188] sm:$0xff] }
 0x4ef   : > { %8984 = vmatprep.subr.bf16.mxu1 %v8983_v55  ;;  %v5554_v61 = vld [vmem:[#allocation2 + $0x49] sm:$0xff] }
 0x4f1   : > { %8261 = vmatmul.mubr.f32.gmra.mrb[6].mxu1 %v10693_v40  ;;  %v8999_v40 = vpack.c.bf16 %v5296_v49, %v5295_v46  ;;  %v5556_v46 = vld [vmem:[#allocation2 + $0x69] sm:$0xff]  ;;  %v5557_v49 = vld [vmem:[#allocation2 + $0x71] sm:$0xff] }
 0x4f2   : > { %8263 = vmatprep.mubr.f32.mxu1 %v10696_v13  ;;  %8986 = vmatpush3.bf16.msra.mxu1 %v8983_v55  ;;  %v5587_v13 = vld [vmem:[#allocation8 + $0x400] sm:$0xff]  ;;  %v5271_v55 = vld [vmem:[#allocation2 + $0x1b0] sm:$0xff] }
 0x4f3   : > { %8988 = vmatprep.subr.bf16.mxu1 %v8987_v41 }
 0x4f5   : > { %8264 = vmatmul.mubr.f32.gmra.mrb[8].mxu1 %v10699_v56  ;;  %v9003_v56 = vpack.c.bf16 %v5588_v7, %v5587_v13  ;;  %v5559_v13 = vld [vmem:[#allocation2 + $0x91] sm:$0xff]  ;;  %v5560_v7 = vld [vmem:[#allocation2 + $0xa9] sm:$0xff] }
 0x4f6   : > { %8266 = vmatprep.mubr.f32.mxu1 %v10702_v18  ;;  %8990 = vmatpush3.bf16.msra.mxu1 %v8987_v41  ;;  %v11401_v18 = vld [vmem:[#allocation14_spill] sm:$0xff] }
 0x4f7   : > { %8992 = vmatprep.subr.bf16.mxu1 %v8991_v63  ;;  %v5274_v41 = vld [vmem:[#allocation2 + $0x1e8] sm:$0xff] }
 0x4f9   : > { %8267 = vmatmul.mubr.f32.gmra.mrb[10].mxu1 %v10705_v24  ;;  %v11402_v24 = vld [vmem:[#allocation15_spill] sm:$0xff] }
 0x4fa   : > { %8269 = vmatprep.mubr.f32.mxu1 %v10708_v27  ;;  %8994 = vmatpush3.bf16.msra.mxu1 %v8991_v63  ;;  %v11403_v27 = vld [vmem:[#allocation42_spill] sm:$0xff]  ;;  %v5277_v63 = vld [vmem:[#allocation2 + $0x210] sm:$0xff] }
 0x4fb   : > { %8996 = vmatprep.subr.bf16.mxu1 %v8995_v31 }
 0x4fd   : > { %8270 = vmatmul.mubr.f32.gmra.mrb[12].mxu1 %v10711_v28  ;;  %v4972_v28 = vld [vmem:[#allocation2 + $0x227] sm:$0xff] }
 0x4fe   : > { %8272 = vmatprep.mubr.f32.mxu1 %v10714_v33  ;;  %8998 = vmatpush3.bf16.msra.mxu1 %v8995_v31  ;;  %v11404_v33 = vld [vmem:[#allocation43_spill] sm:$0xff] }
 0x4ff   : > { %9000 = vmatprep.subr.bf16.mxu1 %v8999_v40  ;;  %v5555_v31 = vld [vmem:[#allocation2 + $0x51] sm:$0xff] }
 0x501   : > { %8273 = vmatmul.mubr.f32.gmra.mrb[14].mxu1 %v10717_v34  ;;  %v4973_v34 = vld [vmem:[#allocation2 + $0x22f] sm:$0xff] }
 0x502   : > { %8275 = vmatprep.mubr.f32.mxu1 %v10720_v57  ;;  %9002 = vmatpush3.bf16.msra.mxu1 %v8999_v40  ;;  %v5589_v57 = vld [vmem:[#allocation8 + $0x410] sm:$0xff] }
 0x503   : > { %9004 = vmatprep.subr.bf16.mxu1 %v9003_v56  ;;  %v5558_v40 = vld [vmem:[#allocation2 + $0x89] sm:$0xff] }
 0x505   : > { %8276 = vmatmul.mubr.f32.gmra.mrb[16].mxu1 %v10723_v25  ;;  %v5590_v25 = vld [vmem:[#allocation8 + $0x418] sm:$0xff] }
 0x506   : > { %8278 = vmatprep.mubr.f32.mxu1 %v10726_v5  ;;  %v9007_v5 = vpack.c.bf16 %v5590_v25, %v5589_v57  ;;  %v5568_v57 = vld [vmem:[#allocation2 + $0x129] sm:$0xff]  ;;  %v5569_v25 = vld [vmem:[#allocation2 + $0x131] sm:$0xff] }
 0x509   : > { %8279 = vmatmul.mubr.f32.gmra.mrb[18].mxu1 %v10729_v62  ;;  %v5591_v62 = vld [vmem:[#allocation8 + $0x420] sm:$0xff] }
 0x50a   : > { %8281 = vmatprep.mubr.f32.mxu1 %v10732_v3  ;;  %v5592_v3 = vld [vmem:[#allocation8 + $0x428] sm:$0xff] }
 0x50d   : > { %8282 = vmatmul.mubr.f32.gmra.mrb[20].mxu1 %v10735_v8  ;;  %v11405_v8 = vld [vmem:[#allocation44_spill] sm:$0xff] }
 0x50e   : > { %8284 = vmatprep.mubr.f32.mxu1 %v10738_v48  ;;  %v11406_v48 = vld [vmem:[#allocation45_spill] sm:$0xff] }
 0x511   : > { %8285 = vmatmul.mubr.f32.gmra.mrb[22].mxu1 %v10741_v20  ;;  %v9011_v20 = vpack.c.bf16 %v5592_v3, %v5591_v62  ;;  %v5571_v62 = vld [vmem:[#allocation2 + $0x151] sm:$0xff]  ;;  %v5572_v3 = vld [vmem:[#allocation2 + $0x169] sm:$0xff] }
 0x512   : > { %8287 = vmatprep.mubr.f32.mxu1 %v10744_v53  ;;  %v5593_v53 = vld [vmem:[#allocation8 + $0x430] sm:$0xff] }
 0x515   : > { %8288 = vmatmul.mubr.f32.gmra.mrb[24].mxu1 %v10747_v54  ;;  %v5594_v54 = vld [vmem:[#allocation8 + $0x438] sm:$0xff] }
 0x516   : > { %8290 = vmatprep.mubr.f32.mxu1 %v11401_v18  ;;  %v9015_v43 = vpack.c.bf16 %v5594_v54, %v5593_v53  ;;  %v5562_v18 = vld [vmem:[#allocation2 + $0xc9] sm:$0xff]  ;;  %v5577_v54 = vld [vmem:[#allocation2 + $0x1b1] sm:$0xff] }
 0x517   : > { %v5576_v53 = vld [vmem:[#allocation2 + $0x1a9] sm:$0xff] }
 0x519   : > { %8291 = vmatmul.mubr.f32.gmra.mrb[26].mxu1 %v11402_v24  ;;  %v5563_v24 = vld [vmem:[#allocation2 + $0xd1] sm:$0xff] }
 0x51a   : > { %8293 = vmatprep.mubr.f32.mxu1 %v11403_v27  ;;  %v5564_v27 = vld [vmem:[#allocation2 + $0xe9] sm:$0xff] }
 0x51d   : > { %8294 = vmatmul.mubr.f32.gmra.mrb[28].mxu1 %v11404_v33  ;;  %v5566_v33 = vld [vmem:[#allocation2 + $0x109] sm:$0xff] }
 0x51e   : > { %8296 = vmatprep.mubr.f32.mxu1 %v4972_v28  ;;  %v5565_v28 = vld [vmem:[#allocation2 + $0xf1] sm:$0xff] }
 0x521   : > { %8297 = vmatmul.mubr.f32.gmra.mrb[30].mxu1 %v4973_v34  ;;  %v5567_v34 = vld [vmem:[#allocation2 + $0x111] sm:$0xff] }
 0x522   : > { %8331 = vmatprep.mubr.f32.mxu1 %v10882_v37  ;;  %v5595_v37 = vld [vmem:[#allocation8 + $0x440] sm:$0xff] }
 0x523   : > { %v9019_v1 = vpack.c.bf16 %v5596_v26, %v5595_v37  ;;  %v5581_v37 = vld [vmem:[#allocation2 + $0x1f1] sm:$0xff]  ;;  %v5584_v26 = vld [vmem:[#allocation2 + $0x229] sm:$0xff] }
 0x525   : > { %8332 = vmatmul.mubr.f32.vlgmr.msra.gmra.mrb[0].mxu1 %v11405_v8  ;;  %v5573_v8 = vld [vmem:[#allocation2 + $0x171] sm:$0xff] }
 0x526   : > { %8334 = vmatprep.mubr.f32.mxu1 %v11406_v48  ;;  %9006 = vmatpush3.bf16.msra.mxu1 %v9003_v56  ;;  %v5561_v56 = vld [vmem:[#allocation2 + $0xb1] sm:$0xff]  ;;  %v5574_v48 = vld [vmem:[#allocation2 + $0x189] sm:$0xff] }
 0x527   : > { %9008 = vmatprep.subr.bf16.mxu1 %v9007_v5 }
 0x529   : > { %8335 = vmatmul.mubr.f32.gmra.mrb[2].mxu1 %v11407_v52  ;;  %v5578_v52 = vld [vmem:[#allocation2 + $0x1c9] sm:$0xff] }
 0x52a   : > { %8337 = vmatprep.mubr.f32.mxu1 %v11408_v32  ;;  %9010 = vmatpush3.bf16.msra.mxu1 %v9007_v5  ;;  %v5570_v5 = vld [vmem:[#allocation2 + $0x149] sm:$0xff]  ;;  %v5579_v32 = vld [vmem:[#allocation2 + $0x1d1] sm:$0xff] }
 0x52b   : > { %9012 = vmatprep.subr.bf16.mxu1 %v9011_v20 }
 0x52d   : > { %8338 = vmatmul.mubr.f32.gmra.mrb[4].mxu1 %v11409_v59  ;;  %v5585_v59 = vld [vmem:[#allocation2 + $0x231] sm:$0xff] }
 0x52e   : > { %8340 = vmatprep.mubr.f32.mxu1 %v10900_v58  ;;  %9014 = vmatpush3.bf16.msra.mxu1 %v9011_v20  ;;  %v9027_v58 = vpack.c.bf16 %v5600_v51, %v5599_v44  ;;  %v5575_v20 = vld [vmem:[#allocation2 + $0x191] sm:$0xff] }
 0x52f   : > { %9016 = vmatprep.subr.bf16.mxu1 %v9015_v43 }
 0x531   : > { %8341 = vmatmul.mubr.f32.gmra.mrb[6].mxu1 %v10903_v30  ;;  %v9031_v30 = vpack.c.bf16 %v5602_v22, %v5601_v16 }
 0x532   : > { %8343 = vmatprep.mubr.f32.mxu1 %v5256_v10  ;;  %9018 = vmatpush3.bf16.msra.mxu1 %v9015_v43  ;;  %v5580_v43 = vld [vmem:[#allocation2 + $0x1e9] sm:$0xff] }
 0x533   : > { %9020 = vmatprep.subr.bf16.mxu1 %v9019_v1 }
 0x535   : > { %8344 = vmatmul.mubr.f32.gmra.mrb[8].mxu1 %v10907_v35  ;;  %v5263_v35 = vld [vmem:[#allocation2 + $0x130] sm:$0xff] }
 0x536   : > { %8346 = vmatprep.mubr.f32.mxu1 %v5258_v45  ;;  %9022 = vmatpush3.bf16.msra.mxu1 %v9019_v1  ;;  %v11012_v1 = vld [vmem:[%s11169_s4] ss:$0 sm:$0xff] }
 0x537   : > { %9024 = vmatprep.subr.bf16.mxu1 %v9023_v50 }
 0x539   : > { %8347 = vmatmul.mubr.f32.gmra.mrb[10].mxu1 %v5259_v15 }
 0x53a   : > { %8349 = vmatprep.mubr.f32.mxu1 %v5260_v38  ;;  %9026 = vmatpush3.bf16.msra.mxu1 %v9023_v50  ;;  %v5901_v38 = vld [vmem:[%s10007_s12 + $0x10] sm:$0xff] }
 0x53b   : > { %9028 = vmatprep.subr.bf16.mxu1 %v9027_v58 }
 0x53d   : > { %8350 = vmatmul.mubr.f32.gmra.mrb[12].mxu1 %v5261_v29 }
 0x53e   : > { %8352 = vmatprep.mubr.f32.mxu1 %v5262_v4  ;;  %9030 = vmatpush3.bf16.msra.mxu1 %v9027_v58  ;;  %v5902_v58 = vld [vmem:[%s10007_s12 + $0x18] sm:$0xff] }
 0x53f   : > { %9032 = vmatprep.subr.bf16.mxu1 %v9031_v30 }
 0x541   : > { %8353 = vmatmul.mubr.f32.gmra.mrb[14].mxu1 %v5263_v35 }
 0x542   : > { %8355 = vmatprep.mubr.f32.mxu1 %v5264_v17  ;;  %9034 = vmatpush3.bf16.msra.mxu1 %v9031_v30 }
 0x545   : > { %8356 = vmatmul.mubr.f32.gmra.mrb[16].mxu1 %v5265_v42  ;;  %v5904_v42 = vld [vmem:[%s10007_s12 + $0x28] sm:$0xff] }
 0x546   : > { %8358 = vmatprep.mubr.f32.mxu1 %v5266_v0 }
 0x549   : > { %8359 = vmatmul.mubr.f32.gmra.mrb[18].mxu1 %v5267_v23 }
 0x54a   : > { %8361 = vmatprep.mubr.f32.mxu1 %v5268_v47 }
 0x54d   : > { %8362 = vmatmul.mubr.f32.gmra.mrb[20].mxu1 %v5269_v21  ;;  %v5903_v21 = vld [vmem:[%s10007_s12 + $0x20] sm:$0xff] }
 0x54e   : > { %8364 = vmatprep.mubr.f32.mxu1 %v5270_v11 }
 0x551   : > { %8365 = vmatmul.mubr.f32.gmra.mrb[22].mxu1 %v5271_v55 }
 0x552   : > { %8367 = vmatprep.mubr.f32.mxu1 %v5272_v19 }
 0x555   : > { %8368 = vmatmul.mubr.f32.gmra.mrb[24].mxu1 %v5273_v39 }
 0x556   : > { %8370 = vmatprep.mubr.f32.mxu1 %v5274_v41 }
 0x559   : > { %8371 = vmatmul.mubr.f32.gmra.mrb[26].mxu1 %v5275_v2  ;;  %v5906_v2 = vld [vmem:[%s10007_s12 + $0x38] sm:$0xff] }
 0x55a   : > { %8373 = vmatprep.mubr.f32.mxu1 %v5276_v36 }
 0x55d   : > { %8374 = vmatmul.mubr.f32.gmra.mrb[28].mxu1 %v5277_v63 }
 0x55e   : > { %8376 = vmatprep.mubr.f32.mxu1 %v9622_v6 }
 0x561   : > { %8377 = vmatmul.mubr.f32.gmra.mrb[30].mxu1 %v9622_v6 }
 0x562   : > { %8411 = vmatprep.mubr.f32.mxu1 %v5554_v61  ;;  %v5905_v61 = vld [vmem:[%s10007_s12 + $0x30] sm:$0xff] }
 0x565   : > { %8412 = vmatmul.mubr.f32.vlgmr.msra.gmra.mrb[0].mxu1 %v5555_v31 }
 0x566   : > { %8414 = vmatprep.mubr.f32.mxu1 %v5556_v46 }
 0x569   : > { %8415 = vmatmul.mubr.f32.gmra.mrb[2].mxu1 %v5557_v49 }
 0x56a   : > { %8417 = vmatprep.mubr.f32.mxu1 %v5558_v40 }
 0x56d   : > { %8418 = vmatmul.mubr.f32.gmra.mrb[4].mxu1 %v5559_v13 }
 0x56e   : > { %8420 = vmatprep.mubr.f32.mxu1 %v5560_v7  ;;  %v5908_v7 = vld [vmem:[%s10007_s12 + $0x48] sm:$0xff] }
 0x571   : > { %8421 = vmatmul.mubr.f32.gmra.mrb[6].mxu1 %v5561_v56 }
 0x572   : > { %8423 = vmatprep.mubr.f32.mxu1 %v5562_v18 }
 0x575   : > { %8424 = vmatmul.mubr.f32.gmra.mrb[8].mxu1 %v5563_v24 }
 0x576   : > { %8426 = vmatprep.mubr.f32.mxu1 %v5564_v27  ;;  %v5907_v27 = vld [vmem:[%s10007_s12 + $0x40] sm:$0xff] }
 0x579   : > { %8427 = vmatmul.mubr.f32.gmra.mrb[10].mxu1 %v5565_v28 }
 0x57a   : > { %8429 = vmatprep.mubr.f32.mxu1 %v5566_v33 }
 0x57d   : > { %8430 = vmatmul.mubr.f32.gmra.mrb[12].mxu1 %v5567_v34 }
 0x57e   : > { %8432 = vmatprep.mubr.f32.mxu1 %v5568_v57 }
 0x581   : > { %8433 = vmatmul.mubr.f32.gmra.mrb[14].mxu1 %v5569_v25 }
 0x582   : > { %8435 = vmatprep.mubr.f32.mxu1 %v5570_v5  ;;  %v5910_v5 = vld [vmem:[%s10007_s12 + $0x58] sm:$0xff] }
 0x585   : > { %8436 = vmatmul.mubr.f32.gmra.mrb[16].mxu1 %v5571_v62 }
 0x586   : > { %8438 = vmatprep.mubr.f32.mxu1 %v5572_v3 }
 0x589   : > { %8439 = vmatmul.mubr.f32.gmra.mrb[18].mxu1 %v5573_v8 }
 0x58a   : > { %8441 = vmatprep.mubr.f32.mxu1 %v5574_v48  ;;  %v5909_v48 = vld [vmem:[%s10007_s12 + $0x50] sm:$0xff] }
 0x58d   : > { %8442 = vmatmul.mubr.f32.gmra.mrb[20].mxu1 %v5575_v20 }
 0x58e   : > { %8444 = vmatprep.mubr.f32.mxu1 %v5576_v53 }
 0x591   : > { %8445 = vmatmul.mubr.f32.gmra.mrb[22].mxu1 %v5577_v54 }
 0x592   : > { %8447 = vmatprep.mubr.f32.mxu1 %v5578_v52 }
 0x595   : > { %8448 = vmatmul.mubr.f32.gmra.mrb[24].mxu1 %v5579_v32 }
 0x596   : > { %8450 = vmatprep.mubr.f32.mxu1 %v5580_v43  ;;  %v5912_v43 = vld [vmem:[%s10007_s12 + $0x68] sm:$0xff] }
 0x599   : > { %8451 = vmatmul.mubr.f32.gmra.mrb[26].mxu1 %v5581_v37 }
 0x59a   : > { %8453 = vmatprep.mubr.f32.mxu1 %v10962_v14  ;;  %v5899_v14 = vld [vmem:[%s10007_s12] sm:$0xff] }
 0x59d   : > { %8454 = vmatmul.mubr.f32.gmra.mrb[28].mxu1 %v10965_v12 }
 0x59e   : > { %8456 = vmatprep.mubr.f32.mxu1 %v5584_v26 }
 0x5a1   : > { %8457 = vmatmul.mubr.f32.gmra.mrb[30].mxu1 %v5585_v59 }
 0x638   : > { %v8413_v60 = vpop.f32.mrb[0].mxu1 }
 0x639   : > { %v5868_v10 = vadd.f32 %v8413_v60, %v11012_v1  ;;  %v5669_v50 = vpop.f32.mrb[1].mxu1  ;;  %v5911_v60 = vld [vmem:[%s10007_s12 + $0x60] sm:$0xff] }
 0x63a   : > { %v5867_v44 = vadd.f32 %v11012_v1, %v5669_v50 }
 0x63b   : > { %v5932_v51 = vadd.f32 %v5900_v9, %v5868_v10 }
 0x63c   : > { %v5931_v12 = vadd.f32 %v5899_v14, %v5867_v44  ;;  %v8416_v45 = vpop.f32.mrb[2].mxu1 }
 0x63d   : > { %v5964_v15 = vmax.f32 %v5932_v51, 0.0  ;;  %v5870_v16 = vadd.f32 %v8416_v45, %v11012_v1  ;;  %v5679_v22 = vpop.f32.mrb[3].mxu1  ;;  %v5914_v51 = vld [vmem:[%s10007_s12 + $0x78] sm:$0xff] }
 0x63e   : > { %v5963_v30 = vmax.f32 %v5931_v12, 0.0  ;;  %v5869_v29 = vadd.f32 %v11012_v1, %v5679_v22 }
 0x63f   : > { %5996 = vst [vmem:[%s11024_s10 + $0x8] sm:$0xff] %v5964_v15  ;;  %v5934_v4 = vadd.f32 %v5902_v58, %v5870_v16  ;;  %v5913_v15 = vld [vmem:[%s10007_s12 + $0x70] sm:$0xff] }
 0x640   : > { %5995 = vst [vmem:[%s11024_s10] sm:$0xff] %v5963_v30  ;;  %v5933_v35 = vadd.f32 %v5901_v38, %v5869_v29  ;;  %v8419_v17 = vpop.f32.mrb[4].mxu1 }
 0x641   : > { %v5966_v0 = vmax.f32 %v5934_v4, 0.0  ;;  %v5872_v23 = vadd.f32 %v8419_v17, %v11012_v1  ;;  %v5689_v47 = vpop.f32.mrb[5].mxu1  ;;  %v5916_v4 = vld [vmem:[%s10007_s12 + $0x88] sm:$0xff] }
 0x642   : > { %v5965_v11 = vmax.f32 %v5933_v35, 0.0  ;;  %v5871_v55 = vadd.f32 %v11012_v1, %v5689_v47 }
 0x643   : > { %5998 = vst [vmem:[%s11024_s10 + $0x18] sm:$0xff] %v5966_v0  ;;  %v5936_v19 = vadd.f32 %v5904_v42, %v5872_v23  ;;  %v5915_v0 = vld [vmem:[%s10007_s12 + $0x80] sm:$0xff] }
 0x644   : > { %5997 = vst [vmem:[%s11024_s10 + $0x10] sm:$0xff] %v5965_v11  ;;  %v5935_v39 = vadd.f32 %v5903_v21, %v5871_v55  ;;  %v8422_v41 = vpop.f32.mrb[6].mxu1 }
 0x645   : > { %v5968_v36 = vmax.f32 %v5936_v19, 0.0  ;;  %v5874_v63 = vadd.f32 %v8422_v41, %v11012_v1  ;;  %v5699_v6 = vpop.f32.mrb[7].mxu1  ;;  %v5918_v19 = vld [vmem:[%s10007_s12 + $0x98] sm:$0xff] }
 0x646   : > { %v5967_v31 = vmax.f32 %v5935_v39, 0.0  ;;  %v5873_v46 = vadd.f32 %v11012_v1, %v5699_v6 }
 0x647   : > { %6000 = vst [vmem:[%s11024_s10 + $0x28] sm:$0xff] %v5968_v36  ;;  %v5938_v49 = vadd.f32 %v5906_v2, %v5874_v63  ;;  %v5917_v36 = vld [vmem:[%s10007_s12 + $0x90] sm:$0xff] }
 0x648   : > { %5999 = vst [vmem:[%s11024_s10 + $0x20] sm:$0xff] %v5967_v31  ;;  %v5937_v40 = vadd.f32 %v5905_v61, %v5873_v46  ;;  %v8425_v13 = vpop.f32.mrb[8].mxu1 }
 0x649   : > { %v5970_v56 = vmax.f32 %v5938_v49, 0.0  ;;  %v5876_v18 = vadd.f32 %v8425_v13, %v11012_v1  ;;  %v5709_v24 = vpop.f32.mrb[9].mxu1  ;;  %v5920_v49 = vld [vmem:[%s10007_s12 + $0xa8] sm:$0xff] }
 0x64a   : > { %v5969_v28 = vmax.f32 %v5937_v40, 0.0  ;;  %v5875_v33 = vadd.f32 %v11012_v1, %v5709_v24 }
 0x64b   : > { %6002 = vst [vmem:[%s11024_s10 + $0x38] sm:$0xff] %v5970_v56  ;;  %v5940_v34 = vadd.f32 %v5908_v7, %v5876_v18  ;;  %v5919_v56 = vld [vmem:[%s10007_s12 + $0xa0] sm:$0xff] }
 0x64c   : > { %6001 = vst [vmem:[%s11024_s10 + $0x30] sm:$0xff] %v5969_v28  ;;  %v5939_v57 = vadd.f32 %v5907_v27, %v5875_v33  ;;  %v8428_v25 = vpop.f32.mrb[10].mxu1 }
 0x64d   : > { %v5972_v62 = vmax.f32 %v5940_v34, 0.0  ;;  %v5878_v3 = vadd.f32 %v8428_v25, %v11012_v1  ;;  %v5719_v8 = vpop.f32.mrb[11].mxu1  ;;  %v5922_v34 = vld [vmem:[%s10007_s12 + $0xb8] sm:$0xff] }
 0x64e   : > { %v5971_v20 = vmax.f32 %v5939_v57, 0.0  ;;  %v5877_v53 = vadd.f32 %v11012_v1, %v5719_v8 }
 0x64f   : > { %6004 = vst [vmem:[%s11024_s10 + $0x48] sm:$0xff] %v5972_v62  ;;  %v5942_v54 = vadd.f32 %v5910_v5, %v5878_v3  ;;  %v5921_v62 = vld [vmem:[%s10007_s12 + $0xb0] sm:$0xff] }
 0x650   : > { %6003 = vst [vmem:[%s11024_s10 + $0x40] sm:$0xff] %v5971_v20  ;;  %v5941_v52 = vadd.f32 %v5909_v48, %v5877_v53  ;;  %v8431_v32 = vpop.f32.mrb[12].mxu1 }
 0x651   : > { %v5974_v37 = vmax.f32 %v5942_v54, 0.0  ;;  %v5880_v26 = vadd.f32 %v8431_v32, %v11012_v1  ;;  %v5729_v59 = vpop.f32.mrb[13].mxu1  ;;  %v5924_v54 = vld [vmem:[%s10007_s12 + $0xc8] sm:$0xff] }
 0x652   : > { %v5973_v9 = vmax.f32 %v5941_v52, 0.0  ;;  %v5879_v10 = vadd.f32 %v11012_v1, %v5729_v59 }
 0x653   : > { %6006 = vst [vmem:[%s11024_s10 + $0x58] sm:$0xff] %v5974_v37  ;;  %v5944_v50 = vadd.f32 %v5912_v43, %v5880_v26  ;;  %v5923_v37 = vld [vmem:[%s10007_s12 + $0xc0] sm:$0xff] }
 0x654   : > { %6005 = vst [vmem:[%s11024_s10 + $0x50] sm:$0xff] %v5973_v9  ;;  %v5943_v14 = vadd.f32 %v5911_v60, %v5879_v10  ;;  %v8434_v44 = vpop.f32.mrb[14].mxu1 }
 0x655   : > { %v5976_v12 = vmax.f32 %v5944_v50, 0.0  ;;  %v5882_v45 = vadd.f32 %v8434_v44, %v11012_v1  ;;  %v5739_v58 = vpop.f32.mrb[15].mxu1  ;;  %v5926_v50 = vld [vmem:[%s10007_s12 + $0xd8] sm:$0xff] }
 0x656   : > { %v5975_v16 = vmax.f32 %v5943_v14, 0.0  ;;  %v5881_v22 = vadd.f32 %v11012_v1, %v5739_v58 }
 0x657   : > { %6008 = vst [vmem:[%s11024_s10 + $0x68] sm:$0xff] %v5976_v12  ;;  %v5946_v38 = vadd.f32 %v5914_v51, %v5882_v45  ;;  %v5925_v12 = vld [vmem:[%s10007_s12 + $0xd0] sm:$0xff] }
 0x658   : > { %6007 = vst [vmem:[%s11024_s10 + $0x60] sm:$0xff] %v5975_v16  ;;  %v5945_v30 = vadd.f32 %v5913_v15, %v5881_v22  ;;  %v8437_v29 = vpop.f32.mrb[16].mxu1 }
 0x659   : > { %v5978_v35 = vmax.f32 %v5946_v38, 0.0  ;;  %v5884_v17 = vadd.f32 %v8437_v29, %v11012_v1  ;;  %v5749_v42 = vpop.f32.mrb[17].mxu1  ;;  %v5928_v38 = vld [vmem:[%s10007_s12 + $0xe8] sm:$0xff] }
 0x65a   : > { %v5977_v23 = vmax.f32 %v5945_v30, 0.0  ;;  %v5883_v47 = vadd.f32 %v11012_v1, %v5749_v42 }
 0x65b   : > { %6010 = vst [vmem:[%s11024_s10 + $0x78] sm:$0xff] %v5978_v35  ;;  %v5948_v21 = vadd.f32 %v5916_v4, %v5884_v17  ;;  %v5927_v35 = vld [vmem:[%s10007_s12 + $0xe0] sm:$0xff] }
 0x65c   : > { %6009 = vst [vmem:[%s11024_s10 + $0x70] sm:$0xff] %v5977_v23  ;;  %v5947_v11 = vadd.f32 %v5915_v0, %v5883_v47  ;;  %v8440_v55 = vpop.f32.mrb[18].mxu1 }
 0x65d   : > { %v5980_v39 = vmax.f32 %v5948_v21, 0.0  ;;  %v5886_v41 = vadd.f32 %v8440_v55, %v11012_v1  ;;  %v5759_v2 = vpop.f32.mrb[19].mxu1  ;;  %v5930_v21 = vld [vmem:[%s10007_s12 + $0xf8] sm:$0xff] }
 0x65e   : > { %v5979_v63 = vmax.f32 %v5947_v11, 0.0  ;;  %v5885_v6 = vadd.f32 %v11012_v1, %v5759_v2 }
 0x65f   : > { %6012 = vst [vmem:[%s11024_s10 + $0x88] sm:$0xff] %v5980_v39  ;;  %v5950_v61 = vadd.f32 %v5918_v19, %v5886_v41  ;;  %v5929_v39 = vld [vmem:[%s10007_s12 + $0xf0] sm:$0xff] }
 0x660   : > { %6011 = vst [vmem:[%s11024_s10 + $0x80] sm:$0xff] %v5979_v63  ;;  %v5949_v31 = vadd.f32 %v5917_v36, %v5885_v6  ;;  %v8443_v46 = vpop.f32.mrb[20].mxu1 }
 0x661   : > { %v5982_v40 = vmax.f32 %v5950_v61, 0.0  ;;  %v5888_v13 = vadd.f32 %v8443_v46, %v11012_v1  ;;  %v5769_v7 = vpop.f32.mrb[21].mxu1 }
 0x662   : > { %v5981_v18 = vmax.f32 %v5949_v31, 0.0  ;;  %v5887_v24 = vadd.f32 %v11012_v1, %v5769_v7 }
 0x663   : > { %6014 = vst [vmem:[%s11024_s10 + $0x98] sm:$0xff] %v5982_v40  ;;  %v5952_v27 = vadd.f32 %v5920_v49, %v5888_v13 }
 0x664   : > { %6013 = vst [vmem:[%s11024_s10 + $0x90] sm:$0xff] %v5981_v18  ;;  %v5951_v28 = vadd.f32 %v5919_v56, %v5887_v24  ;;  %v8446_v33 = vpop.f32.mrb[22].mxu1 }
 0x665   : > { %v5984_v57 = vmax.f32 %v5952_v27, 0.0  ;;  %v5890_v25 = vadd.f32 %v8446_v33, %v11012_v1  ;;  %v5779_v5 = vpop.f32.mrb[23].mxu1 }
 0x666   : > { %v5983_v3 = vmax.f32 %v5951_v28, 0.0  ;;  %v5889_v8 = vadd.f32 %v11012_v1, %v5779_v5 }
 0x667   : > { %6016 = vst [vmem:[%s11024_s10 + $0xa8] sm:$0xff] %v5984_v57  ;;  %v5954_v48 = vadd.f32 %v5922_v34, %v5890_v25 }
 0x668   : > { %6015 = vst [vmem:[%s11024_s10 + $0xa0] sm:$0xff] %v5983_v3  ;;  %v5953_v20 = vadd.f32 %v5921_v62, %v5889_v8  ;;  %v8449_v53 = vpop.f32.mrb[24].mxu1 }
 0x669   : > { %v5986_v52 = vmax.f32 %v5954_v48, 0.0  ;;  %v5892_v32 = vadd.f32 %v8449_v53, %v11012_v1  ;;  %v5789_v43 = vpop.f32.mrb[25].mxu1 }
 0x66a   : > { %v5985_v26 = vmax.f32 %v5953_v20, 0.0  ;;  %v5891_v59 = vadd.f32 %v11012_v1, %v5789_v43 }
 0x66b   : > { %6018 = vst [vmem:[%s11024_s10 + $0xb8] sm:$0xff] %v5986_v52  ;;  %v5956_v60 = vadd.f32 %v5924_v54, %v5892_v32 }
 0x66c   : > { %6017 = vst [vmem:[%s11024_s10 + $0xb0] sm:$0xff] %v5985_v26  ;;  %v5955_v9 = vadd.f32 %v5923_v37, %v5891_v59  ;;  %v8452_v10 = vpop.f32.mrb[26].mxu1 }
 0x66d   : > { %v5988_v14 = vmax.f32 %v5956_v60, 0.0  ;;  %v5894_v44 = vadd.f32 %v8452_v10, %v11012_v1  ;;  %v5799_v51 = vpop.f32.mrb[27].mxu1 }
 0x66e   : > { %v5987_v45 = vmax.f32 %v5955_v9, 0.0  ;;  %v5893_v58 = vadd.f32 %v11012_v1, %v5799_v51 }
 0x66f   : > { %6020 = vst [vmem:[%s11024_s10 + $0xc8] sm:$0xff] %v5988_v14  ;;  %v5958_v15 = vadd.f32 %v5926_v50, %v5894_v44 }
 0x670   : > { %6019 = vst [vmem:[%s11024_s10 + $0xc0] sm:$0xff] %v5987_v45  ;;  %v5957_v16 = vadd.f32 %v5925_v12, %v5893_v58  ;;  %v8455_v22 = vpop.f32.mrb[28].mxu1 }
 0x671   : > { %v5990_v30 = vmax.f32 %v5958_v15, 0.0  ;;  %v5896_v29 = vadd.f32 %v8455_v22, %v11012_v1  ;;  %v5809_v4 = vpop.f32.mrb[29].mxu1 }
 0x672   : > { %v5989_v17 = vmax.f32 %v5957_v16, 0.0  ;;  %v5895_v42 = vadd.f32 %v11012_v1, %v5809_v4 }
 0x673   : > { %6022 = vst [vmem:[%s11024_s10 + $0xd8] sm:$0xff] %v5990_v30  ;;  %v5960_v0 = vadd.f32 %v5928_v38, %v5896_v29 }
 0x674   : > { %6021 = vst [vmem:[%s11024_s10 + $0xd0] sm:$0xff] %v5989_v17  ;;  %v5959_v23 = vadd.f32 %v5927_v35, %v5895_v42  ;;  %v8458_v47 = vpop.f32.mrb[30].mxu1 }
 0x675   : > { %v5992_v11 = vmax.f32 %v5960_v0, 0.0  ;;  %v5898_v55 = vadd.f32 %v8458_v47, %v11012_v1  ;;  %v5819_v19 = vpop.f32.mrb[31].mxu1 }
 0x676   : > { %v5991_v41 = vmax.f32 %v5959_v23, 0.0  ;;  %v5897_v2 = vadd.f32 %v11012_v1, %v5819_v19 }
 0x677   : > { %6024 = vst [vmem:[%s11024_s10 + $0xe8] sm:$0xff] %v5992_v11  ;;  %v5962_v36 = vadd.f32 %v5930_v21, %v5898_v55 }
 0x678   : > { %6023 = vst [vmem:[%s11024_s10 + $0xe0] sm:$0xff] %v5991_v41  ;;  %v5961_v63 = vadd.f32 %v5929_v39, %v5897_v2 }
 0x679   : > { %v5994_v6 = vmax.f32 %v5962_v36, 0.0 }
 0x67a   : > { %v5993_v61 = vmax.f32 %v5961_v63, 0.0 }
 0x67b   : > { %6026 = vst [vmem:[%s11024_s10 + $0xf8] sm:$0xff] %v5994_v6 }
 0x67c   : > { %6025 = vst [vmem:[%s11024_s10 + $0xf0] sm:$0xff] %v5993_v61 }
 0x67d   : > { %9722 = shalt.err (!%p9719_p1)
}
 0x67e   : > { %s9723_s12 = scalar_lea.hbm %s11117_s11, 4096  ;;  %s9727_s15 = scalar_lea.hbm %s11170_s5, 8192 }
 0x67f   : > { %p9724_p13 = scmp.ne.s32.totalorder %s11117_s11, %s9723_s12  ;;  %p9728_p4 = scmp.lt.u32.totalorder %s11117_s11, %s11170_s5 }
 0x680   : > { %p9729_p5 = scmp.lt.u32.totalorder %s9727_s15, %s9723_s12  ;;  %p9731_p11 = scmp.lt.u32.totalorder %s9723_s12, %s11117_s11 }
 0x681   : > { %p9725_p6 = pnand %p9724_p13, %p11410_p0 }
 0x682   : > { %p9730_p8 = por %p9729_p5, %p9728_p4 }
 0x683   : > { %p9726_p10 = pneg %p9725_p6 }
 0x684   : > { %p9732_p2 = por %p9731_p11, %p9730_p8 }
 0x686   : > { %p9733_p3 = pnand %p9732_p2, %p9726_p10 }
 0x688   : > { %9736 = shalt.err (!%p9733_p3)
}
 0x689   : > { %s9788_s28 = smov 128   ;;  %s9789_s9 = smov 8  }
 0x68a   : > { %9557 = dma.vmem_to_hbm [thread:$0]  (%p11410_p0), %s11119_s13, 4096, %s11117_s11, %s6028_s22, %s9788_s28, %s9788_s28, %s9789_s9  }
 0x68b PF: > { %s6056_s30 = sand.u32 1, %s9767_s18   ;;  %p11411_p7 = scmp.ne.s32.totalorder %s11251_s25, 0 }
 0x68c   : > { %p11412_p9 = scmp.ge.s32.totalorder %s9779_s21, 2  ;;  %s6057_s17 = scalar_lea.sflag [#allocation5], %s6056_s30 }
 0x68e   : > { %p9571_p12 = pnand %p11412_p9, %p11411_p7 }
 0x690   : > { %9762 = dma.done.wait (!%p9571_p12), %s6057_s17, 4096  }
 0x691   : > { %9764 = vsyncadd (!%p9571_p12), %s6057_s17, 4294963200  ;;  %p19_p1 = scmp.ge.s32.totalorder %s9936_s29, 4   ;;  %s11413_s18 = smov %s9771_s19 }
 0x692   : > { %s11414_s19 = smov %s9775_s20  ;;  %s11415_s20 = smov %s9952_s27 }
 0x693   : > { %s11416_s21 = smov %s9936_s29  ;;  %21 = sbr.rel (!%p19_p1) target bundleno = 6 (0x6), region = 112 }
 0x69a   :  { %6062 = vsyncpa [#allocation4], 1 }
 0x69b   :  { %6064 = vsyncpa [#allocation4 + $0x1], 1 }
 0x69c   :  { %6065 = vsyncpa [#allocation7], 1 }
 0x69d   :  { %6066 = vsyncpa [#allocation5], 1 }
 0x69e   :  { %6068 = vsyncpa [#allocation5 + $0x1], 1 }

</bundles_post_ra>
